<compile_context>
chip_gen: v7x
topology: tpu7x:2x2x1
jax: 0.10.0
libtpu: 0.0.40
codegen_flags: <defaults>
</compile_context>

<pallas_src>
import math
from functools import partial

import numpy as np
import jax
import jax.numpy as jnp
from jax.experimental import pallas as pl
from jax.experimental.pallas import tpu as pltpu


# ----------------------------------------------------------------------------
# host-side helpers
# ----------------------------------------------------------------------------
def _adaptive_windows(in_size, out_size):
    starts = [(i * in_size) // out_size for i in range(out_size)]
    ends = [math.ceil((i + 1) * in_size / out_size) for i in range(out_size)]
    return starts, ends


def _adaptive_pool_matrix(in_size, out_size):
    """AdaptiveAvgPool1d as an (in, out) matrix (applied as x @ P)."""
    s, e = _adaptive_windows(in_size, out_size)
    p = np.zeros((in_size, out_size), np.float32)
    for j in range(out_size):
        p[s[j]:e[j], j] = 1.0 / (e[j] - s[j])
    return p


def _mish(z):
    # x * tanh(softplus(x)), numerically stable softplus (exp/tanh -> EUP slot)
    sp = jnp.maximum(z, 0.0) + jnp.log(1.0 + jnp.exp(-jnp.abs(z)))
    return z * jnp.tanh(sp)


# ----------------------------------------------------------------------------
# the single fused Pallas kernel (one grid step == `bt_n` batch elements)
# ----------------------------------------------------------------------------
def _encoder_kernel(ks, mid, bout, wrow, nf, bt_n, lin_specs, *refs):
    it = iter(refs)
    x_ref = next(it)                                       # (Bt, Cin, NF) f32
    wcp_ref = next(it)                                     # (n*mid+bout, Cin) bf16
    subs = [tuple(next(it) for _ in range(4)) for _ in ks]  # w1, w2, bn, wo_pad
    bres_ref = next(it)                                    # (bout, 1) f32
    p2_ref = next(it)                                      # (NF, 25) bf16
    tile_ref = next(it)                                    # (25, 125) f32
    wde_ref = next(it)                                     # (bout, 125) f32
    bde_ref = next(it)                                     # (1, 125) f32
    wlin_ref = next(it)                                    # (125, sum 2*down) f32
    bsh_ref = next(it)                                     # (1, sum down) f32
    o_ref = next(it)                                       # (Bt, bout, NF) f32

    n_sub = len(ks)
    bf16 = jnp.bfloat16
    f32 = jnp.float32

    def shift(a, d):
        # result[:, f] = a[:, f + d]   (pltpu.roll == jnp.roll semantics => shift by -d)
        if d == 0:
            return a
        return pltpu.roll(a, (-d) % nf, axis=1)

    wcp = wcp_ref[...]
    bres = bres_ref[...]
    p2 = p2_ref[...]
    tile25 = tile_ref[...]
    wde = wde_ref[...]
    bde = bde_ref[...]

    for bt in range(bt_n):
        x4 = x_ref[bt].astype(bf16)                                  # (Cin, NF)

        # fused 1x1 projections: both input_compress weights + passthrough, one push
        proj = jnp.dot(wcp, x4, preferred_element_type=f32)          # (n*mid+bout, NF)

        # passthrough + fused (output_compress bias + passthrough bias)
        x_res = proj[n_sub * mid:n_sub * mid + bout, :] + bres       # (bout, NF)

        # ---- CodecMultiKernelBlock sub-blocks (separable convs) --------------
        for i, k in enumerate(ks):
            w1_ref, w2_ref, bn_ref, wo_ref = subs[i]
            p = k // 2
            h = proj[i * mid:(i + 1) * mid, :]                       # (mid, NF) f32
            # (1,k) conv along W: k lane-rolled matmuls accumulated in f32
            y1 = jnp.zeros((mid, nf), f32)
            for t in range(k):
                ht = shift(h, t - p).astype(bf16)
                y1 = y1 + jnp.dot(w1_ref[t], ht, preferred_element_type=f32)
            # (k,1) conv along H: lane rolls by whole padded rows
            y2 = jnp.zeros((mid, nf), f32)
            for t in range(k):
                yt = shift(y1, (t - p) * wrow).astype(bf16)
                y2 = y2 + jnp.dot(w2_ref[t], yt, preferred_element_type=f32)
            bn = bn_ref[...]                                         # (mid, 2)
            z = _mish(y2 * bn[:, 0:1] + bn[:, 1:2])                  # eval-mode BN + Mish
            # output_compress with zero-row-padded weight -> lands in its channel slice
            x_res = x_res + jnp.dot(wo_ref[...], z.astype(bf16),
                                    preferred_element_type=f32)

        # ---- PoolSelector -----------------------------------------------------
        # AdaptiveAvgPool2d(5) as one matmul over the resident plane
        pooled5 = jnp.dot(x_res.astype(bf16), p2, preferred_element_type=f32)  # (bout, 25)
        # conv_down (1x1, bias) + NCHW channel-major flatten:
        # tile spatial 5x (tiny matmul), weight-expand multiply, sublane reduce.
        p5t = jnp.dot(pooled5, tile25, preferred_element_type=f32)              # (bout, 125)
        hvec = jnp.sum(p5t * wde, axis=0, keepdims=True) + bde                  # (1, 125)

        # ResLinearBlock chain: one fused [W*bn_scale | avgpool] push per level
        hv = hvec
        sel = None
        for (n_in, dwn, coff, soff, last) in lin_specs:
            wl = wlin_ref[0:n_in, coff:coff + 2 * dwn]
            r = jnp.dot(hv, wl, preferred_element_type=f32)          # (1, 2*dwn)
            z = r[:, 0:dwn] + bsh_ref[:, soff:soff + dwn]            # eval-mode BN shift
            if last:
                sel = 1.0 / (1.0 + jnp.exp(-z))                      # sigmoid, no residual
            else:
                hv = _mish(z) + r[:, dwn:2 * dwn]                    # Mish + avgpool residual
        sel_s = sel[0, 0]

        # ---- fused 2x2 AvgPool / MaxPool + selector blend ---------------------
        # Valid at the top-left corner of every 2x2 window (interior pixels only);
        # the wrapper strided-slices exactly those positions.
        xb = shift(x_res, 1)
        xc = shift(x_res, wrow)
        xd = shift(x_res, wrow + 1)
        avg = (x_res + xb + xc + xd) * 0.25
        mx = jnp.maximum(jnp.maximum(x_res, xb), jnp.maximum(xc, xd))
        o_ref[bt] = avg * sel_s + mx * (1.0 - sel_s)                 # (bout, NF), lane-dense


# ----------------------------------------------------------------------------
# wrapper: parameter plumbing + single pallas_call
# ----------------------------------------------------------------------------
def encoder_layer_forward(x_nchw, params, *, batch_block=1):
    B, Cin, H, W = x_nchw.shape
    pmax = params["pmax"]
    HP, WP = H + 2 * pmax, W + 2 * pmax
    NF = ((HP * WP + 127) // 128) * 128
    mid, bout = params["mid"], params["bout"]
    ks = params["ks"]
    Bt = batch_block
    assert B % Bt == 0, "batch_block must divide batch"

    # NCHW kept as-is (channels on sublanes, flat padded spatial on lanes): no transpose.
    xpad = jnp.pad(x_nchw.astype(jnp.float32),
                   ((0, 0), (0, 0), (pmax, pmax), (pmax, pmax)))
    xflat = xpad.reshape(B, Cin, HP * WP)
    xflat = jnp.pad(xflat, ((0, 0), (0, 0), (0, NF - HP * WP)))

    flat = [xflat, params["wcp"]]
    for sp in params["subblocks"]:
        flat += [sp["w1"], sp["w2"], sp["bn"], sp["wo_pad"]]
    flat += [params["bias_res"], params["p2"], params["tile"],
             params["wde"], params["bde"], params["wlin"], params["bshift"]]

    def _full_spec(a):
        nd = a.ndim
        return pl.BlockSpec(a.shape, lambda b, _nd=nd: (0,) * _nd)

    in_specs = [pl.BlockSpec((Bt, Cin, NF), lambda b: (b, 0, 0))]
    in_specs += [_full_spec(a) for a in flat[1:]]

    out_full = pl.pallas_call(
        partial(_encoder_kernel, ks, mid, bout, WP, NF, Bt, params["lin_specs"]),
        out_shape=jax.ShapeDtypeStruct((B, bout, NF), jnp.float32),
        grid=(B // Bt,),
        in_specs=in_specs,
        out_specs=pl.BlockSpec((Bt, bout, NF), lambda b: (b, 0, 0)),
        compiler_params=pltpu.CompilerParams(dimension_semantics=("parallel",)),
    )(*flat)

    # Channel-major, lane-dense kernel output -> NCHW via a metadata reshape and a
    # tiny strided slice that picks the top-left corner of each 2x2 window (where
    # the blended pooled value was computed in-kernel). No transpose anywhere.
    full = out_full[:, :, :HP * WP].reshape(B, bout, HP, WP)
    return full[:, :, pmax:pmax + H:2, pmax:pmax + W:2]


# ----------------------------------------------------------------------------
# deterministic parameter init (synthetic; shapes from the module __init__)
# ----------------------------------------------------------------------------
def init_params(key, in_ch=4, mid_ch=8, out_ch=16, kernels=(3, 5), H=16, W=16):
    eps = 1e-5
    # CodecMultiKernelStack with stacks == 1 builds
    #   CodecMultiKernelBlock(input_ch, middle_ch=output_ch, out_channels=mid_ch, kernels)
    middle = out_ch
    block_out = mid_ch
    n = len(kernels)
    out_each = [round(i * block_out / n) for i in range(n + 1)]
    pmax = max(kernels) // 2
    for k in kernels:
        assert k // 2 <= pmax, "flat lane-shift convolution requires k <= 2*pmax+1"
    HP, WP = H + 2 * pmax, W + 2 * pmax
    NF = ((HP * WP + 127) // 128) * 128

    keys = iter(jax.random.split(key, 64))

    def nrm(shape, scale):
        return np.asarray(jax.random.normal(next(keys), shape, jnp.float32)) * scale

    # --- fused 1x1 projections: [input_compress(k0); input_compress(k1); passthrough] ---
    wcp = np.zeros((n * middle + block_out, in_ch), np.float32)
    bias_res = np.zeros((block_out, 1), np.float32)
    subblocks = []
    for i, k in enumerate(kernels):
        oe = out_each[i + 1] - out_each[i]
        wc = (nrm((middle, in_ch), 1.0 / math.sqrt(in_ch))
              if in_ch != middle else np.eye(middle, dtype=np.float32))
        wcp[i * middle:(i + 1) * middle] = wc
        w1 = nrm((k, middle, middle), 1.0 / math.sqrt(middle * k))   # (1,k) conv taps
        w2 = nrm((k, middle, middle), 1.0 / math.sqrt(middle * k))   # (k,1) conv taps
        gamma = 1.0 + 0.1 * nrm((middle,), 1.0)
        beta = 0.1 * nrm((middle,), 1.0)
        bn = np.stack([gamma / math.sqrt(1.0 + eps), beta], axis=1)  # eval-mode BN folded
        wo = nrm((oe, middle), 1.0 / math.sqrt(middle))              # output_compress
        bo = 0.1 * nrm((oe,), 1.0)
        wo_pad = np.zeros((block_out, middle), np.float32)           # zero-row-padded
        wo_pad[out_each[i]:out_each[i + 1]] = wo
        bias_res[out_each[i]:out_each[i + 1], 0] += bo
        subblocks.append(dict(
            w1=jnp.asarray(w1, jnp.bfloat16),
            w2=jnp.asarray(w2, jnp.bfloat16),
            bn=jnp.asarray(bn, jnp.float32),
            wo_pad=jnp.asarray(wo_pad, jnp.bfloat16),
        ))
    if in_ch != block_out:                                           # passthrough 1x1
        wp = nrm((block_out, in_ch), 1.0 / math.sqrt(in_ch))
        bp = 0.1 * nrm((block_out,), 1.0)
    else:
        wp = np.eye(block_out, dtype=np.float32)
        bp = np.zeros((block_out,), np.float32)
    wcp[n * middle:] = wp
    bias_res[:, 0] += bp

    # --- PoolSelector(127): side = int(127 ** (1/3)) = 5 ---
    side = int(127 ** (1.0 / 3.0))
    hs, he = _adaptive_windows(H, side)
    ws, we = _adaptive_windows(W, side)
    p2 = np.zeros((NF, side * side), np.float32)      # AdaptiveAvgPool2d(5), interior only
    for i in range(side):
        for j in range(side):
            v = 1.0 / ((he[i] - hs[i]) * (we[j] - ws[j]))
            for h in range(hs[i], he[i]):
                for w in range(ws[j], we[j]):
                    p2[(h + pmax) * WP + (w + pmax), i * side + j] = v
    tile = np.tile(np.eye(side * side, dtype=np.float32), (1, side))     # (25, 125)
    wd = nrm((side, block_out), 1.0 / math.sqrt(block_out))              # conv_down 1x1
    bd = 0.1 * nrm((side,), 1.0)
    wde = np.repeat(wd.T, side * side, axis=1)                           # (block_out, 125)
    bde = np.repeat(bd, side * side)[None, :]                            # (1, 125)

    # --- ResLinearBlock chain packed as one [W*bn_scale | avgpool] slab ---
    lin_specs, w_cols, s_cols = [], [], []
    coff = soff = 0
    new = side ** 3
    while new >= 2:
        down = new // 2
        last = down == 1
        wt = nrm((new, down), 1.0 / math.sqrt(new))          # Linear (no bias), as x @ Wt
        gamma = 1.0 + 0.1 * nrm((down,), 1.0)
        beta = 0.1 * nrm((down,), 1.0)
        wcat = np.zeros((side ** 3, 2 * down), np.float32)
        wcat[:new, :down] = wt * (gamma / math.sqrt(1.0 + eps))[None, :]  # fold BN scale
        wcat[:new, down:] = _adaptive_pool_matrix(new, down)              # residual pool
        w_cols.append(wcat)
        s_cols.append(beta[None, :])
        lin_specs.append((int(new), int(down), int(coff), int(soff), bool(last)))
        coff += 2 * down
        soff += down
        if last:
            break
        new = down
    wlin = np.concatenate(w_cols, axis=1)                    # (125, sum 2*down)
    bshift = np.concatenate(s_cols, axis=1)                  # (1, sum down)

    return dict(
        ks=tuple(int(k) for k in kernels), mid=middle, bout=block_out, pmax=pmax,
        wcp=jnp.asarray(wcp, jnp.bfloat16),
        subblocks=subblocks,
        bias_res=jnp.asarray(bias_res, jnp.float32),
        p2=jnp.asarray(p2, jnp.bfloat16),
        tile=jnp.asarray(tile, jnp.float32),
        wde=jnp.asarray(wde, jnp.float32),
        bde=jnp.asarray(bde, jnp.float32),
        wlin=jnp.asarray(wlin, jnp.float32),
        bshift=jnp.asarray(bshift, jnp.float32),
        lin_specs=tuple(lin_specs),
    )


if __name__ == "__main__":
    key = jax.random.PRNGKey(0)
    pkey, xkey = jax.random.split(key)
    params = init_params(pkey)

    # PyTorch-style NCHW input: batch=2, channels=4, 16x16 spatial
    x = jax.random.normal(xkey, (2, 4, 16, 16), jnp.float32)

    fwd = jax.jit(lambda xx: encoder_layer_forward(xx, params))
    out = jax.block_until_ready(fwd(x))

    assert out.shape == (2, 8, 8, 8), out.shape            # (B, mid_ch, H/2, W/2)
    assert bool(jnp.all(jnp.isfinite(out)))
    print("KERNEL_OK")
</pallas_src>

<mosaic_0001>
module attributes {stable_mosaic.version = 11 : i64} {
  func.func @_encoder_kernel(%arg0: i32, %arg1: memref<1x4x512xf32, #tpu.memory_space<vmem>>, %arg2: memref<40x4xbf16, #tpu.memory_space<vmem>>, %arg3: memref<3x16x16xbf16, #tpu.memory_space<vmem>>, %arg4: memref<3x16x16xbf16, #tpu.memory_space<vmem>>, %arg5: memref<16x2xf32, #tpu.memory_space<vmem>>, %arg6: memref<8x16xbf16, #tpu.memory_space<vmem>>, %arg7: memref<5x16x16xbf16, #tpu.memory_space<vmem>>, %arg8: memref<5x16x16xbf16, #tpu.memory_space<vmem>>, %arg9: memref<16x2xf32, #tpu.memory_space<vmem>>, %arg10: memref<8x16xbf16, #tpu.memory_space<vmem>>, %arg11: memref<8x1xf32, #tpu.memory_space<vmem>>, %arg12: memref<512x25xbf16, #tpu.memory_space<vmem>>, %arg13: memref<25x125xf32, #tpu.memory_space<vmem>>, %arg14: memref<8x125xf32, #tpu.memory_space<vmem>>, %arg15: memref<1x125xf32, #tpu.memory_space<vmem>>, %arg16: memref<125x238xf32, #tpu.memory_space<vmem>>, %arg17: memref<1x119xf32, #tpu.memory_space<vmem>>, %arg18: memref<1x8x512xf32, #tpu.memory_space<vmem>>) attributes {dimension_semantics = [#tpu.dimension_semantics<parallel>], iteration_bounds = array<i64: 2>, scalar_prefetch = 0 : i64, scratch_operands = 0 : i64, tpu.core_type = #tpu.core_type<tc>, window_params = [{transform_indices = @transform_0, window_bounds = array<i64: 1, 4, 512>}, {pipeline_mode = #tpu.pipeline_mode<synchronous>, transform_indices = @transform_1, window_bounds = array<i64: 40, 4>}, {pipeline_mode = #tpu.pipeline_mode<synchronous>, transform_indices = @transform_2, window_bounds = array<i64: 3, 16, 16>}, {pipeline_mode = #tpu.pipeline_mode<synchronous>, transform_indices = @transform_3, window_bounds = array<i64: 3, 16, 16>}, {pipeline_mode = #tpu.pipeline_mode<synchronous>, transform_indices = @transform_4, window_bounds = array<i64: 16, 2>}, {pipeline_mode = #tpu.pipeline_mode<synchronous>, transform_indices = @transform_5, window_bounds = array<i64: 8, 16>}, {pipeline_mode = #tpu.pipeline_mode<synchronous>, transform_indices = @transform_6, window_bounds = array<i64: 5, 16, 16>}, {pipeline_mode = #tpu.pipeline_mode<synchronous>, transform_indices = @transform_7, window_bounds = array<i64: 5, 16, 16>}, {pipeline_mode = #tpu.pipeline_mode<synchronous>, transform_indices = @transform_8, window_bounds = array<i64: 16, 2>}, {pipeline_mode = #tpu.pipeline_mode<synchronous>, transform_indices = @transform_9, window_bounds = array<i64: 8, 16>}, {pipeline_mode = #tpu.pipeline_mode<synchronous>, transform_indices = @transform_10, window_bounds = array<i64: 8, 1>}, {pipeline_mode = #tpu.pipeline_mode<synchronous>, transform_indices = @transform_11, window_bounds = array<i64: 512, 25>}, {pipeline_mode = #tpu.pipeline_mode<synchronous>, transform_indices = @transform_12, window_bounds = array<i64: 25, 125>}, {pipeline_mode = #tpu.pipeline_mode<synchronous>, transform_indices = @transform_13, window_bounds = array<i64: 8, 125>}, {pipeline_mode = #tpu.pipeline_mode<synchronous>, transform_indices = @transform_14, window_bounds = array<i64: 1, 125>}, {pipeline_mode = #tpu.pipeline_mode<synchronous>, transform_indices = @transform_15, window_bounds = array<i64: 125, 238>}, {pipeline_mode = #tpu.pipeline_mode<synchronous>, transform_indices = @transform_16, window_bounds = array<i64: 1, 119>}, {transform_indices = @transform_17, window_bounds = array<i64: 1, 8, 512>}]} {
    %c0 = arith.constant 0 : index
    %c0_0 = arith.constant 0 : index
    %0 = vector.load %arg2[%c0, %c0_0] : memref<40x4xbf16, #tpu.memory_space<vmem>>, vector<40x4xbf16>
    %c0_1 = arith.constant 0 : index
    %c0_2 = arith.constant 0 : index
    %1 = vector.load %arg11[%c0_1, %c0_2] : memref<8x1xf32, #tpu.memory_space<vmem>>, vector<8x1xf32>
    %c0_3 = arith.constant 0 : index
    %c0_4 = arith.constant 0 : index
    %2 = vector.load %arg12[%c0_3, %c0_4] : memref<512x25xbf16, #tpu.memory_space<vmem>>, vector<512x25xbf16>
    %c0_5 = arith.constant 0 : index
    %c0_6 = arith.constant 0 : index
    %3 = vector.load %arg13[%c0_5, %c0_6] : memref<25x125xf32, #tpu.memory_space<vmem>>, vector<25x125xf32>
    %c0_7 = arith.constant 0 : index
    %c0_8 = arith.constant 0 : index
    %4 = vector.load %arg14[%c0_7, %c0_8] : memref<8x125xf32, #tpu.memory_space<vmem>>, vector<8x125xf32>
    %c0_9 = arith.constant 0 : index
    %c0_10 = arith.constant 0 : index
    %5 = vector.load %arg15[%c0_9, %c0_10] : memref<1x125xf32, #tpu.memory_space<vmem>>, vector<1x125xf32>
    %c0_11 = arith.constant 0 : index
    %c0_12 = arith.constant 0 : index
    %c0_13 = arith.constant 0 : index
    %6 = vector.load %arg1[%c0_11, %c0_12, %c0_13] : memref<1x4x512xf32, #tpu.memory_space<vmem>>, vector<1x4x512xf32>
    %7 = vector.shape_cast %6 : vector<1x4x512xf32> to vector<4x512xf32>
    %8 = arith.truncf %7 : vector<4x512xf32> to vector<4x512xbf16>
    %cst = arith.constant dense<0.000000e+00> : vector<40x512xf32>
    %9 = tpu.matmul %0, %8, %cst {dimension_numbers = #tpu.dot_dimension_numbers<[1], [0], [0], [1], [0, 0, 1, 1], [], []>} : vector<40x4xbf16>, vector<4x512xbf16>, vector<40x512xf32> -> vector<40x512xf32>
    %10 = vector.extract_strided_slice %9 {offsets = [32, 0], sizes = [8, 512], strides = [1, 1]} : vector<40x512xf32> to vector<8x512xf32>
    %11 = vector.broadcast %1 : vector<8x1xf32> to vector<8x512xf32>
    %12 = arith.addf %10, %11 : vector<8x512xf32>
    %13 = vector.extract_strided_slice %9 {offsets = [0, 0], sizes = [16, 512], strides = [1, 1]} : vector<40x512xf32> to vector<16x512xf32>
    %cst_14 = arith.constant 0.000000e+00 : f32
    %14 = vector.broadcast %cst_14 : f32 to vector<16x512xf32>
    %c1_i32 = arith.constant 1 : i32
    %15 = tpu.dynamic_rotate %13 by %c1_i32 dim 1 : vector<16x512xf32>, i32 -> vector<16x512xf32>
    %16 = arith.truncf %15 : vector<16x512xf32> to vector<16x512xbf16>
    %c0_15 = arith.constant 0 : index
    %c0_16 = arith.constant 0 : index
    %c0_17 = arith.constant 0 : index
    %17 = vector.load %arg3[%c0_15, %c0_16, %c0_17] : memref<3x16x16xbf16, #tpu.memory_space<vmem>>, vector<1x16x16xbf16>
    %18 = vector.shape_cast %17 : vector<1x16x16xbf16> to vector<16x16xbf16>
    %cst_18 = arith.constant dense<0.000000e+00> : vector<16x512xf32>
    %19 = tpu.matmul %18, %16, %cst_18 {dimension_numbers = #tpu.dot_dimension_numbers<[1], [0], [0], [1], [0, 0, 1, 1], [], []>} : vector<16x16xbf16>, vector<16x512xbf16>, vector<16x512xf32> -> vector<16x512xf32>
    %20 = arith.addf %14, %19 : vector<16x512xf32>
    %21 = arith.truncf %13 : vector<16x512xf32> to vector<16x512xbf16>
    %c1 = arith.constant 1 : index
    %c0_19 = arith.constant 0 : index
    %c0_20 = arith.constant 0 : index
    %22 = vector.load %arg3[%c1, %c0_19, %c0_20] : memref<3x16x16xbf16, #tpu.memory_space<vmem>>, vector<1x16x16xbf16>
    %23 = vector.shape_cast %22 : vector<1x16x16xbf16> to vector<16x16xbf16>
    %cst_21 = arith.constant dense<0.000000e+00> : vector<16x512xf32>
    %24 = tpu.matmul %23, %21, %cst_21 {dimension_numbers = #tpu.dot_dimension_numbers<[1], [0], [0], [1], [0, 0, 1, 1], [], []>} : vector<16x16xbf16>, vector<16x512xbf16>, vector<16x512xf32> -> vector<16x512xf32>
    %25 = arith.addf %20, %24 : vector<16x512xf32>
    %c511_i32 = arith.constant 511 : i32
    %26 = tpu.dynamic_rotate %13 by %c511_i32 dim 1 : vector<16x512xf32>, i32 -> vector<16x512xf32>
    %27 = arith.truncf %26 : vector<16x512xf32> to vector<16x512xbf16>
    %c2 = arith.constant 2 : index
    %c0_22 = arith.constant 0 : index
    %c0_23 = arith.constant 0 : index
    %28 = vector.load %arg3[%c2, %c0_22, %c0_23] : memref<3x16x16xbf16, #tpu.memory_space<vmem>>, vector<1x16x16xbf16>
    %29 = vector.shape_cast %28 : vector<1x16x16xbf16> to vector<16x16xbf16>
    %cst_24 = arith.constant dense<0.000000e+00> : vector<16x512xf32>
    %30 = tpu.matmul %29, %27, %cst_24 {dimension_numbers = #tpu.dot_dimension_numbers<[1], [0], [0], [1], [0, 0, 1, 1], [], []>} : vector<16x16xbf16>, vector<16x512xbf16>, vector<16x512xf32> -> vector<16x512xf32>
    %31 = arith.addf %25, %30 : vector<16x512xf32>
    %cst_25 = arith.constant 0.000000e+00 : f32
    %32 = vector.broadcast %cst_25 : f32 to vector<16x512xf32>
    %c20_i32 = arith.constant 20 : i32
    %33 = tpu.dynamic_rotate %31 by %c20_i32 dim 1 : vector<16x512xf32>, i32 -> vector<16x512xf32>
    %34 = arith.truncf %33 : vector<16x512xf32> to vector<16x512xbf16>
    %c0_26 = arith.constant 0 : index
    %c0_27 = arith.constant 0 : index
    %c0_28 = arith.constant 0 : index
    %35 = vector.load %arg4[%c0_26, %c0_27, %c0_28] : memref<3x16x16xbf16, #tpu.memory_space<vmem>>, vector<1x16x16xbf16>
    %36 = vector.shape_cast %35 : vector<1x16x16xbf16> to vector<16x16xbf16>
    %cst_29 = arith.constant dense<0.000000e+00> : vector<16x512xf32>
    %37 = tpu.matmul %36, %34, %cst_29 {dimension_numbers = #tpu.dot_dimension_numbers<[1], [0], [0], [1], [0, 0, 1, 1], [], []>} : vector<16x16xbf16>, vector<16x512xbf16>, vector<16x512xf32> -> vector<16x512xf32>
    %38 = arith.addf %32, %37 : vector<16x512xf32>
    %39 = arith.truncf %31 : vector<16x512xf32> to vector<16x512xbf16>
    %c1_30 = arith.constant 1 : index
    %c0_31 = arith.constant 0 : index
    %c0_32 = arith.constant 0 : index
    %40 = vector.load %arg4[%c1_30, %c0_31, %c0_32] : memref<3x16x16xbf16, #tpu.memory_space<vmem>>, vector<1x16x16xbf16>
    %41 = vector.shape_cast %40 : vector<1x16x16xbf16> to vector<16x16xbf16>
    %cst_33 = arith.constant dense<0.000000e+00> : vector<16x512xf32>
    %42 = tpu.matmul %41, %39, %cst_33 {dimension_numbers = #tpu.dot_dimension_numbers<[1], [0], [0], [1], [0, 0, 1, 1], [], []>} : vector<16x16xbf16>, vector<16x512xbf16>, vector<16x512xf32> -> vector<16x512xf32>
    %43 = arith.addf %38, %42 : vector<16x512xf32>
    %c492_i32 = arith.constant 492 : i32
    %44 = tpu.dynamic_rotate %31 by %c492_i32 dim 1 : vector<16x512xf32>, i32 -> vector<16x512xf32>
    %45 = arith.truncf %44 : vector<16x512xf32> to vector<16x512xbf16>
    %c2_34 = arith.constant 2 : index
    %c0_35 = arith.constant 0 : index
    %c0_36 = arith.constant 0 : index
    %46 = vector.load %arg4[%c2_34, %c0_35, %c0_36] : memref<3x16x16xbf16, #tpu.memory_space<vmem>>, vector<1x16x16xbf16>
    %47 = vector.shape_cast %46 : vector<1x16x16xbf16> to vector<16x16xbf16>
    %cst_37 = arith.constant dense<0.000000e+00> : vector<16x512xf32>
    %48 = tpu.matmul %47, %45, %cst_37 {dimension_numbers = #tpu.dot_dimension_numbers<[1], [0], [0], [1], [0, 0, 1, 1], [], []>} : vector<16x16xbf16>, vector<16x512xbf16>, vector<16x512xf32> -> vector<16x512xf32>
    %49 = arith.addf %43, %48 : vector<16x512xf32>
    %c0_38 = arith.constant 0 : index
    %c0_39 = arith.constant 0 : index
    %50 = vector.load %arg5[%c0_38, %c0_39] : memref<16x2xf32, #tpu.memory_space<vmem>>, vector<16x2xf32>
    %51 = vector.extract_strided_slice %50 {offsets = [0, 0], sizes = [16, 1], strides = [1, 1]} : vector<16x2xf32> to vector<16x1xf32>
    %52 = vector.broadcast %51 : vector<16x1xf32> to vector<16x512xf32>
    %53 = arith.mulf %49, %52 : vector<16x512xf32>
    %54 = vector.extract_strided_slice %50 {offsets = [0, 1], sizes = [16, 1], strides = [1, 1]} : vector<16x2xf32> to vector<16x1xf32>
    %55 = vector.broadcast %54 : vector<16x1xf32> to vector<16x512xf32>
    %56 = arith.addf %53, %55 : vector<16x512xf32>
    %cst_40 = arith.constant 0.000000e+00 : f32
    %57 = vector.broadcast %cst_40 : f32 to vector<16x512xf32>
    %58 = arith.maximumf %56, %57 : vector<16x512xf32>
    %59 = math.absf %56 : vector<16x512xf32>
    %cst_41 = arith.constant 0.000000e+00 : f32
    %60 = vector.broadcast %cst_41 : f32 to vector<16x512xf32>
    %61 = arith.subf %60, %59 : vector<16x512xf32>
    %62 = math.exp %61 : vector<16x512xf32>
    %cst_42 = arith.constant 1.000000e+00 : f32
    %63 = vector.broadcast %cst_42 : f32 to vector<16x512xf32>
    %64 = arith.addf %63, %62 : vector<16x512xf32>
    %65 = math.log %64 : vector<16x512xf32>
    %66 = arith.addf %58, %65 : vector<16x512xf32>
    %67 = math.tanh %66 : vector<16x512xf32>
    %68 = arith.mulf %56, %67 : vector<16x512xf32>
    %c0_43 = arith.constant 0 : index
    %c0_44 = arith.constant 0 : index
    %69 = vector.load %arg6[%c0_43, %c0_44] : memref<8x16xbf16, #tpu.memory_space<vmem>>, vector<8x16xbf16>
    %70 = arith.truncf %68 : vector<16x512xf32> to vector<16x512xbf16>
    %cst_45 = arith.constant dense<0.000000e+00> : vector<8x512xf32>
    %71 = tpu.matmul %69, %70, %cst_45 {dimension_numbers = #tpu.dot_dimension_numbers<[1], [0], [0], [1], [0, 0, 1, 1], [], []>} : vector<8x16xbf16>, vector<16x512xbf16>, vector<8x512xf32> -> vector<8x512xf32>
    %72 = arith.addf %12, %71 : vector<8x512xf32>
    %73 = vector.extract_strided_slice %9 {offsets = [16, 0], sizes = [16, 512], strides = [1, 1]} : vector<40x512xf32> to vector<16x512xf32>
    %cst_46 = arith.constant 0.000000e+00 : f32
    %74 = vector.broadcast %cst_46 : f32 to vector<16x512xf32>
    %c2_i32 = arith.constant 2 : i32
    %75 = tpu.dynamic_rotate %73 by %c2_i32 dim 1 : vector<16x512xf32>, i32 -> vector<16x512xf32>
    %76 = arith.truncf %75 : vector<16x512xf32> to vector<16x512xbf16>
    %c0_47 = arith.constant 0 : index
    %c0_48 = arith.constant 0 : index
    %c0_49 = arith.constant 0 : index
    %77 = vector.load %arg7[%c0_47, %c0_48, %c0_49] : memref<5x16x16xbf16, #tpu.memory_space<vmem>>, vector<1x16x16xbf16>
    %78 = vector.shape_cast %77 : vector<1x16x16xbf16> to vector<16x16xbf16>
    %cst_50 = arith.constant dense<0.000000e+00> : vector<16x512xf32>
    %79 = tpu.matmul %78, %76, %cst_50 {dimension_numbers = #tpu.dot_dimension_numbers<[1], [0], [0], [1], [0, 0, 1, 1], [], []>} : vector<16x16xbf16>, vector<16x512xbf16>, vector<16x512xf32> -> vector<16x512xf32>
    %80 = arith.addf %74, %79 : vector<16x512xf32>
    %c1_i32_51 = arith.constant 1 : i32
    %81 = tpu.dynamic_rotate %73 by %c1_i32_51 dim 1 : vector<16x512xf32>, i32 -> vector<16x512xf32>
    %82 = arith.truncf %81 : vector<16x512xf32> to vector<16x512xbf16>
    %c1_52 = arith.constant 1 : index
    %c0_53 = arith.constant 0 : index
    %c0_54 = arith.constant 0 : index
    %83 = vector.load %arg7[%c1_52, %c0_53, %c0_54] : memref<5x16x16xbf16, #tpu.memory_space<vmem>>, vector<1x16x16xbf16>
    %84 = vector.shape_cast %83 : vector<1x16x16xbf16> to vector<16x16xbf16>
    %cst_55 = arith.constant dense<0.000000e+00> : vector<16x512xf32>
    %85 = tpu.matmul %84, %82, %cst_55 {dimension_numbers = #tpu.dot_dimension_numbers<[1], [0], [0], [1], [0, 0, 1, 1], [], []>} : vector<16x16xbf16>, vector<16x512xbf16>, vector<16x512xf32> -> vector<16x512xf32>
    %86 = arith.addf %80, %85 : vector<16x512xf32>
    %87 = arith.truncf %73 : vector<16x512xf32> to vector<16x512xbf16>
    %c2_56 = arith.constant 2 : index
    %c0_57 = arith.constant 0 : index
    %c0_58 = arith.constant 0 : index
    %88 = vector.load %arg7[%c2_56, %c0_57, %c0_58] : memref<5x16x16xbf16, #tpu.memory_space<vmem>>, vector<1x16x16xbf16>
    %89 = vector.shape_cast %88 : vector<1x16x16xbf16> to vector<16x16xbf16>
    %cst_59 = arith.constant dense<0.000000e+00> : vector<16x512xf32>
    %90 = tpu.matmul %89, %87, %cst_59 {dimension_numbers = #tpu.dot_dimension_numbers<[1], [0], [0], [1], [0, 0, 1, 1], [], []>} : vector<16x16xbf16>, vector<16x512xbf16>, vector<16x512xf32> -> vector<16x512xf32>
    %91 = arith.addf %86, %90 : vector<16x512xf32>
    %c511_i32_60 = arith.constant 511 : i32
    %92 = tpu.dynamic_rotate %73 by %c511_i32_60 dim 1 : vector<16x512xf32>, i32 -> vector<16x512xf32>
    %93 = arith.truncf %92 : vector<16x512xf32> to vector<16x512xbf16>
    %c3 = arith.constant 3 : index
    %c0_61 = arith.constant 0 : index
    %c0_62 = arith.constant 0 : index
    %94 = vector.load %arg7[%c3, %c0_61, %c0_62] : memref<5x16x16xbf16, #tpu.memory_space<vmem>>, vector<1x16x16xbf16>
    %95 = vector.shape_cast %94 : vector<1x16x16xbf16> to vector<16x16xbf16>
    %cst_63 = arith.constant dense<0.000000e+00> : vector<16x512xf32>
    %96 = tpu.matmul %95, %93, %cst_63 {dimension_numbers = #tpu.dot_dimension_numbers<[1], [0], [0], [1], [0, 0, 1, 1], [], []>} : vector<16x16xbf16>, vector<16x512xbf16>, vector<16x512xf32> -> vector<16x512xf32>
    %97 = arith.addf %91, %96 : vector<16x512xf32>
    %c510_i32 = arith.constant 510 : i32
    %98 = tpu.dynamic_rotate %73 by %c510_i32 dim 1 : vector<16x512xf32>, i32 -> vector<16x512xf32>
    %99 = arith.truncf %98 : vector<16x512xf32> to vector<16x512xbf16>
    %c4 = arith.constant 4 : index
    %c0_64 = arith.constant 0 : index
    %c0_65 = arith.constant 0 : index
    %100 = vector.load %arg7[%c4, %c0_64, %c0_65] : memref<5x16x16xbf16, #tpu.memory_space<vmem>>, vector<1x16x16xbf16>
    %101 = vector.shape_cast %100 : vector<1x16x16xbf16> to vector<16x16xbf16>
    %cst_66 = arith.constant dense<0.000000e+00> : vector<16x512xf32>
    %102 = tpu.matmul %101, %99, %cst_66 {dimension_numbers = #tpu.dot_dimension_numbers<[1], [0], [0], [1], [0, 0, 1, 1], [], []>} : vector<16x16xbf16>, vector<16x512xbf16>, vector<16x512xf32> -> vector<16x512xf32>
    %103 = arith.addf %97, %102 : vector<16x512xf32>
    %cst_67 = arith.constant 0.000000e+00 : f32
    %104 = vector.broadcast %cst_67 : f32 to vector<16x512xf32>
    %c40_i32 = arith.constant 40 : i32
    %105 = tpu.dynamic_rotate %103 by %c40_i32 dim 1 : vector<16x512xf32>, i32 -> vector<16x512xf32>
    %106 = arith.truncf %105 : vector<16x512xf32> to vector<16x512xbf16>
    %c0_68 = arith.constant 0 : index
    %c0_69 = arith.constant 0 : index
    %c0_70 = arith.constant 0 : index
    %107 = vector.load %arg8[%c0_68, %c0_69, %c0_70] : memref<5x16x16xbf16, #tpu.memory_space<vmem>>, vector<1x16x16xbf16>
    %108 = vector.shape_cast %107 : vector<1x16x16xbf16> to vector<16x16xbf16>
    %cst_71 = arith.constant dense<0.000000e+00> : vector<16x512xf32>
    %109 = tpu.matmul %108, %106, %cst_71 {dimension_numbers = #tpu.dot_dimension_numbers<[1], [0], [0], [1], [0, 0, 1, 1], [], []>} : vector<16x16xbf16>, vector<16x512xbf16>, vector<16x512xf32> -> vector<16x512xf32>
    %110 = arith.addf %104, %109 : vector<16x512xf32>
    %c20_i32_72 = arith.constant 20 : i32
    %111 = tpu.dynamic_rotate %103 by %c20_i32_72 dim 1 : vector<16x512xf32>, i32 -> vector<16x512xf32>
    %112 = arith.truncf %111 : vector<16x512xf32> to vector<16x512xbf16>
    %c1_73 = arith.constant 1 : index
    %c0_74 = arith.constant 0 : index
    %c0_75 = arith.constant 0 : index
    %113 = vector.load %arg8[%c1_73, %c0_74, %c0_75] : memref<5x16x16xbf16, #tpu.memory_space<vmem>>, vector<1x16x16xbf16>
    %114 = vector.shape_cast %113 : vector<1x16x16xbf16> to vector<16x16xbf16>
    %cst_76 = arith.constant dense<0.000000e+00> : vector<16x512xf32>
    %115 = tpu.matmul %114, %112, %cst_76 {dimension_numbers = #tpu.dot_dimension_numbers<[1], [0], [0], [1], [0, 0, 1, 1], [], []>} : vector<16x16xbf16>, vector<16x512xbf16>, vector<16x512xf32> -> vector<16x512xf32>
    %116 = arith.addf %110, %115 : vector<16x512xf32>
    %117 = arith.truncf %103 : vector<16x512xf32> to vector<16x512xbf16>
    %c2_77 = arith.constant 2 : index
    %c0_78 = arith.constant 0 : index
    %c0_79 = arith.constant 0 : index
    %118 = vector.load %arg8[%c2_77, %c0_78, %c0_79] : memref<5x16x16xbf16, #tpu.memory_space<vmem>>, vector<1x16x16xbf16>
    %119 = vector.shape_cast %118 : vector<1x16x16xbf16> to vector<16x16xbf16>
    %cst_80 = arith.constant dense<0.000000e+00> : vector<16x512xf32>
    %120 = tpu.matmul %119, %117, %cst_80 {dimension_numbers = #tpu.dot_dimension_numbers<[1], [0], [0], [1], [0, 0, 1, 1], [], []>} : vector<16x16xbf16>, vector<16x512xbf16>, vector<16x512xf32> -> vector<16x512xf32>
    %121 = arith.addf %116, %120 : vector<16x512xf32>
    %c492_i32_81 = arith.constant 492 : i32
    %122 = tpu.dynamic_rotate %103 by %c492_i32_81 dim 1 : vector<16x512xf32>, i32 -> vector<16x512xf32>
    %123 = arith.truncf %122 : vector<16x512xf32> to vector<16x512xbf16>
    %c3_82 = arith.constant 3 : index
    %c0_83 = arith.constant 0 : index
    %c0_84 = arith.constant 0 : index
    %124 = vector.load %arg8[%c3_82, %c0_83, %c0_84] : memref<5x16x16xbf16, #tpu.memory_space<vmem>>, vector<1x16x16xbf16>
    %125 = vector.shape_cast %124 : vector<1x16x16xbf16> to vector<16x16xbf16>
    %cst_85 = arith.constant dense<0.000000e+00> : vector<16x512xf32>
    %126 = tpu.matmul %125, %123, %cst_85 {dimension_numbers = #tpu.dot_dimension_numbers<[1], [0], [0], [1], [0, 0, 1, 1], [], []>} : vector<16x16xbf16>, vector<16x512xbf16>, vector<16x512xf32> -> vector<16x512xf32>
    %127 = arith.addf %121, %126 : vector<16x512xf32>
    %c472_i32 = arith.constant 472 : i32
    %128 = tpu.dynamic_rotate %103 by %c472_i32 dim 1 : vector<16x512xf32>, i32 -> vector<16x512xf32>
    %129 = arith.truncf %128 : vector<16x512xf32> to vector<16x512xbf16>
    %c4_86 = arith.constant 4 : index
    %c0_87 = arith.constant 0 : index
    %c0_88 = arith.constant 0 : index
    %130 = vector.load %arg8[%c4_86, %c0_87, %c0_88] : memref<5x16x16xbf16, #tpu.memory_space<vmem>>, vector<1x16x16xbf16>
    %131 = vector.shape_cast %130 : vector<1x16x16xbf16> to vector<16x16xbf16>
    %cst_89 = arith.constant dense<0.000000e+00> : vector<16x512xf32>
    %132 = tpu.matmul %131, %129, %cst_89 {dimension_numbers = #tpu.dot_dimension_numbers<[1], [0], [0], [1], [0, 0, 1, 1], [], []>} : vector<16x16xbf16>, vector<16x512xbf16>, vector<16x512xf32> -> vector<16x512xf32>
    %133 = arith.addf %127, %132 : vector<16x512xf32>
    %c0_90 = arith.constant 0 : index
    %c0_91 = arith.constant 0 : index
    %134 = vector.load %arg9[%c0_90, %c0_91] : memref<16x2xf32, #tpu.memory_space<vmem>>, vector<16x2xf32>
    %135 = vector.extract_strided_slice %134 {offsets = [0, 0], sizes = [16, 1], strides = [1, 1]} : vector<16x2xf32> to vector<16x1xf32>
    %136 = vector.broadcast %135 : vector<16x1xf32> to vector<16x512xf32>
    %137 = arith.mulf %133, %136 : vector<16x512xf32>
    %138 = vector.extract_strided_slice %134 {offsets = [0, 1], sizes = [16, 1], strides = [1, 1]} : vector<16x2xf32> to vector<16x1xf32>
    %139 = vector.broadcast %138 : vector<16x1xf32> to vector<16x512xf32>
    %140 = arith.addf %137, %139 : vector<16x512xf32>
    %cst_92 = arith.constant 0.000000e+00 : f32
    %141 = vector.broadcast %cst_92 : f32 to vector<16x512xf32>
    %142 = arith.maximumf %140, %141 : vector<16x512xf32>
    %143 = math.absf %140 : vector<16x512xf32>
    %cst_93 = arith.constant 0.000000e+00 : f32
    %144 = vector.broadcast %cst_93 : f32 to vector<16x512xf32>
    %145 = arith.subf %144, %143 : vector<16x512xf32>
    %146 = math.exp %145 : vector<16x512xf32>
    %cst_94 = arith.constant 1.000000e+00 : f32
    %147 = vector.broadcast %cst_94 : f32 to vector<16x512xf32>
    %148 = arith.addf %147, %146 : vector<16x512xf32>
    %149 = math.log %148 : vector<16x512xf32>
    %150 = arith.addf %142, %149 : vector<16x512xf32>
    %151 = math.tanh %150 : vector<16x512xf32>
    %152 = arith.mulf %140, %151 : vector<16x512xf32>
    %c0_95 = arith.constant 0 : index
    %c0_96 = arith.constant 0 : index
    %153 = vector.load %arg10[%c0_95, %c0_96] : memref<8x16xbf16, #tpu.memory_space<vmem>>, vector<8x16xbf16>
    %154 = arith.truncf %152 : vector<16x512xf32> to vector<16x512xbf16>
    %cst_97 = arith.constant dense<0.000000e+00> : vector<8x512xf32>
    %155 = tpu.matmul %153, %154, %cst_97 {dimension_numbers = #tpu.dot_dimension_numbers<[1], [0], [0], [1], [0, 0, 1, 1], [], []>} : vector<8x16xbf16>, vector<16x512xbf16>, vector<8x512xf32> -> vector<8x512xf32>
    %156 = arith.addf %72, %155 : vector<8x512xf32>
    %157 = arith.truncf %156 : vector<8x512xf32> to vector<8x512xbf16>
    %cst_98 = arith.constant dense<0.000000e+00> : vector<8x25xf32>
    %158 = tpu.matmul %157, %2, %cst_98 {dimension_numbers = #tpu.dot_dimension_numbers<[1], [0], [0], [1], [0, 0, 1, 1], [], []>} : vector<8x512xbf16>, vector<512x25xbf16>, vector<8x25xf32> -> vector<8x25xf32>
    %cst_99 = arith.constant dense<0.000000e+00> : vector<8x125xf32>
    %159 = tpu.matmul %158, %3, %cst_99 {dimension_numbers = #tpu.dot_dimension_numbers<[1], [0], [0], [1], [0, 0, 1, 1], [], []>} : vector<8x25xf32>, vector<25x125xf32>, vector<8x125xf32> -> vector<8x125xf32>
    %160 = arith.mulf %159, %4 : vector<8x125xf32>
    %cst_100 = arith.constant dense<0.000000e+00> : vector<125xf32>
    %161 = vector.multi_reduction <add>, %160, %cst_100 [0] : vector<8x125xf32> to vector<125xf32>
    %162 = vector.shape_cast %161 : vector<125xf32> to vector<1x125xf32>
    %163 = arith.addf %162, %5 : vector<1x125xf32>
    %c0_101 = arith.constant 0 : index
    %c0_102 = arith.constant 0 : index
    %164 = vector.load %arg16[%c0_101, %c0_102] : memref<125x238xf32, #tpu.memory_space<vmem>>, vector<125x124xf32>
    %cst_103 = arith.constant dense<0.000000e+00> : vector<1x124xf32>
    %165 = tpu.matmul %163, %164, %cst_103 {dimension_numbers = #tpu.dot_dimension_numbers<[1], [0], [0], [1], [0, 0, 1, 1], [], []>} : vector<1x125xf32>, vector<125x124xf32>, vector<1x124xf32> -> vector<1x124xf32>
    %166 = vector.extract_strided_slice %165 {offsets = [0, 0], sizes = [1, 62], strides = [1, 1]} : vector<1x124xf32> to vector<1x62xf32>
    %c0_104 = arith.constant 0 : index
    %c0_105 = arith.constant 0 : index
    %167 = vector.load %arg17[%c0_104, %c0_105] : memref<1x119xf32, #tpu.memory_space<vmem>>, vector<1x62xf32>
    %168 = arith.addf %166, %167 : vector<1x62xf32>
    %cst_106 = arith.constant 0.000000e+00 : f32
    %169 = vector.broadcast %cst_106 : f32 to vector<1x62xf32>
    %170 = arith.maximumf %168, %169 : vector<1x62xf32>
    %171 = math.absf %168 : vector<1x62xf32>
    %cst_107 = arith.constant 0.000000e+00 : f32
    %172 = vector.broadcast %cst_107 : f32 to vector<1x62xf32>
    %173 = arith.subf %172, %171 : vector<1x62xf32>
    %174 = math.exp %173 : vector<1x62xf32>
    %cst_108 = arith.constant 1.000000e+00 : f32
    %175 = vector.broadcast %cst_108 : f32 to vector<1x62xf32>
    %176 = arith.addf %175, %174 : vector<1x62xf32>
    %177 = math.log %176 : vector<1x62xf32>
    %178 = arith.addf %170, %177 : vector<1x62xf32>
    %179 = math.tanh %178 : vector<1x62xf32>
    %180 = arith.mulf %168, %179 : vector<1x62xf32>
    %181 = vector.extract_strided_slice %165 {offsets = [0, 62], sizes = [1, 62], strides = [1, 1]} : vector<1x124xf32> to vector<1x62xf32>
    %182 = arith.addf %180, %181 : vector<1x62xf32>
    %c0_109 = arith.constant 0 : index
    %c124 = arith.constant 124 : index
    %183 = vector.load %arg16[%c0_109, %c124] : memref<125x238xf32, #tpu.memory_space<vmem>>, vector<62x62xf32>
    %cst_110 = arith.constant dense<0.000000e+00> : vector<1x62xf32>
    %184 = tpu.matmul %182, %183, %cst_110 {dimension_numbers = #tpu.dot_dimension_numbers<[1], [0], [0], [1], [0, 0, 1, 1], [], []>} : vector<1x62xf32>, vector<62x62xf32>, vector<1x62xf32> -> vector<1x62xf32>
    %185 = vector.extract_strided_slice %184 {offsets = [0, 0], sizes = [1, 31], strides = [1, 1]} : vector<1x62xf32> to vector<1x31xf32>
    %c0_111 = arith.constant 0 : index
    %c62 = arith.constant 62 : index
    %186 = vector.load %arg17[%c0_111, %c62] : memref<1x119xf32, #tpu.memory_space<vmem>>, vector<1x31xf32>
    %187 = arith.addf %185, %186 : vector<1x31xf32>
    %cst_112 = arith.constant 0.000000e+00 : f32
    %188 = vector.broadcast %cst_112 : f32 to vector<1x31xf32>
    %189 = arith.maximumf %187, %188 : vector<1x31xf32>
    %190 = math.absf %187 : vector<1x31xf32>
    %cst_113 = arith.constant 0.000000e+00 : f32
    %191 = vector.broadcast %cst_113 : f32 to vector<1x31xf32>
    %192 = arith.subf %191, %190 : vector<1x31xf32>
    %193 = math.exp %192 : vector<1x31xf32>
    %cst_114 = arith.constant 1.000000e+00 : f32
    %194 = vector.broadcast %cst_114 : f32 to vector<1x31xf32>
    %195 = arith.addf %194, %193 : vector<1x31xf32>
    %196 = math.log %195 : vector<1x31xf32>
    %197 = arith.addf %189, %196 : vector<1x31xf32>
    %198 = math.tanh %197 : vector<1x31xf32>
    %199 = arith.mulf %187, %198 : vector<1x31xf32>
    %200 = vector.extract_strided_slice %184 {offsets = [0, 31], sizes = [1, 31], strides = [1, 1]} : vector<1x62xf32> to vector<1x31xf32>
    %201 = arith.addf %199, %200 : vector<1x31xf32>
    %c0_115 = arith.constant 0 : index
    %c186 = arith.constant 186 : index
    %202 = vector.load %arg16[%c0_115, %c186] : memref<125x238xf32, #tpu.memory_space<vmem>>, vector<31x30xf32>
    %cst_116 = arith.constant dense<0.000000e+00> : vector<1x30xf32>
    %203 = tpu.matmul %201, %202, %cst_116 {dimension_numbers = #tpu.dot_dimension_numbers<[1], [0], [0], [1], [0, 0, 1, 1], [], []>} : vector<1x31xf32>, vector<31x30xf32>, vector<1x30xf32> -> vector<1x30xf32>
    %204 = vector.extract_strided_slice %203 {offsets = [0, 0], sizes = [1, 15], strides = [1, 1]} : vector<1x30xf32> to vector<1x15xf32>
    %c0_117 = arith.constant 0 : index
    %c93 = arith.constant 93 : index
    %205 = vector.load %arg17[%c0_117, %c93] : memref<1x119xf32, #tpu.memory_space<vmem>>, vector<1x15xf32>
    %206 = arith.addf %204, %205 : vector<1x15xf32>
    %cst_118 = arith.constant 0.000000e+00 : f32
    %207 = vector.broadcast %cst_118 : f32 to vector<1x15xf32>
    %208 = arith.maximumf %206, %207 : vector<1x15xf32>
    %209 = math.absf %206 : vector<1x15xf32>
    %cst_119 = arith.constant 0.000000e+00 : f32
    %210 = vector.broadcast %cst_119 : f32 to vector<1x15xf32>
    %211 = arith.subf %210, %209 : vector<1x15xf32>
    %212 = math.exp %211 : vector<1x15xf32>
    %cst_120 = arith.constant 1.000000e+00 : f32
    %213 = vector.broadcast %cst_120 : f32 to vector<1x15xf32>
    %214 = arith.addf %213, %212 : vector<1x15xf32>
    %215 = math.log %214 : vector<1x15xf32>
    %216 = arith.addf %208, %215 : vector<1x15xf32>
    %217 = math.tanh %216 : vector<1x15xf32>
    %218 = arith.mulf %206, %217 : vector<1x15xf32>
    %219 = vector.extract_strided_slice %203 {offsets = [0, 15], sizes = [1, 15], strides = [1, 1]} : vector<1x30xf32> to vector<1x15xf32>
    %220 = arith.addf %218, %219 : vector<1x15xf32>
    %c0_121 = arith.constant 0 : index
    %c216 = arith.constant 216 : index
    %221 = vector.load %arg16[%c0_121, %c216] : memref<125x238xf32, #tpu.memory_space<vmem>>, vector<15x14xf32>
    %cst_122 = arith.constant dense<0.000000e+00> : vector<1x14xf32>
    %222 = tpu.matmul %220, %221, %cst_122 {dimension_numbers = #tpu.dot_dimension_numbers<[1], [0], [0], [1], [0, 0, 1, 1], [], []>} : vector<1x15xf32>, vector<15x14xf32>, vector<1x14xf32> -> vector<1x14xf32>
    %223 = vector.extract_strided_slice %222 {offsets = [0, 0], sizes = [1, 7], strides = [1, 1]} : vector<1x14xf32> to vector<1x7xf32>
    %c0_123 = arith.constant 0 : index
    %c108 = arith.constant 108 : index
    %224 = vector.load %arg17[%c0_123, %c108] : memref<1x119xf32, #tpu.memory_space<vmem>>, vector<1x7xf32>
    %225 = arith.addf %223, %224 : vector<1x7xf32>
    %cst_124 = arith.constant 0.000000e+00 : f32
    %226 = vector.broadcast %cst_124 : f32 to vector<1x7xf32>
    %227 = arith.maximumf %225, %226 : vector<1x7xf32>
    %228 = math.absf %225 : vector<1x7xf32>
    %cst_125 = arith.constant 0.000000e+00 : f32
    %229 = vector.broadcast %cst_125 : f32 to vector<1x7xf32>
    %230 = arith.subf %229, %228 : vector<1x7xf32>
    %231 = math.exp %230 : vector<1x7xf32>
    %cst_126 = arith.constant 1.000000e+00 : f32
    %232 = vector.broadcast %cst_126 : f32 to vector<1x7xf32>
    %233 = arith.addf %232, %231 : vector<1x7xf32>
    %234 = math.log %233 : vector<1x7xf32>
    %235 = arith.addf %227, %234 : vector<1x7xf32>
    %236 = math.tanh %235 : vector<1x7xf32>
    %237 = arith.mulf %225, %236 : vector<1x7xf32>
    %238 = vector.extract_strided_slice %222 {offsets = [0, 7], sizes = [1, 7], strides = [1, 1]} : vector<1x14xf32> to vector<1x7xf32>
    %239 = arith.addf %237, %238 : vector<1x7xf32>
    %c0_127 = arith.constant 0 : index
    %c230 = arith.constant 230 : index
    %240 = vector.load %arg16[%c0_127, %c230] : memref<125x238xf32, #tpu.memory_space<vmem>>, vector<7x6xf32>
    %cst_128 = arith.constant dense<0.000000e+00> : vector<1x6xf32>
    %241 = tpu.matmul %239, %240, %cst_128 {dimension_numbers = #tpu.dot_dimension_numbers<[1], [0], [0], [1], [0, 0, 1, 1], [], []>} : vector<1x7xf32>, vector<7x6xf32>, vector<1x6xf32> -> vector<1x6xf32>
    %242 = vector.extract_strided_slice %241 {offsets = [0, 0], sizes = [1, 3], strides = [1, 1]} : vector<1x6xf32> to vector<1x3xf32>
    %c0_129 = arith.constant 0 : index
    %c115 = arith.constant 115 : index
    %243 = vector.load %arg17[%c0_129, %c115] : memref<1x119xf32, #tpu.memory_space<vmem>>, vector<1x3xf32>
    %244 = arith.addf %242, %243 : vector<1x3xf32>
    %cst_130 = arith.constant 0.000000e+00 : f32
    %245 = vector.broadcast %cst_130 : f32 to vector<1x3xf32>
    %246 = arith.maximumf %244, %245 : vector<1x3xf32>
    %247 = math.absf %244 : vector<1x3xf32>
    %cst_131 = arith.constant 0.000000e+00 : f32
    %248 = vector.broadcast %cst_131 : f32 to vector<1x3xf32>
    %249 = arith.subf %248, %247 : vector<1x3xf32>
    %250 = math.exp %249 : vector<1x3xf32>
    %cst_132 = arith.constant 1.000000e+00 : f32
    %251 = vector.broadcast %cst_132 : f32 to vector<1x3xf32>
    %252 = arith.addf %251, %250 : vector<1x3xf32>
    %253 = math.log %252 : vector<1x3xf32>
    %254 = arith.addf %246, %253 : vector<1x3xf32>
    %255 = math.tanh %254 : vector<1x3xf32>
    %256 = arith.mulf %244, %255 : vector<1x3xf32>
    %257 = vector.extract_strided_slice %241 {offsets = [0, 3], sizes = [1, 3], strides = [1, 1]} : vector<1x6xf32> to vector<1x3xf32>
    %258 = arith.addf %256, %257 : vector<1x3xf32>
    %c0_133 = arith.constant 0 : index
    %c236 = arith.constant 236 : index
    %259 = vector.load %arg16[%c0_133, %c236] : memref<125x238xf32, #tpu.memory_space<vmem>>, vector<3x2xf32>
    %cst_134 = arith.constant dense<0.000000e+00> : vector<1x2xf32>
    %260 = tpu.matmul %258, %259, %cst_134 {dimension_numbers = #tpu.dot_dimension_numbers<[1], [0], [0], [1], [0, 0, 1, 1], [], []>} : vector<1x3xf32>, vector<3x2xf32>, vector<1x2xf32> -> vector<1x2xf32>
    %261 = vector.extract_strided_slice %260 {offsets = [0, 0], sizes = [1, 1], strides = [1, 1]} : vector<1x2xf32> to vector<1x1xf32>
    %c0_135 = arith.constant 0 : index
    %c118 = arith.constant 118 : index
    %262 = vector.load %arg17[%c0_135, %c118] : memref<1x119xf32, #tpu.memory_space<vmem>>, vector<1x1xf32>
    %263 = arith.addf %261, %262 : vector<1x1xf32>
    %cst_136 = arith.constant 0.000000e+00 : f32
    %264 = vector.broadcast %cst_136 : f32 to vector<1x1xf32>
    %265 = arith.subf %264, %263 : vector<1x1xf32>
    %266 = math.exp %265 : vector<1x1xf32>
    %cst_137 = arith.constant 1.000000e+00 : f32
    %267 = vector.broadcast %cst_137 : f32 to vector<1x1xf32>
    %268 = arith.addf %267, %266 : vector<1x1xf32>
    %cst_138 = arith.constant 1.000000e+00 : f32
    %269 = vector.broadcast %cst_138 : f32 to vector<1x1xf32>
    %270 = arith.divf %269, %268 : vector<1x1xf32>
    %271 = vector.extract %270[0, 0] : f32 from vector<1x1xf32>
    %c511_i32_139 = arith.constant 511 : i32
    %272 = tpu.dynamic_rotate %156 by %c511_i32_139 dim 1 : vector<8x512xf32>, i32 -> vector<8x512xf32>
    %c492_i32_140 = arith.constant 492 : i32
    %273 = tpu.dynamic_rotate %156 by %c492_i32_140 dim 1 : vector<8x512xf32>, i32 -> vector<8x512xf32>
    %c491_i32 = arith.constant 491 : i32
    %274 = tpu.dynamic_rotate %156 by %c491_i32 dim 1 : vector<8x512xf32>, i32 -> vector<8x512xf32>
    %275 = arith.addf %156, %272 : vector<8x512xf32>
    %276 = arith.addf %275, %273 : vector<8x512xf32>
    %277 = arith.addf %276, %274 : vector<8x512xf32>
    %cst_141 = arith.constant 2.500000e-01 : f32
    %278 = vector.broadcast %cst_141 : f32 to vector<8x512xf32>
    %279 = arith.mulf %277, %278 : vector<8x512xf32>
    %280 = arith.maximumf %156, %272 : vector<8x512xf32>
    %281 = arith.maximumf %273, %274 : vector<8x512xf32>
    %282 = arith.maximumf %280, %281 : vector<8x512xf32>
    %283 = vector.broadcast %271 : f32 to vector<8x512xf32>
    %284 = arith.mulf %279, %283 : vector<8x512xf32>
    %cst_142 = arith.constant 1.000000e+00 : f32
    %285 = arith.subf %cst_142, %271 : f32
    %286 = vector.broadcast %285 : f32 to vector<8x512xf32>
    %287 = arith.mulf %282, %286 : vector<8x512xf32>
    %288 = arith.addf %284, %287 : vector<8x512xf32>
    %c0_143 = arith.constant 0 : index
    %c0_144 = arith.constant 0 : index
    %c0_145 = arith.constant 0 : index
    %289 = vector.load %arg18[%c0_143, %c0_144, %c0_145] : memref<1x8x512xf32, #tpu.memory_space<vmem>>, vector<1x8x512xf32>
    %290 = vector.shape_cast %289 : vector<1x8x512xf32> to vector<8x512xf32>
    %291 = vector.shape_cast %288 : vector<8x512xf32> to vector<1x8x512xf32>
    tpu.vector_store %arg18[%c0_143, %c0_144, %c0_145], %291 {strides = array<i32>} : memref<1x8x512xf32, #tpu.memory_space<vmem>>, vector<1x8x512xf32>,
    return
  }
  func.func @transform_0(%arg0: i32) -> (i32, i32, i32) {
    %c0_i32 = arith.constant 0 : i32
    %c0_i32_0 = arith.constant 0 : i32
    %c0_i32_1 = arith.constant 0 : i32
    return %arg0, %c0_i32, %c0_i32_0 : i32, i32, i32
  }
  func.func @transform_1(%arg0: i32) -> (i32, i32) {
    %c0_i32 = arith.constant 0 : i32
    %c0_i32_0 = arith.constant 0 : i32
    %c0_i32_1 = arith.constant 0 : i32
    return %c0_i32, %c0_i32_0 : i32, i32
  }
  func.func @transform_2(%arg0: i32) -> (i32, i32, i32) {
    %c0_i32 = arith.constant 0 : i32
    %c0_i32_0 = arith.constant 0 : i32
    %c0_i32_1 = arith.constant 0 : i32
    %c0_i32_2 = arith.constant 0 : i32
    return %c0_i32, %c0_i32_0, %c0_i32_1 : i32, i32, i32
  }
  func.func @transform_3(%arg0: i32) -> (i32, i32, i32) {
    %c0_i32 = arith.constant 0 : i32
    %c0_i32_0 = arith.constant 0 : i32
    %c0_i32_1 = arith.constant 0 : i32
    %c0_i32_2 = arith.constant 0 : i32
    return %c0_i32, %c0_i32_0, %c0_i32_1 : i32, i32, i32
  }
  func.func @transform_4(%arg0: i32) -> (i32, i32) {
    %c0_i32 = arith.constant 0 : i32
    %c0_i32_0 = arith.constant 0 : i32
    %c0_i32_1 = arith.constant 0 : i32
    return %c0_i32, %c0_i32_0 : i32, i32
  }
  func.func @transform_5(%arg0: i32) -> (i32, i32) {
    %c0_i32 = arith.constant 0 : i32
    %c0_i32_0 = arith.constant 0 : i32
    %c0_i32_1 = arith.constant 0 : i32
    return %c0_i32, %c0_i32_0 : i32, i32
  }
  func.func @transform_6(%arg0: i32) -> (i32, i32, i32) {
    %c0_i32 = arith.constant 0 : i32
    %c0_i32_0 = arith.constant 0 : i32
    %c0_i32_1 = arith.constant 0 : i32
    %c0_i32_2 = arith.constant 0 : i32
    return %c0_i32, %c0_i32_0, %c0_i32_1 : i32, i32, i32
  }
  func.func @transform_7(%arg0: i32) -> (i32, i32, i32) {
    %c0_i32 = arith.constant 0 : i32
    %c0_i32_0 = arith.constant 0 : i32
    %c0_i32_1 = arith.constant 0 : i32
    %c0_i32_2 = arith.constant 0 : i32
    return %c0_i32, %c0_i32_0, %c0_i32_1 : i32, i32, i32
  }
  func.func @transform_8(%arg0: i32) -> (i32, i32) {
    %c0_i32 = arith.constant 0 : i32
    %c0_i32_0 = arith.constant 0 : i32
    %c0_i32_1 = arith.constant 0 : i32
    return %c0_i32, %c0_i32_0 : i32, i32
  }
  func.func @transform_9(%arg0: i32) -> (i32, i32) {
    %c0_i32 = arith.constant 0 : i32
    %c0_i32_0 = arith.constant 0 : i32
    %c0_i32_1 = arith.constant 0 : i32
    return %c0_i32, %c0_i32_0 : i32, i32
  }
  func.func @transform_10(%arg0: i32) -> (i32, i32) {
    %c0_i32 = arith.constant 0 : i32
    %c0_i32_0 = arith.constant 0 : i32
    %c0_i32_1 = arith.constant 0 : i32
    return %c0_i32, %c0_i32_0 : i32, i32
  }
  func.func @transform_11(%arg0: i32) -> (i32, i32) {
    %c0_i32 = arith.constant 0 : i32
    %c0_i32_0 = arith.constant 0 : i32
    %c0_i32_1 = arith.constant 0 : i32
    return %c0_i32, %c0_i32_0 : i32, i32
  }
  func.func @transform_12(%arg0: i32) -> (i32, i32) {
    %c0_i32 = arith.constant 0 : i32
    %c0_i32_0 = arith.constant 0 : i32
    %c0_i32_1 = arith.constant 0 : i32
    return %c0_i32, %c0_i32_0 : i32, i32
  }
  func.func @transform_13(%arg0: i32) -> (i32, i32) {
    %c0_i32 = arith.constant 0 : i32
    %c0_i32_0 = arith.constant 0 : i32
    %c0_i32_1 = arith.constant 0 : i32
    return %c0_i32, %c0_i32_0 : i32, i32
  }
  func.func @transform_14(%arg0: i32) -> (i32, i32) {
    %c0_i32 = arith.constant 0 : i32
    %c0_i32_0 = arith.constant 0 : i32
    %c0_i32_1 = arith.constant 0 : i32
    return %c0_i32, %c0_i32_0 : i32, i32
  }
  func.func @transform_15(%arg0: i32) -> (i32, i32) {
    %c0_i32 = arith.constant 0 : i32
    %c0_i32_0 = arith.constant 0 : i32
    %c0_i32_1 = arith.constant 0 : i32
    return %c0_i32, %c0_i32_0 : i32, i32
  }
  func.func @transform_16(%arg0: i32) -> (i32, i32) {
    %c0_i32 = arith.constant 0 : i32
    %c0_i32_0 = arith.constant 0 : i32
    %c0_i32_1 = arith.constant 0 : i32
    return %c0_i32, %c0_i32_0 : i32, i32
  }
  func.func @transform_17(%arg0: i32) -> (i32, i32, i32) {
    %c0_i32 = arith.constant 0 : i32
    %c0_i32_0 = arith.constant 0 : i32
    %c0_i32_1 = arith.constant 0 : i32
    return %arg0, %c0_i32, %c0_i32_0 : i32, i32, i32
  }
}

</mosaic_0001>

<bundles_post_ra>
// kernel: _lambda_.1
= control target key start
LH: loop header
LB: loop body
LE: loop exit
PB: predicated region body
PF: predicated region fallthrough
CT: control target
= control target key end

     0   :  { %s7150_s0 = inlined_call_operand.vmem [shape: f32[2,4,512], index: 0, kind: input, shape index: {}]   ;;  %s7151_s1 = inlined_call_operand.hbm [shape: bf16[40,4], index: 1, kind: input, shape index: {}]   ;;  %s7152_s2 = inlined_call_operand.vmem [shape: bf16[3,16,16], index: 2, kind: input, shape index: {}]   ;;  %s7153_s3 = inlined_call_operand.vmem [shape: bf16[3,16,16], index: 3, kind: input, shape index: {}]   ;;  %s7154_s4 = inlined_call_operand.hbm [shape: f32[16,2], index: 4, kind: input, shape index: {}]   ;;  %s7155_s5 = inlined_call_operand.hbm [shape: bf16[8,16], index: 5, kind: input, shape index: {}]   ;;  %s7156_s6 = inlined_call_operand.vmem [shape: bf16[5,16,16], index: 6, kind: input, shape index: {}]   ;;  %s7157_s7 = inlined_call_operand.vmem [shape: bf16[5,16,16], index: 7, kind: input, shape index: {}]   ;;  %s7158_s8 = inlined_call_operand.hbm [shape: f32[16,2], index: 8, kind: input, shape index: {}]   ;;  %s7159_s9 = inlined_call_operand.vmem [shape: bf16[8,16], index: 9, kind: input, shape index: {}]   ;;  %s7160_s10 = inlined_call_operand.hbm [shape: f32[8,1], index: 10, kind: input, shape index: {}]   ;;  %s7161_s11 = inlined_call_operand.vmem [shape: bf16[512,25], index: 11, kind: input, shape index: {}]   ;;  %s7162_s12 = inlined_call_operand.vmem [shape: f32[25,125], index: 12, kind: input, shape index: {}]   ;;  %s7163_s13 = inlined_call_operand.hbm [shape: f32[8,125], index: 13, kind: input, shape index: {}]   ;;  %s7164_s14 = inlined_call_operand.vmem [shape: f32[1,125], index: 14, kind: input, shape index: {}]   ;;  %s7165_s15 = inlined_call_operand.vmem [shape: f32[125,238], index: 15, kind: input, shape index: {}]   ;;  %s7166_s16 = inlined_call_operand.vmem [shape: f32[1,119], index: 16, kind: input, shape index: {}]   ;;  %s7167_s17 = inlined_call_operand.vmem [shape: f32[2,8,512], index: 17, kind: output, shape index: {}]  }
   0x1   :  { %7172 = sst [smem:[#allocation17_spill]] %s7150_s0 }
   0x2   :  { %7173 = sst [smem:[#allocation18_spill]] %s7151_s1 }
   0x3   :  { %7174 = sst [smem:[#allocation19_spill]] %s7154_s4 }
   0x4   :  { %7175 = sst [smem:[#allocation20_spill]] %s7164_s14 }
   0x5   :  { %7176 = sst [smem:[#allocation21_spill]] %s7166_s16 }
   0x6   :  { %7177 = sst [smem:[#allocation22_spill]] %s7167_s17 }
   0x7   :  { %22 = vsyncpa [#allocation3], 0 }
   0x8   :  { %23 = vsyncpa [#allocation5], 0 }
   0x9   :  { %24 = vsyncpa [#allocation8], 0 }
   0xa   :  { %25 = vsyncpa [#allocation11], 0  ;;  %s5982_s24 = smov 0  }
   0xb LB: > { %7178 = sst [smem:[#allocation16_spill]] %s5854_s24  ;;  %s5856_s25 = smov [#allocation4]   ;;  %s5854_s24 = sphi %s5982_s24, %s31_s24  }
   0xc   : > { %s455_s26 = sshll.u32 %s5856_s25, 4  ;;  %s5988_s27 = sadd.s32 4294967295, %s5854_s24   ;;  %s5993_s26 = int_to_ptr.vmem [resolvable:$true] %s455_s26 }
   0xd   : > { %p4568_p0 = scmp.ge.s32.totalorder %s5854_s24, 1  ;;  %p424_p1 = scmp.lt.s32.totalorder %s5854_s24, 3 }
   0xe   : > { %p7170_p2 = scmp.eq.s32.totalorder %s5988_s27, 0  ;;  %s5857_s29 = smov [#allocation7]  }
   0xf   : > { %p5995_p3 = pnand %p4568_p0, %p424_p1  ;;  %s485_s0 = sshll.u32 %s5857_s29, 4  ;;  %s6001_s0 = int_to_ptr.vmem [resolvable:$true] %s485_s0 }
  0x10   : > { %s5858_s18 = smov [#allocation2]   ;;  %s7181_s4 = sld [smem:[#allocation19_spill]] }
  0x11   : > { %s7179_s28 = scalar_select %p5995_p3, 1, 0 }
  0x12   : > { %p5102_p4 = pneg %p5995_p3  ;;  %s436_s19 = sshll.u32 %s5858_s18, 4  ;;  %s6009_s19 = int_to_ptr.vmem [resolvable:$true] %s436_s19 }
  0x14   : > { %p6005_p5 = pnand %p7170_p2, %p5102_p4 }
  0x16   : > { %s5664_s21 = scalar_lea.hbm %s7181_s4, 256  ;;  %p6019_p7 = pneg %p6005_p5 }
  0x17   : > { %p5665_p6 = scmp.ne.s32.totalorder %s7181_s4, %s5664_s21  ;;  %p5671_p10 = scmp.lt.u32.totalorder %s5664_s21, %s7181_s4 }
  0x19   : > { %p5667_p8 = pnand %p6019_p7, %p5665_p6 }
  0x1b   : > { %p5668_p9 = pneg %p5667_p8 }
  0x1d   : > { %p5673_p11 = pnand %p5671_p10, %p5668_p9 }
  0x1f   : > { %5676 = shalt.err (!%p5673_p11)
}
  0x20   : > { %s5677_s1 = scalar_lea.vmem %s5993_s26, 256  ;;  %p5685_p1 = scmp.lt.s32.totalorder %s5993_s26, %s5993_s26 }
  0x21   : > { %p5678_p12 = scmp.ne.s32.totalorder %s5993_s26, %s5677_s1  ;;  %p5686_p4 = scmp.lt.s32.totalorder %s5677_s1, %s5677_s1 }
  0x23   : > { %p5680_p13 = pnand %p5678_p12, %p6019_p7  ;;  %p5687_p6 = por %p5686_p4, %p5685_p1 }
  0x25   : > { %p5681_p0 = pneg %p5680_p13 }
  0x27   : > { %p5688_p8 = pnand %p5687_p6, %p5681_p0 }
  0x29   : > { %5691 = shalt.err (!%p5688_p8)
}
  0x2a   : > { %s5859_s20 = smov 128   ;;  %s5860_s21 = smov 8  }
  0x2b   : > { %5108 = dma.hbm_to_vmem [thread:$0]  (!%p6005_p5), %s7181_s4, 256, %s5993_s26, [#allocation5], %s5859_s20, %s5859_s20, %s5860_s21  }
  0x2c   : > { %s5692_s24 = scalar_lea.hbm %s7158_s8, 256 }
  0x2d   : > { %p5693_p9 = scmp.ne.s32.totalorder %s7158_s8, %s5692_s24  ;;  %p5699_p12 = scmp.lt.u32.totalorder %s5692_s24, %s7158_s8 }
  0x2f   : > { %p5695_p10 = pnand %p5693_p9, %p6019_p7 }
  0x31   : > { %p5696_p11 = pneg %p5695_p10 }
  0x33   : > { %p5701_p13 = pnand %p5699_p12, %p5696_p11 }
  0x35   : > { %5704 = shalt.err (!%p5701_p13)
}
  0x36   : > { %s5705_s26 = scalar_lea.vmem %s6001_s0, 256  ;;  %p5713_p6 = scmp.lt.s32.totalorder %s6001_s0, %s6001_s0 }
  0x37   : > { %p5706_p0 = scmp.ne.s32.totalorder %s6001_s0, %s5705_s26  ;;  %p5714_p8 = scmp.lt.s32.totalorder %s5705_s26, %s5705_s26 }
  0x39   : > { %p5708_p1 = pnand %p5706_p0, %p6019_p7  ;;  %p5715_p9 = por %p5714_p8, %p5713_p6 }
  0x3b   : > { %p5709_p4 = pneg %p5708_p1 }
  0x3d   : > { %p5716_p10 = pnand %p5715_p9, %p5709_p4 }
  0x3f   : > { %5719 = shalt.err (!%p5716_p10)
}
  0x40   : > { %5114 = dma.hbm_to_vmem [thread:$0]  (!%p6005_p5), %s7158_s8, 256, %s6001_s0, [#allocation8], %s5859_s20, %s5859_s20, %s5860_s21  }
  0x41   : > { %s7183_s22 = sld [smem:[#allocation18_spill]] }
  0x47   : > { %s5720_s23 = scalar_lea.hbm %s7183_s22, 320 }
  0x48   : > { %p5721_p11 = scmp.ne.s32.totalorder %s7183_s22, %s5720_s23  ;;  %p5727_p0 = scmp.lt.u32.totalorder %s5720_s23, %s7183_s22 }
  0x4a   : > { %p5723_p12 = pnand %p5721_p11, %p6019_p7 }
  0x4c   : > { %p5724_p13 = pneg %p5723_p12 }
  0x4e   : > { %p5729_p1 = pnand %p5727_p0, %p5724_p13 }
  0x50   : > { %5732 = shalt.err (!%p5729_p1)
}
  0x51   : > { %s5733_s0 = scalar_lea.vmem %s6009_s19, 320  ;;  %p5741_p9 = scmp.lt.s32.totalorder %s6009_s19, %s6009_s19 }
  0x52   : > { %p5734_p4 = scmp.ne.s32.totalorder %s6009_s19, %s5733_s0  ;;  %p5742_p10 = scmp.lt.s32.totalorder %s5733_s0, %s5733_s0 }
  0x54   : > { %p5736_p6 = pnand %p5734_p4, %p6019_p7  ;;  %p5743_p11 = por %p5742_p10, %p5741_p9 }
  0x56   : > { %p5737_p8 = pneg %p5736_p6 }
  0x58   : > { %p5744_p12 = pnand %p5743_p11, %p5737_p8 }
  0x5a   : > { %5747 = shalt.err (!%p5744_p12)
}
  0x5b   : > { %s5861_s20 = smov 64   ;;  %s5862_s21 = smov 4  }
  0x5c   : > { %5105 = dma.hbm_to_vmem [thread:$0]  (!%p6005_p5), %s7183_s22, 320, %s6009_s19, [#allocation3], %s5861_s20, %s5861_s20, %s5862_s21  }
  0x5d   : > { %s5863_s17 = smov [#allocation6]   ;;  %s5864_s23 = smov [#allocation9]  }
  0x5e   : > { %s469_s24 = sshll.u32 %s5863_s17, 4  ;;  %s502_s29 = sshll.u32 %s5864_s23, 4  ;;  %s470_s24 = int_to_ptr.vmem [resolvable:$true] %s469_s24  ;;  %s6086_s29 = int_to_ptr.vmem [resolvable:$true] %s502_s29 }
  0x5f   : > { %s5748_s26 = scalar_lea.hbm %s7155_s5, 64 }
  0x60   : > { %p5749_p13 = scmp.ne.s32.totalorder %s7155_s5, %s5748_s26  ;;  %p5755_p4 = scmp.lt.u32.totalorder %s5748_s26, %s7155_s5 }
  0x62   : > { %p5751_p0 = pnand %p5749_p13, %p6019_p7 }
  0x64   : > { %p5752_p1 = pneg %p5751_p0 }
  0x66   : > { %p5757_p6 = pnand %p5755_p4, %p5752_p1 }
  0x68   : > { %5760 = shalt.err (!%p5757_p6)
}
  0x69   : > { %s5761_s20 = scalar_lea.vmem %s470_s24, 64  ;;  %p5769_p11 = scmp.lt.s32.totalorder %s470_s24, %s470_s24 }
  0x6a   : > { %p5762_p8 = scmp.ne.s32.totalorder %s470_s24, %s5761_s20  ;;  %p5770_p12 = scmp.lt.s32.totalorder %s5761_s20, %s5761_s20 }
  0x6c   : > { %p5764_p9 = pnand %p5762_p8, %p6019_p7  ;;  %p5771_p2 = por %p5770_p12, %p5769_p11 }
  0x6e   : > { %p5765_p10 = pneg %p5764_p9 }
  0x70   : > { %p5772_p3 = pnand %p5771_p2, %p5765_p10 }
  0x72   : > { %5775 = shalt.err (!%p5772_p3)
}
  0x73   : > { %5111 = dma.hbm_to_vmem [thread:$0]  (!%p6005_p5), %s7155_s5, 64, %s470_s24, [#allocation5]  }
  0x74   : > { %s5776_s23 = scalar_lea.hbm %s7160_s10, 128 }
  0x75   : > { %p5777_p13 = scmp.ne.s32.totalorder %s7160_s10, %s5776_s23  ;;  %p5783_p2 = scmp.lt.u32.totalorder %s5776_s23, %s7160_s10 }
  0x77   : > { %p5779_p0 = pnand %p5777_p13, %p6019_p7 }
  0x79   : > { %p5780_p1 = pneg %p5779_p0 }
  0x7b   : > { %p5785_p3 = pnand %p5783_p2, %p5780_p1 }
  0x7d   : > { %5788 = shalt.err (!%p5785_p3)
}
  0x7e   : > { %s5789_s24 = scalar_lea.vmem %s6086_s29, 128  ;;  %p5797_p9 = scmp.lt.s32.totalorder %s6086_s29, %s6086_s29 }
  0x7f   : > { %p5790_p4 = scmp.ne.s32.totalorder %s6086_s29, %s5789_s24  ;;  %p5798_p10 = scmp.lt.s32.totalorder %s5789_s24, %s5789_s24 }
  0x81   : > { %p5792_p6 = pnand %p5790_p4, %p6019_p7  ;;  %p5799_p11 = por %p5798_p10, %p5797_p9 }
  0x83   : > { %p5793_p8 = pneg %p5792_p6 }
  0x85   : > { %p5800_p12 = pnand %p5799_p11, %p5793_p8 }
  0x87   : > { %5803 = shalt.err (!%p5800_p12)
}
  0x88   : > { %5117 = dma.hbm_to_vmem [thread:$0]  (!%p6005_p5), %s7160_s10, 128, %s6086_s29, [#allocation8]  }
  0x89   : > { %s5865_s20 = smov [#allocation10]   ;;  %s5804_s17 = scalar_lea.hbm %s7163_s13, 128 }
  0x8a   : > { %s519_s4 = sshll.u32 %s5865_s20, 4  ;;  %p5805_p13 = scmp.ne.s32.totalorder %s7163_s13, %s5804_s17  ;;  %s520_s4 = int_to_ptr.vmem [resolvable:$true] %s519_s4 }
  0x8b   : > { %p5811_p2 = scmp.lt.u32.totalorder %s5804_s17, %s7163_s13 }
  0x8c   : > { %p5807_p0 = pnand %p5805_p13, %p6019_p7 }
  0x8e   : > { %p5808_p1 = pneg %p5807_p0 }
  0x90   : > { %p5813_p3 = pnand %p5811_p2, %p5808_p1 }
  0x92   : > { %5816 = shalt.err (!%p5813_p3)
}
  0x93   : > { %s5817_s29 = scalar_lea.vmem %s520_s4, 128  ;;  %p5825_p9 = scmp.lt.s32.totalorder %s520_s4, %s520_s4 }
  0x94   : > { %p5818_p4 = scmp.ne.s32.totalorder %s520_s4, %s5817_s29  ;;  %p5826_p10 = scmp.lt.s32.totalorder %s5817_s29, %s5817_s29 }
  0x96   : > { %p5820_p6 = pnand %p5818_p4, %p6019_p7  ;;  %p5827_p11 = por %p5826_p10, %p5825_p9 }
  0x98   : > { %p5821_p8 = pneg %p5820_p6 }
  0x9a   : > { %p5828_p12 = pnand %p5827_p11, %p5821_p8 }
  0x9c   : > { %5831 = shalt.err (!%p5828_p12)
}
  0x9d   : > { %5120 = dma.hbm_to_vmem [thread:$0]  (!%p6005_p5), %s7163_s13, 128, %s520_s4, [#allocation11]  }
  0x9e   : > { %p7184_p13 = scmp.ne.s32.totalorder %s7179_s28, 0 }
  0x9f   : > { %p7185_p0 = scmp.eq.s32.totalorder (!%p7184_p13), %s5988_s27, 0 }
  0xa0   : > { %549 = sbr.rel (%p7184_p13) target bundleno = 4516 (0x11a4), region = 88 }
  0xa7   : > { %5837 = dma.done.wait (%p7185_p0), [#allocation3], 320   ;;  %p7186_p7 = pmov %p7185_p0 }
  0xa8   : > { %p7187_p1 = pmov %p7185_p0 }
  0xa9   : > { %5839 = vsyncadd (%p7186_p7), [#allocation3], 4294966976 }
  0xaa   : > { %5841 = dma.done.wait (%p7187_p1), [#allocation5], 320   ;;  %p7188_p2 = pmov %p7185_p0 }
  0xab   : > { %p7189_p3 = pmov %p7185_p0 }
  0xac   : > { %5843 = vsyncadd (%p7188_p2), [#allocation5], 4294966976 }
  0xad   : > { %5845 = dma.done.wait (%p7189_p3), [#allocation8], 384   ;;  %p7190_p5 = pmov %p7185_p0 }
  0xae   : > { %p7191_p4 = pmov %p7185_p0 }
  0xaf   : > { %5847 = vsyncadd (%p7190_p5), [#allocation8], 4294966912 }
  0xb0   : > { %5849 = dma.done.wait (%p7191_p4), [#allocation11], 128   ;;  %p7192_p6 = pmov %p7185_p0 }
  0xb1   : > { %p621_p8 = scmp.lt.s32.totalorder %s5988_s27, 1  ;;  %v5866_v0 = vmov 0   ;;  %s7193_s14 = sld [smem:[#allocation17_spill]]  ;;  %vm743_vm0 = vcmask 1041408   ;;  %vm733_vm1 = vcmask 31744   ;;  %v5483_v11 = vld [vmem:[#allocation2] sm:$0xff]   ;;  %v903_v39 = vlaneseq }
  0xb2   : > { %5851 = vsyncadd (%p7192_p6), [#allocation11], 4294967168  ;;  %788 = vmatprep.mubr.bf16.mxu0 %v5866_v0  ;;  %849 = vmatprep.mubr.bf16.mxu1 %v5866_v0  ;;  %v5484_v12 = vld [vmem:[#allocation2 + $0x8] sm:$0xff]   ;;  %v5485_v13 = vld [vmem:[#allocation2 + $0x10] ss:$0 sps:$4 sm:$0xff]   ;;  %s5867_s20 = smov 1  }
  0xb3   : > { %s7201_s27 = smov (!%p621_p8, %s5988_s27), 1  ;;  %5257 = vset.pattern.permute.xlu0 %v5866_v0  ;;  %5258 = vset.pattern.permute.xlu1 %v5866_v0  ;;  %v5486_v30 = vld [vmem:[%s7152_s2 + $0x8] sm:$0xff]   ;;  %vm932_vm2 = vcmask 130048   ;;  %s5868_s16 = smov 127   ;;  %v6221_v40 = vand.u32 127, %v903_v39  ;;  %vm3578_vm11 = vcmask 1040384  }
  0xb4   : > { %s4722_s28 = sshll.u32 %s7201_s27, 4  ;;  %s5869_s26 = smov 20   ;;  %vm5877_vm12 = vmmov 1   ;;  %vm5878_vm14 = vmmov 0   ;;  %vm3574_vm15 = vcmask 203776  }
  0xb5   : > { %vm905_vm3 = vcmp.lt.s32.totalorder %v6221_v40, 1  ;;  %vm1132_vm4 = vcmp.lt.s32.totalorder %v6221_v40, 127  ;;  %s5870_s24 = smov 108   ;;  %s5873_s30 = smov 126   ;;  %vm1266_vm5 = vcmp.lt.s32.totalorder %v6221_v40, 20  ;;  %vm1492_vm6 = vcmp.lt.s32.totalorder %v6221_v40, 108  ;;  %vm4909_vm13 = vmpackc.low %vm3578_vm11, %vm5877_vm12 }
  0xb6   : > { %vm1844_vm7 = vcmp.lt.s32.totalorder %v6221_v40, 2  ;;  %vm2336_vm8 = vcmp.lt.s32.totalorder %v6221_v40, 126  ;;  %s5874_s25 = smov 40   ;;  %vm2470_vm9 = vcmp.lt.s32.totalorder %v6221_v40, 40  ;;  %vm2962_vm10 = vcmp.lt.s32.totalorder %v6221_v40, 88  ;;  %s5880_s1 = smov 4  }
  0xb7   : > { %s625_s19 = scalar_lea.vmem %s7193_s14, %s4722_s28  ;;  %s5872_s28 = smov 2   ;;  %vm4079_vm11 = vcmask 121856  }
  0xb8   : > { %v708_v1 = vld [vmem:[%s625_s19] sm:$0xff]  ;;  %v709_v2 = vld [vmem:[%s625_s19 + $0x8] sm:$0xff]  ;;  %s5875_s14 = smov 88   ;;  %s7194_s29 = sld [smem:[#allocation20_spill]] }
  0xb9   : > { %v712_v3 = vcombine.high %v708_v1, %v708_v1  ;;  %v713_v4 = vcombine.high %v709_v2, %v709_v2  ;;  %v716_v5 = vpack.c.bf16 %v708_v1, %v708_v1  ;;  %v718_v6 = vpack.c.bf16 %v709_v2, %v709_v2  ;;  %s5883_s4 = smov 35   ;;  %s5884_s23 = smov 97  }
  0xba   : > { %s5887_s0 = smov 121   ;;  %s5889_s19 = smov 107  }
  0xbb   : > { %v717_v7 = vpack.c.bf16 %v712_v3, %v712_v3  ;;  %v719_v8 = vpack.c.bf16 %v713_v4, %v713_v4  ;;  %v745_v9 = vsel %vm743_vm0, %v716_v5, 0  ;;  %v751_v10 = vsel %vm743_vm0, %v718_v6, 0 }
  0xbd   : > { %4590 = vmatprep.subr.msk.bf16.mxu0 %vm743_vm0, %v717_v7  ;;  %4594 = vmatprep.subr.msk.bf16.mxu1 %vm743_vm0, %v719_v8  ;;  %vm3681_vm0 = vcmask 1044480  }
  0xbe   : > { %757 = vmatpush1.bf16.msra.mxu0 %v745_v9  ;;  %818 = vmatpush1.bf16.msra.mxu1 %v751_v10  ;;  %v5487_v10 = vld [vmem:[%s7152_s2] sm:$0xff]  }
  0xc1   : > { %4591 = vmatmul.mubr.msk.bf16.vlgmr.msra.gmra.mrb[0].mxu0 %vm733_vm1, %v5483_v11  ;;  %4595 = vmatmul.mubr.msk.bf16.vlgmr.msra.gmra.mrb[0].mxu1 %vm733_vm1, %v5483_v11 }
  0xc2   : > { %798 = vmatprep.mubr.bf16.mxu0 %v5866_v0  ;;  %859 = vmatprep.mubr.bf16.mxu1 %v5866_v0 }
  0xc9   : > { %4592 = vmatmul.mubr.msk.bf16.gmra.mrb[4].mxu0 %vm733_vm1, %v5484_v12  ;;  %4596 = vmatmul.mubr.msk.bf16.gmra.mrb[4].mxu1 %vm733_vm1, %v5484_v12 }
  0xca   : > { %808 = vmatprep.mubr.bf16.mxu0 %v5866_v0  ;;  %869 = vmatprep.mubr.bf16.mxu1 %v5866_v0 }
  0xd1   : > { %4593 = vmatmul.mubr.msk.bf16.gmra.mrb[8].mxu0 %vm733_vm1, %v5485_v13  ;;  %4597 = vmatmul.mubr.msk.bf16.gmra.mrb[8].mxu1 %vm733_vm1, %v5485_v13 }
  0xd2   : > { %968 = vmatprep.mubr.bf16.mxu0 %v5866_v0  ;;  %1011 = vmatprep.mubr.bf16.mxu1 %v5866_v0 }
 0x194   : > { %v790_v14 = vpop.f32.mrb[0].mxu0  ;;  %v851_v15 = vpop.f32.mrb[0].mxu1 }
 0x195   : > { %v792_v16 = vpop.f32.mrb[1].mxu0  ;;  %v853_v17 = vpop.f32.mrb[1].mxu1 }
 0x196   : > { %v794_v18 = vpop.f32.mrb[2].mxu0  ;;  %v855_v19 = vpop.f32.mrb[2].mxu1 }
 0x197   : > { %v5197_v20 = vpack.i.bf16 %v794_v18, %v790_v14  ;;  %v920_v21 = vpack.c.bf16 %v794_v18, %v790_v14  ;;  %v5202_v22 = vpack.i.bf16 %v855_v19, %v851_v15  ;;  %v922_v23 = vpack.c.bf16 %v855_v19, %v851_v15  ;;  %v796_v24 = vpop.f32.mrb[3].mxu0  ;;  %v857_v25 = vpop.f32.mrb[3].mxu1 }
 0x198   : > { %v5207_v26 = vpack.i.bf16 %v796_v24, %v792_v16  ;;  %v921_v27 = vpack.c.bf16 %v796_v24, %v792_v16  ;;  %v5212_v28 = vpack.i.bf16 %v857_v25, %v853_v17  ;;  %v923_v29 = vpack.c.bf16 %v857_v25, %v853_v17 }
 0x199   : > { %5188 = vrot.lane.b32.xlu1 %v5202_v22, %s5867_s20  ;;  %5178 = vrot.lane.b32.xlu0 %v5197_v20, %s5867_s20 }
 0x19a   : > { %936 = vmatprep.subr.bf16.mxu0 %v921_v27  ;;  %979 = vmatprep.subr.bf16.mxu1 %v923_v29  ;;  %v5488_v27 = vld [vmem:[%s7152_s2 + $0x10] sm:$0xff]  }
 0x19b   : > { %937 = vmatpush1.bf16.msra.mxu0 %v920_v21  ;;  %980 = vmatpush1.bf16.msra.mxu1 %v922_v23 }
 0x19c   : > { %v6204_v31 = vpop.f32.mrb[4].mxu0  ;;  %v6206_v32 = vpop.f32.mrb[4].mxu1 }
 0x19d   : > { %5193 = vrot.lane.b32.xlu1 %v5212_v28, %s5867_s20  ;;  %5183 = vrot.lane.b32.xlu0 %v5207_v26, %s5867_s20  ;;  %v6208_v33 = vpop.f32.mrb[5].mxu0  ;;  %v6210_v34 = vpop.f32.mrb[5].mxu1 }
 0x19e   : > { %4601 = vmatmul.mubr.msk.bf16.vlgmr.msra.gmra.mrb[12].mxu0 %vm932_vm2, %v5486_v30  ;;  %4602 = vmatmul.mubr.msk.bf16.vlgmr.msra.gmra.mrb[12].mxu1 %vm932_vm2, %v5486_v30  ;;  %v6212_v35 = vpop.f32.mrb[6].mxu0  ;;  %v6214_v36 = vpop.f32.mrb[6].mxu1 }
 0x19f   : > { %1062 = vmatprep.mubr.bf16.mxu0 %v5866_v0  ;;  %1105 = vmatprep.mubr.bf16.mxu1 %v5866_v0  ;;  %v6216_v37 = vpop.f32.mrb[7].mxu0  ;;  %v6218_v38 = vpop.f32.mrb[7].mxu1  ;;  %v6281_v30 = vpack.i.bf16 %v6214_v36, %v6206_v32 }
 0x1a0   : > { %v6277_v29 = vpack.i.bf16 %v6216_v37, %v6208_v33 }
 0x1a1   : > { %5208 = vrot.lane.b32.xlu1 %v5207_v26, %s5868_s16  ;;  %5198 = vrot.lane.b32.xlu0 %v5197_v20, %s5868_s16 }
 0x1a5   : > { %5213 = vrot.lane.b32.xlu1 %v5212_v28, %s5868_s16  ;;  %5203 = vrot.lane.b32.xlu0 %v5202_v22, %s5868_s16  ;;  %v6273_v28 = vpack.i.bf16 %v6212_v35, %v6204_v31 }
 0x20b   : > { %v5189_v41 = vpop.permute.xlu1 %5188  ;;  %v5179_v42 = vpop.permute.xlu0 %5178 }
 0x20c   : > { %v5191_v43 = vunpack.i.h.bf16 %v5189_v41  ;;  %v5190_v44 = vunpack.i.l.bf16 %v5189_v41  ;;  %v5181_v45 = vunpack.i.h.bf16 %v5179_v42  ;;  %v5180_v46 = vunpack.i.l.bf16 %v5179_v42 }
 0x20d   : > { %v6285_v41 = vpack.i.bf16 %v6218_v38, %v6210_v34  ;;  %v2079_v42 = vpack.c.bf16 %v6216_v37, %v6208_v33  ;;  %v5493_v33 = vld [vmem:[%s7156_s6] sm:$0xff]  }
 0x20f   : > { %v5194_v47 = vpop.permute.xlu1 %5193  ;;  %v5184_v48 = vpop.permute.xlu0 %5183 }
 0x210   : > { %v5196_v49 = vunpack.i.h.bf16 %v5194_v47  ;;  %v5195_v50 = vunpack.i.l.bf16 %v5194_v47  ;;  %v5186_v51 = vunpack.i.h.bf16 %v5184_v48  ;;  %v5185_v52 = vunpack.i.l.bf16 %v5184_v48 }
 0x212   : > { %v912_v53 = vsel %vm905_vm3, %v5195_v50, %v5180_v46  ;;  %v913_v54 = vsel %vm905_vm3, %v5196_v49, %v5181_v45  ;;  %v909_v55 = vsel %vm905_vm3, %v5186_v51, %v5191_v43  ;;  %v908_v56 = vsel %vm905_vm3, %v5185_v52, %v5190_v44 }
 0x213   : > { %v914_v57 = vpack.c.bf16 %v913_v54, %v912_v53  ;;  %v5209_v58 = vpop.permute.xlu1 %5208  ;;  %v5199_v59 = vpop.permute.xlu0 %5198  ;;  %v910_v60 = vsel %vm905_vm3, %v5180_v46, %v5185_v52  ;;  %v911_v61 = vsel %vm905_vm3, %v5181_v45, %v5186_v51  ;;  %v916_v62 = vpack.c.bf16 %v909_v55, %v908_v56 }
 0x214   : > { %v5211_v63 = vunpack.i.h.bf16 %v5209_v58  ;;  %v5210_v1 = vunpack.i.l.bf16 %v5209_v58  ;;  %v5201_v2 = vunpack.i.h.bf16 %v5199_v59  ;;  %v5200_v3 = vunpack.i.l.bf16 %v5199_v59 }
 0x215   : > { %v915_v4 = vpack.c.bf16 %v911_v61, %v910_v60  ;;  %v906_v5 = vsel %vm905_vm3, %v5190_v44, %v5195_v50  ;;  %v907_v6 = vsel %vm905_vm3, %v5191_v43, %v5196_v49  ;;  %v2078_v43 = vpack.c.bf16 %v6212_v35, %v6204_v31 }
 0x216   : > { %v917_v7 = vpack.c.bf16 %v907_v6, %v906_v5  ;;  %v1138_v15 = vsel %vm1132_vm4, %v5201_v2, %v5211_v63  ;;  %v1137_v16 = vsel %vm1132_vm4, %v5200_v3, %v5210_v1  ;;  %v2081_v44 = vpack.c.bf16 %v6218_v38, %v6210_v34 }
 0x217   : > { %1030 = vmatprep.subr.bf16.mxu0 %v915_v4  ;;  %v5214_v8 = vpop.permute.xlu1 %5213  ;;  %v5204_v9 = vpop.permute.xlu0 %5203  ;;  %v1141_v25 = vpack.c.bf16 %v1138_v15, %v1137_v16  ;;  %v2080_v45 = vpack.c.bf16 %v6214_v36, %v6206_v32 }
 0x218   : > { %1073 = vmatprep.subr.bf16.mxu1 %v917_v7  ;;  %1031 = vmatpush1.bf16.msra.mxu0 %v914_v57  ;;  %v5216_v11 = vunpack.i.h.bf16 %v5214_v8  ;;  %v5215_v12 = vunpack.i.l.bf16 %v5214_v8  ;;  %v5206_v13 = vunpack.i.h.bf16 %v5204_v9  ;;  %v5205_v14 = vunpack.i.l.bf16 %v5204_v9 }
 0x219   : > { %1074 = vmatpush1.bf16.msra.mxu1 %v916_v62  ;;  %v5489_v62 = vld [vmem:[%s7153_s3 + $0x8] sm:$0xff]  }
 0x21a   : > { %v1134_v17 = vsel %vm1132_vm4, %v5206_v13, %v5216_v11  ;;  %v1133_v18 = vsel %vm1132_vm4, %v5205_v14, %v5215_v12  ;;  %v1135_v19 = vsel %vm1132_vm4, %v5210_v1, %v5205_v14  ;;  %v1136_v20 = vsel %vm1132_vm4, %v5211_v63, %v5206_v13  ;;  %v1610_v63 = vld [vmem:[#allocation4] sm:$0xff]  ;;  %v1611_v1 = vld [vmem:[#allocation4 + $0x8] sm:$0xff] }
 0x21b   : > { %v1143_v21 = vpack.c.bf16 %v1134_v17, %v1133_v18  ;;  %4604 = vmatmul.mubr.msk.bf16.vlgmr.msra.gmra.mrb[12].mxu0 %vm932_vm2, %v5487_v10  ;;  %v1142_v22 = vpack.c.bf16 %v1136_v20, %v1135_v19  ;;  %v1139_v23 = vsel %vm1132_vm4, %v5215_v12, %v5200_v3  ;;  %v1140_v24 = vsel %vm1132_vm4, %v5216_v11, %v5201_v2 }
 0x21c   : > { %4605 = vmatmul.mubr.msk.bf16.vlgmr.msra.gmra.mrb[12].mxu1 %vm932_vm2, %v5487_v10  ;;  %v1144_v26 = vpack.c.bf16 %v1140_v24, %v1139_v23  ;;  %1188 = vmatprep.mubr.bf16.mxu0 %v5866_v0  ;;  %v5871_v2 = vmov 1  }
 0x21d   : > { %1156 = vmatprep.subr.bf16.mxu0 %v1142_v22  ;;  %1231 = vmatprep.mubr.bf16.mxu1 %v5866_v0 }
 0x21e   : > { %1199 = vmatprep.subr.bf16.mxu1 %v1144_v26  ;;  %1157 = vmatpush1.bf16.msra.mxu0 %v1141_v25 }
 0x21f   : > { %1200 = vmatpush1.bf16.msra.mxu1 %v1143_v21 }
 0x227   : > { %4609 = vmatmul.mubr.msk.bf16.vlgmr.msra.gmra.mrb[12].mxu0 %vm932_vm2, %v5488_v27 }
 0x228   : > { %4610 = vmatmul.mubr.msk.bf16.vlgmr.msra.gmra.mrb[12].mxu1 %vm932_vm2, %v5488_v27  ;;  %1328 = vmatprep.mubr.bf16.mxu0 %v5866_v0 }
 0x229   : > { %1371 = vmatprep.mubr.bf16.mxu1 %v5866_v0 }
 0x2fa   : > { %v1190_v46 = vpop.f32.mrb[12].mxu0 }
 0x2fb   : > { %v1233_v47 = vpop.f32.mrb[12].mxu1  ;;  %v1192_v48 = vpop.f32.mrb[13].mxu0 }
 0x2fc   : > { %v1235_v49 = vpop.f32.mrb[13].mxu1  ;;  %v1194_v50 = vpop.f32.mrb[14].mxu0 }
 0x2fd   : > { %v5237_v51 = vpack.i.bf16 %v1194_v50, %v1190_v46  ;;  %v1281_v52 = vpack.c.bf16 %v1194_v50, %v1190_v46  ;;  %v1237_v53 = vpop.f32.mrb[14].mxu1  ;;  %v1196_v54 = vpop.f32.mrb[15].mxu0  ;;  %v5490_v46 = vld [vmem:[%s7153_s3] sm:$0xff]  }
 0x2fe   : > { %v5242_v55 = vpack.i.bf16 %v1237_v53, %v1233_v47  ;;  %v1283_v56 = vpack.c.bf16 %v1237_v53, %v1233_v47  ;;  %v5247_v57 = vpack.i.bf16 %v1196_v54, %v1192_v48  ;;  %v1239_v58 = vpop.f32.mrb[15].mxu1  ;;  %v1282_v59 = vpack.c.bf16 %v1196_v54, %v1192_v48 }
 0x2ff   : > { %v5252_v60 = vpack.i.bf16 %v1239_v58, %v1235_v49  ;;  %5218 = vrot.lane.b32.xlu0 %v5237_v51, %s5869_s26  ;;  %v1284_v61 = vpack.c.bf16 %v1239_v58, %v1235_v49 }
 0x300   : > { %5228 = vrot.lane.b32.xlu1 %v5247_v57, %s5869_s26  ;;  %1296 = vmatprep.subr.bf16.mxu0 %v1282_v59 }
 0x301   : > { %1339 = vmatprep.subr.bf16.mxu1 %v1284_v61  ;;  %1297 = vmatpush1.bf16.msra.mxu0 %v1281_v52 }
 0x302   : > { %1340 = vmatpush1.bf16.msra.mxu1 %v1283_v56 }
 0x303   : > { %5223 = vrot.lane.b32.xlu0 %v5242_v55, %s5869_s26 }
 0x304   : > { %5233 = vrot.lane.b32.xlu1 %v5252_v60, %s5869_s26  ;;  %4614 = vmatmul.mubr.msk.bf16.vlgmr.msra.gmra.mrb[16].mxu0 %vm932_vm2, %v5489_v62 }
 0x305   : > { %4615 = vmatmul.mubr.msk.bf16.vlgmr.msra.gmra.mrb[16].mxu1 %vm932_vm2, %v5489_v62  ;;  %1422 = vmatprep.mubr.bf16.mxu0 %v5866_v0 }
 0x306   : > { %1465 = vmatprep.mubr.bf16.mxu1 %v5866_v0 }
 0x307   : > { %5238 = vrot.lane.b32.xlu0 %v5237_v51, %s5870_s24 }
 0x308   : > { %5248 = vrot.lane.b32.xlu1 %v5247_v57, %s5870_s24 }
 0x30b   : > { %5243 = vrot.lane.b32.xlu0 %v5242_v55, %s5870_s24 }
 0x30c   : > { %5253 = vrot.lane.b32.xlu1 %v5252_v60, %s5870_s24 }
 0x30f   : > { %1614 = vperm.xlu0 %5257, %v1610_v63  }
 0x310   : > { %1619 = vperm.xlu1 %5258, %v1611_v1  }
 0x313   : > { %5260 = vset.pattern.permute.xlu0 %v5871_v2 }
 0x314   : > { %1635 = vperm.xlu0 %5260, %v1611_v1   ;;  %5259 = vset.pattern.permute.xlu1 %v5871_v2 }
 0x315   : > { %1631 = vperm.xlu1 %5259, %v1610_v63  }
 0x318   : > { %5272 = vrot.lane.b32.xlu0 %v6281_v30, %s5867_s20 }
 0x319   : > { %5421 = vset.pattern.permute.xlu0 %v5866_v0  ;;  %5262 = vrot.lane.b32.xlu1 %v6273_v28, %s5867_s20 }
 0x31a   : > { %5422 = vset.pattern.permute.xlu1 %v5866_v0 }
 0x31c   : > { %5282 = vrot.lane.b32.xlu0 %v6273_v28, %s5872_s28 }
 0x31d   : > { %5267 = vrot.lane.b32.xlu1 %v6277_v29, %s5867_s20 }
 0x320   : > { %5292 = vrot.lane.b32.xlu0 %v6281_v30, %s5872_s28 }
 0x321   : > { %5277 = vrot.lane.b32.xlu1 %v6285_v41, %s5867_s20  ;;  %s5882_s20 = smov 70  }
 0x324   : > { %5302 = vrot.lane.b32.xlu0 %v6273_v28, %s5868_s16 }
 0x325   : > { %5287 = vrot.lane.b32.xlu1 %v6277_v29, %s5872_s28 }
 0x328   : > { %5312 = vrot.lane.b32.xlu0 %v6281_v30, %s5868_s16 }
 0x329   : > { %5297 = vrot.lane.b32.xlu1 %v6285_v41, %s5872_s28  ;;  %s7195_s28 = sld [smem:[#allocation21_spill]] }
 0x32c   : > { %5322 = vrot.lane.b32.xlu0 %v6273_v28, %s5873_s30 }
 0x32d   : > { %5307 = vrot.lane.b32.xlu1 %v6277_v29, %s5868_s16 }
 0x330   : > { %5332 = vrot.lane.b32.xlu0 %v6281_v30, %s5873_s30 }
 0x331   : > { %5317 = vrot.lane.b32.xlu1 %v6285_v41, %s5868_s16 }
 0x335   : > { %5327 = vrot.lane.b32.xlu1 %v6277_v29, %s5873_s30 }
 0x339   : > { %5337 = vrot.lane.b32.xlu1 %v6285_v41, %s5873_s30  ;;  %s5881_s30 = smov 66  }
 0x371   : > { %v5219_v3 = vpop.permute.xlu0 %5218 }
 0x372   : > { %v5221_v4 = vunpack.i.h.bf16 %v5219_v3  ;;  %v5220_v5 = vunpack.i.l.bf16 %v5219_v3  ;;  %v5229_v6 = vpop.permute.xlu1 %5228 }
 0x373   : > { %v5231_v7 = vunpack.i.h.bf16 %v5229_v6  ;;  %v5230_v8 = vunpack.i.l.bf16 %v5229_v6 }
 0x375   : > { %v5224_v9 = vpop.permute.xlu0 %5223  ;;  %v1271_v12 = vsel %vm1266_vm5, %v5220_v5, %v5230_v8  ;;  %v1272_v13 = vsel %vm1266_vm5, %v5221_v4, %v5231_v7 }
 0x376   : > { %v5226_v10 = vunpack.i.h.bf16 %v5224_v9  ;;  %v5225_v11 = vunpack.i.l.bf16 %v5224_v9  ;;  %v5234_v14 = vpop.permute.xlu1 %5233  ;;  %v1276_v15 = vpack.c.bf16 %v1272_v13, %v1271_v12 }
 0x377   : > { %v5236_v16 = vunpack.i.h.bf16 %v5234_v14  ;;  %v5235_v17 = vunpack.i.l.bf16 %v5234_v14 }
 0x378   : > { %v1269_v18 = vsel %vm1266_vm5, %v5230_v8, %v5225_v11  ;;  %v1270_v19 = vsel %vm1266_vm5, %v5231_v7, %v5226_v10  ;;  %1390 = vmatprep.subr.bf16.mxu0 %v1276_v15 }
 0x379   : > { %v5239_v20 = vpop.permute.xlu0 %5238  ;;  %v1274_v21 = vsel %vm1266_vm5, %v5236_v16, %v5221_v4  ;;  %v1273_v22 = vsel %vm1266_vm5, %v5235_v17, %v5220_v5  ;;  %v1267_v27 = vsel %vm1266_vm5, %v5225_v11, %v5235_v17  ;;  %v1268_v28 = vsel %vm1266_vm5, %v5226_v10, %v5236_v16  ;;  %v5491_v4 = vld [vmem:[%s7153_s3 + $0x10] sm:$0xff]  }
 0x37a   : > { %v5241_v23 = vunpack.i.h.bf16 %v5239_v20  ;;  %v5240_v24 = vunpack.i.l.bf16 %v5239_v20  ;;  %v1275_v25 = vpack.c.bf16 %v1274_v21, %v1273_v22  ;;  %v5249_v26 = vpop.permute.xlu1 %5248  ;;  %v1278_v41 = vpack.c.bf16 %v1268_v28, %v1267_v27 }
 0x37b   : > { %v5251_v29 = vunpack.i.h.bf16 %v5249_v26  ;;  %v5250_v30 = vunpack.i.l.bf16 %v5249_v26  ;;  %v1277_v47 = vpack.c.bf16 %v1270_v19, %v1269_v18 }
 0x37c   : > { %1391 = vmatpush1.bf16.msra.mxu0 %v1275_v25  ;;  %1433 = vmatprep.subr.bf16.mxu1 %v1278_v41 }
 0x37d   : > { %v5244_v48 = vpop.permute.xlu0 %5243  ;;  %v1498_v49 = vsel %vm1492_vm6, %v5241_v23, %v5251_v29  ;;  %v1497_v50 = vsel %vm1492_vm6, %v5240_v24, %v5250_v30  ;;  %1434 = vmatpush1.bf16.msra.mxu1 %v1277_v47 }
 0x37e   : > { %v5246_v51 = vunpack.i.h.bf16 %v5244_v48  ;;  %v5245_v52 = vunpack.i.l.bf16 %v5244_v48  ;;  %v5254_v53 = vpop.permute.xlu1 %5253  ;;  %v1501_v58 = vpack.c.bf16 %v1498_v49, %v1497_v50 }
 0x37f   : > { %v5256_v54 = vunpack.i.h.bf16 %v5254_v53  ;;  %v5255_v55 = vunpack.i.l.bf16 %v5254_v53  ;;  %4617 = vmatmul.mubr.msk.bf16.vlgmr.msra.gmra.mrb[16].mxu0 %vm932_vm2, %v5490_v46 }
 0x380   : > { %v1495_v56 = vsel %vm1492_vm6, %v5250_v30, %v5245_v52  ;;  %v1496_v57 = vsel %vm1492_vm6, %v5251_v29, %v5246_v51  ;;  %1548 = vmatprep.mubr.bf16.mxu0 %v5866_v0  ;;  %4618 = vmatmul.mubr.msk.bf16.vlgmr.msra.gmra.mrb[16].mxu1 %vm932_vm2, %v5490_v46 }
 0x381   : > { %v1502_v59 = vpack.c.bf16 %v1496_v57, %v1495_v56  ;;  %v1494_v60 = vsel %vm1492_vm6, %v5246_v51, %v5256_v54  ;;  %v1493_v61 = vsel %vm1492_vm6, %v5245_v52, %v5255_v55  ;;  %v1499_v62 = vsel %vm1492_vm6, %v5255_v55, %v5240_v24  ;;  %1591 = vmatprep.mubr.bf16.mxu1 %v5866_v0 }
 0x382   : > { %v1500_v63 = vsel %vm1492_vm6, %v5256_v54, %v5241_v23  ;;  %v1503_v1 = vpack.c.bf16 %v1494_v60, %v1493_v61 }
 0x383   : > { %1516 = vmatprep.subr.bf16.mxu0 %v1502_v59  ;;  %v1504_v3 = vpack.c.bf16 %v1500_v63, %v1499_v62 }
 0x384   : > { %1517 = vmatpush1.bf16.msra.mxu0 %v1501_v58 }
 0x385   : > { %1559 = vmatprep.subr.bf16.mxu1 %v1504_v3 }
 0x386   : > { %1560 = vmatpush1.bf16.msra.mxu1 %v1503_v1 }
 0x38b   : > { %4622 = vmatmul.mubr.msk.bf16.vlgmr.msra.gmra.mrb[16].mxu0 %vm932_vm2, %v5491_v4 }
 0x38c   : > { %1774 = vmatprep.mubr.bf16.mxu0 %v5866_v0  ;;  %4623 = vmatmul.mubr.msk.bf16.vlgmr.msra.gmra.mrb[16].mxu1 %vm932_vm2, %v5491_v4 }
 0x38d   : > { %1815 = vmatprep.mubr.bf16.mxu1 %v5866_v0 }
 0x38e   : > { %v1615_v6 = vpop.permute.xlu0 %1614 }
 0x38f   : > { %v1620_v5 = vpop.permute.xlu1 %1619 }
 0x393   : > { %v1636_v19 = vpop.permute.xlu0 %1635 }
 0x394   : > { %v1632_v8 = vpop.permute.xlu1 %1631 }
 0x45e   : > { %v1550_v7 = vpop.f32.mrb[16].mxu0 }
 0x45f   : > { %v1622_v9 = vmul.f32 %v1615_v6, %v1550_v7  ;;  %v1552_v10 = vpop.f32.mrb[17].mxu0  ;;  %v1593_v12 = vpop.f32.mrb[16].mxu1 }
 0x460   : > { %v1623_v11 = vmul.f32 %v1615_v6, %v1552_v10  ;;  %v1554_v13 = vpop.f32.mrb[18].mxu0  ;;  %v1624_v15 = vmul.f32 %v1615_v6, %v1593_v12  ;;  %v1595_v17 = vpop.f32.mrb[17].mxu1 }
 0x461   : > { %v6386_v14 = vadd.f32 %v1632_v8, %v1622_v9  ;;  %v1626_v16 = vmul.f32 %v1620_v5, %v1554_v13  ;;  %v1556_v18 = vpop.f32.mrb[19].mxu0  ;;  %v1625_v21 = vmul.f32 %v1615_v6, %v1595_v17  ;;  %v1597_v23 = vpop.f32.mrb[18].mxu1 }
 0x462   : > { %v6388_v20 = vadd.f32 %v1632_v8, %v1623_v11  ;;  %v1627_v22 = vmul.f32 %v1620_v5, %v1556_v18  ;;  %v6391_v25 = vadd.f32 %v1632_v8, %v1624_v15  ;;  %v1599_v27 = vpop.f32.mrb[19].mxu1  ;;  %v1628_v56 = vmul.f32 %v1620_v5, %v1597_v23 }
 0x463   : > { %v1654_v24 = vand.u32 2147483647, %v6386_v14  ;;  %v6393_v26 = vadd.f32 %v1636_v19, %v1626_v16  ;;  %v6396_v29 = vadd.f32 %v1632_v8, %v1625_v21  ;;  %v1629_v59 = vmul.f32 %v1620_v5, %v1599_v27 }
 0x464   : > { %v1655_v28 = vand.u32 2147483647, %v6388_v20  ;;  %v6398_v30 = vadd.f32 %v1636_v19, %v1627_v22  ;;  %v1656_v46 = vand.u32 2147483647, %v6391_v25  ;;  %v6404_v62 = vadd.f32 %v1636_v19, %v1628_v56 }
 0x465   : > { %v1662_v41 = vsub.f32 0.0, %v1654_v24  ;;  %v1658_v48 = vand.u32 2147483647, %v6393_v26  ;;  %v1657_v49 = vand.u32 2147483647, %v6396_v29  ;;  %v6406_v1 = vadd.f32 %v1636_v19, %v1629_v59 }
 0x466   : > { %v1663_v47 = vsub.f32 0.0, %v1655_v28  ;;  %v1664_v51 = vsub.f32 0.0, %v1656_v46  ;;  %v1659_v52 = vand.u32 2147483647, %v6398_v30  ;;  %v1660_v3 = vand.u32 2147483647, %v6404_v62  ;;  %v6410_v46 = vpop.permute.xlu1 %5262 }
 0x467   : > { %v1670_v50 = vmul.f32 1.442695, %v1662_v41  ;;  %v1666_v54 = vsub.f32 0.0, %v1658_v48  ;;  %v1665_v55 = vsub.f32 0.0, %v1657_v49  ;;  %v1661_v4 = vand.u32 2147483647, %v6406_v1 }
 0x468   : > { %v1672_v53 = vmul.f32 1.442695, %v1663_v47  ;;  %v1674_v57 = vmul.f32 1.442695, %v1664_v51  ;;  %v1667_v58 = vsub.f32 0.0, %v1659_v52  ;;  %v1668_v6 = vsub.f32 0.0, %v1660_v3 }
 0x469   : > { %5534 = vpow2.f32 %v1670_v50  ;;  %v1678_v60 = vmul.f32 1.442695, %v1666_v54  ;;  %v1676_v61 = vmul.f32 1.442695, %v1665_v55  ;;  %v1669_v7 = vsub.f32 0.0, %v1661_v4 }
 0x46a   : > { %5536 = vpow2.f32 %v1672_v53  ;;  %v1680_v63 = vmul.f32 1.442695, %v1667_v58  ;;  %v1682_v8 = vmul.f32 1.442695, %v1668_v6  ;;  %v1646_v48 = vmax.f32 %v6386_v14, 0.0  ;;  %v6416_v3 = vpop.permute.xlu1 %5267 }
 0x46b   : > { %5538 = vpow2.f32 %v1674_v57  ;;  %v1684_v5 = vmul.f32 1.442695, %v1669_v7  ;;  %v1647_v51 = vmax.f32 %v6388_v20, 0.0  ;;  %v1650_v58 = vmax.f32 %v6393_v26, 0.0 }
 0x46c   : > { %5540 = vpow2.f32 %v1678_v60  ;;  %v1651_v6 = vmax.f32 %v6398_v30, 0.0 }
 0x46d   : > { %5542 = vpow2.f32 %v1676_v61  ;;  %v1648_v61 = vmax.f32 %v6391_v25, 0.0 }
 0x46e   : > { %5544 = vpow2.f32 %v1680_v63 }
 0x46f   : > { %5546 = vpow2.f32 %v1682_v8  ;;  %v1649_v8 = vmax.f32 %v6396_v29, 0.0 }
 0x470   : > { %5548 = vpow2.f32 %v1684_v5 }
 0x473   : > { %v5535_v9 = vpop.eup %5534 }
 0x474   : > { %v5537_v10 = vpop.eup %5536  ;;  %v1686_v11 = vadd.f32 1.0, %v5535_v9 }
 0x475   : > { %v5539_v12 = vpop.eup %5538  ;;  %v1687_v13 = vadd.f32 1.0, %v5537_v10 }
 0x476   : > { %v5541_v15 = vpop.eup %5540  ;;  %5550 = vlog2.f32 %v1686_v11  ;;  %v1688_v16 = vadd.f32 1.0, %v5539_v12 }
 0x477   : > { %v5543_v17 = vpop.eup %5542  ;;  %5552 = vlog2.f32 %v1687_v13  ;;  %v1690_v18 = vadd.f32 1.0, %v5541_v15  ;;  %v1652_v13 = vmax.f32 %v6404_v62, 0.0 }
 0x478   : > { %v5545_v19 = vpop.eup %5544  ;;  %5554 = vlog2.f32 %v1688_v16  ;;  %v1689_v21 = vadd.f32 1.0, %v5543_v17  ;;  %v1653_v16 = vmax.f32 %v6406_v1, 0.0 }
 0x479   : > { %5556 = vlog2.f32 %v1690_v18  ;;  %v1691_v22 = vadd.f32 1.0, %v5545_v19  ;;  %v5547_v23 = vpop.eup %5546  ;;  %v5278_v18 = vpop.permute.xlu1 %5277 }
 0x47a   : > { %5558 = vlog2.f32 %v1689_v21  ;;  %v5549_v24 = vpop.eup %5548  ;;  %v1692_v27 = vadd.f32 1.0, %v5547_v23 }
 0x47b   : > { %5560 = vlog2.f32 %v1691_v22  ;;  %v1693_v28 = vadd.f32 1.0, %v5549_v24  ;;  %v6422_v22 = vpop.permute.xlu0 %5272  ;;  %v5270_v24 = vunpack.i.h.bf16 %v6416_v3 }
 0x47c   : > { %5562 = vlog2.f32 %v1692_v27  ;;  %v5269_v27 = vunpack.i.l.bf16 %v6416_v3  ;;  %v5274_v3 = vunpack.i.l.bf16 %v6422_v22 }
 0x47d   : > { %5564 = vlog2.f32 %v1693_v28 }
 0x480   : > { %v5551_v41 = vpop.eup %5550 }
 0x481   : > { %v5553_v47 = vpop.eup %5552  ;;  %v1695_v49 = vmul.f32 0.6931472, %v5551_v41 }
 0x482   : > { %v5555_v50 = vpop.eup %5554  ;;  %v1697_v52 = vmul.f32 0.6931472, %v5553_v47  ;;  %v5265_v47 = vunpack.i.h.bf16 %v6410_v46 }
 0x483   : > { %v5557_v53 = vpop.eup %5556  ;;  %v1710_v54 = vadd.f32 %v1695_v49, %v1646_v48  ;;  %v1699_v57 = vmul.f32 0.6931472, %v5555_v50  ;;  %v5264_v48 = vunpack.i.l.bf16 %v6410_v46  ;;  %v6428_v49 = vpop.permute.xlu1 %5287 }
 0x484   : > { %v5559_v55 = vpop.eup %5558  ;;  %v1711_v56 = vadd.f32 %v1697_v52, %v1647_v51  ;;  %v1703_v59 = vmul.f32 0.6931472, %v5557_v53  ;;  %v5283_v53 = vpop.permute.xlu0 %5282 }
 0x485   : > { %v5561_v60 = vpop.eup %5560  ;;  %v1701_v63 = vmul.f32 0.6931472, %v5559_v55  ;;  %5566 = vtanh.f32 %v1710_v54  ;;  %v1712_v5 = vadd.f32 %v1699_v57, %v1648_v61  ;;  %v5279_v54 = vunpack.i.l.bf16 %v5278_v18 }
 0x486   : > { %v1714_v4 = vadd.f32 %v1703_v59, %v1650_v58  ;;  %v1705_v7 = vmul.f32 0.6931472, %v5561_v60  ;;  %5568 = vtanh.f32 %v1711_v56  ;;  %v5563_v10 = vpop.eup %5562  ;;  %v1879_v55 = vsel %vm905_vm3, %v5264_v48, %v5269_v27 }
 0x487   : > { %v1713_v11 = vadd.f32 %v1701_v63, %v1649_v8  ;;  %v5565_v12 = vpop.eup %5564  ;;  %v1707_v15 = vmul.f32 0.6931472, %v5563_v10  ;;  %v1880_v56 = vsel %vm905_vm3, %v5265_v47, %v5270_v24  ;;  %v5280_v57 = vunpack.i.h.bf16 %v5278_v18  ;;  %v1734_v18 = vld [vmem:[#allocation6] sm:$0xf] }
 0x488   : > { %5570 = vtanh.f32 %v1714_v4  ;;  %v1715_v9 = vadd.f32 %v1705_v7, %v1651_v6  ;;  %v1709_v17 = vmul.f32 0.6931472, %v5565_v12  ;;  %v5275_v63 = vunpack.i.h.bf16 %v6422_v22 }
 0x489   : > { %v1716_v19 = vadd.f32 %v1707_v15, %v1652_v13  ;;  %v5285_v7 = vunpack.i.h.bf16 %v5283_v53  ;;  %v5284_v8 = vunpack.i.l.bf16 %v5283_v53  ;;  %v1882_v10 = vsel %vm905_vm3, %v5280_v57, %v5265_v47  ;;  %v5293_v15 = vpop.permute.xlu0 %5292 }
 0x48a   : > { %5572 = vtanh.f32 %v1715_v9  ;;  %v1717_v21 = vadd.f32 %v1709_v17, %v1653_v16  ;;  %v1875_v13 = vsel %vm905_vm3, %v5274_v3, %v5279_v54  ;;  %v5295_v47 = vunpack.i.h.bf16 %v5293_v15 }
 0x48b   : > { %5574 = vtanh.f32 %v1712_v5  ;;  %v1884_v5 = vpack.c.bf16 %v1880_v56, %v1879_v55 }
 0x48c   : > { %5576 = vtanh.f32 %v1713_v11 }
 0x48d   : > { %5578 = vtanh.f32 %v1716_v19  ;;  %v5303_v56 = vpop.permute.xlu0 %5302 }
 0x48e   : > { %5580 = vtanh.f32 %v1717_v21 }
 0x48f   : > { %v5567_v23 = vpop.eup %5566 }
 0x490   : > { %v5569_v28 = vpop.eup %5568  ;;  %v1726_v50 = vmul.f32 %v5567_v23, %v6386_v14  ;;  %v5290_v14 = vunpack.i.h.bf16 %v6428_v49  ;;  %v1876_v23 = vsel %vm905_vm3, %v5275_v63, %v5280_v57 }
 0x491   : > { %v1727_v58 = vmul.f32 %v5569_v28, %v6388_v20  ;;  %v1881_v20 = vsel %vm905_vm3, %v5279_v54, %v5264_v48  ;;  %v1878_v48 = vsel %vm905_vm3, %v5270_v24, %v5275_v63  ;;  %v5492_v54 = vld [vmem:[%s7156_s6 + $0x8] sm:$0xff]  }
 0x492   : > { %v5571_v41 = vpop.eup %5570  ;;  %v1850_v21 = vsel %vm1844_vm7, %v5285_v7, %v5290_v14  ;;  %v1883_v28 = vpack.c.bf16 %v1882_v10, %v1881_v20  ;;  %v5305_v20 = vunpack.i.h.bf16 %v5303_v56 }
 0x493   : > { %v1730_v51 = vmul.f32 %v5571_v41, %v6393_v26  ;;  %v5289_v26 = vunpack.i.l.bf16 %v6428_v49  ;;  %v1877_v49 = vsel %vm905_vm3, %v5269_v27, %v5274_v3  ;;  %vm3653_vm3 = vcmask 1022976  }
 0x494   : > { %v5573_v52 = vpop.eup %5572  ;;  %v1885_v53 = vpack.c.bf16 %v1878_v48, %v1877_v49  ;;  %v5495_v48 = vld [vmem:[%s7156_s6 + $0x18] sm:$0xff]  }
 0x495   : > { %v1731_v46 = vmul.f32 %v5573_v52, %v6398_v30  ;;  %v1735_v59 = vpack.c.bf16 %v1730_v51, %v1726_v50  ;;  %v5575_v60 = vpop.eup %5574  ;;  %v5298_v30 = vpop.permute.xlu1 %5297  ;;  %v1849_v19 = vsel %vm1844_vm7, %v5284_v8, %v5289_v26  ;;  %v1886_v50 = vpack.c.bf16 %v1876_v23, %v1875_v13 }
 0x496   : > { %v5577_v61 = vpop.eup %5576  ;;  %v1728_v11 = vmul.f32 %v5575_v60, %v6391_v25  ;;  %v5300_v25 = vunpack.i.h.bf16 %v5298_v30  ;;  %v5299_v22 = vunpack.i.l.bf16 %v5298_v30  ;;  %v5304_v30 = vunpack.i.l.bf16 %v5303_v56 }
 0x497   : > { %v1736_v4 = vpack.c.bf16 %v1731_v46, %v1727_v58  ;;  %v5579_v6 = vpop.eup %5578  ;;  %v1729_v16 = vmul.f32 %v5577_v61, %v6396_v29  ;;  %v5294_v29 = vunpack.i.l.bf16 %v5293_v15  ;;  %v1848_v58 = vsel %vm1844_vm7, %v5290_v14, %v5295_v47  ;;  %v5313_v61 = vpop.permute.xlu0 %5312 }
 0x498   : > { %v5581_v9 = vpop.eup %5580  ;;  %v1732_v12 = vmul.f32 %v5579_v6, %v6404_v62  ;;  %v1846_v52 = vsel %vm1844_vm7, %v5295_v47, %v5300_v25  ;;  %v1852_v24 = vsel %vm1844_vm7, %v5300_v25, %v5285_v7  ;;  %v1851_v27 = vsel %vm1844_vm7, %v5299_v22, %v5284_v8 }
 0x499   : > { %1742 = vmatprep.subr.bf16.mxu0 %v1736_v4  ;;  %v1733_v17 = vmul.f32 %v5581_v9, %v6406_v1  ;;  %v1854_v1 = vpack.c.bf16 %v1850_v21, %v1849_v19  ;;  %v1845_v51 = vsel %vm1844_vm7, %v5294_v29, %v5299_v22  ;;  %v1853_v57 = vpack.c.bf16 %v1852_v24, %v1851_v27 }
 0x49a   : > { %1743 = vmatpush1.bf16.msra.mxu0 %v1735_v59  ;;  %v1737_v62 = vpack.c.bf16 %v1732_v12, %v1728_v11  ;;  %v1856_v55 = vpack.c.bf16 %v1846_v52, %v1845_v51  ;;  %v1847_v46 = vsel %vm1844_vm7, %v5289_v26, %v5294_v29  ;;  %v5308_v59 = vpop.permute.xlu1 %5307  ;;  %v5315_v14 = vunpack.i.h.bf16 %v5313_v61 }
 0x49b   : > { %1898 = vmatprep.subr.bf16.mxu0 %v1884_v5  ;;  %v1738_v41 = vpack.c.bf16 %v1733_v17, %v1729_v16  ;;  %v1855_v60 = vpack.c.bf16 %v1848_v58, %v1847_v46  ;;  %v5310_v63 = vunpack.i.h.bf16 %v5308_v59  ;;  %v5309_v3 = vunpack.i.l.bf16 %v5308_v59  ;;  %v5323_v6 = vpop.permute.xlu0 %5322  ;;  %v5494_v16 = vld [vmem:[%s7156_s6 + $0x10] sm:$0xff]  }
 0x49c   : > { %v5314_v4 = vunpack.i.l.bf16 %v5313_v61  ;;  %v5325_v19 = vunpack.i.h.bf16 %v5323_v6  ;;  %v5324_v21 = vunpack.i.l.bf16 %v5323_v6 }
 0x49d   : > { %4624 = vmatmul.mubr.msk.bf16.vlgmr.msra.gmra.mrb[8].mxu0 %vm932_vm2, %v1734_v18  ;;  %1783 = vmatprep.subr.bf16.mxu1 %v1738_v41  ;;  %v2208_v13 = vsel %vm1132_vm4, %v5305_v20, %v5310_v63  ;;  %v2207_v15 = vsel %vm1132_vm4, %v5304_v30, %v5309_v3 }
 0x49e   : > { %1899 = vmatpush1.bf16.msra.mxu0 %v1883_v28  ;;  %1784 = vmatpush1.bf16.msra.mxu1 %v1737_v62  ;;  %v5318_v26 = vpop.permute.xlu1 %5317  ;;  %v2205_v37 = vsel %vm1132_vm4, %v5309_v3, %v5314_v4 }
 0x49f   : > { %1992 = vmatprep.subr.bf16.mxu0 %v1854_v1  ;;  %1941 = vmatprep.subr.bf16.mxu1 %v1886_v50  ;;  %v5320_v7 = vunpack.i.h.bf16 %v5318_v26  ;;  %v5319_v8 = vunpack.i.l.bf16 %v5318_v26  ;;  %v5333_v9 = vpop.permute.xlu0 %5332 }
 0x4a0   : > { %1930 = vmatprep.mubr.bf16.mxu0 %v5866_v0  ;;  %v5335_v31 = vunpack.i.h.bf16 %v5333_v9  ;;  %v5334_v35 = vunpack.i.l.bf16 %v5333_v9 }
 0x4a1   : > { %4625 = vmatmul.mubr.msk.bf16.vlgmr.msra.gmra.mrb[8].mxu1 %vm932_vm2, %v1734_v18  ;;  %v2209_v38 = vsel %vm1132_vm4, %v5319_v8, %v5304_v30  ;;  %v2211_v18 = vpack.c.bf16 %v2208_v13, %v2207_v15  ;;  %v2204_v22 = vsel %vm1132_vm4, %v5315_v14, %v5320_v7  ;;  %v2203_v62 = vsel %vm1132_vm4, %v5314_v4, %v5319_v8 }
 0x4a2   : > { %1942 = vmatpush1.bf16.msra.mxu1 %v1885_v53  ;;  %1973 = vmatprep.mubr.bf16.mxu1 %v5866_v0  ;;  %v5328_v34 = vpop.permute.xlu1 %5327  ;;  %v2213_v41 = vpack.c.bf16 %v2204_v22, %v2203_v62  ;;  %v5496_v53 = vld [vmem:[%s7156_s6 + $0x20] sm:$0xff]   ;;  %v5497_v22 = vld [vmem:[%s7157_s7 + $0x8] sm:$0xff]  }
 0x4a3   : > { %2035 = vmatprep.subr.bf16.mxu1 %v1856_v55  ;;  %v5330_v10 = vunpack.i.h.bf16 %v5328_v34  ;;  %v5329_v11 = vunpack.i.l.bf16 %v5328_v34 }
 0x4a5   : > { %4629 = vmatmul.mubr.msk.bf16.vlgmr.msra.gmra.mrb[20].mxu0 %vm932_vm2, %v5492_v54  ;;  %v2339_v32 = vsel %vm2336_vm8, %v5329_v11, %v5334_v35  ;;  %v2340_v36 = vsel %vm2336_vm8, %v5330_v10, %v5335_v31  ;;  %v2342_v29 = vsel %vm2336_vm8, %v5325_v19, %v5330_v10  ;;  %v2341_v1 = vsel %vm2336_vm8, %v5324_v21, %v5329_v11 }
 0x4a6   : > { %1993 = vmatpush1.bf16.msra.mxu0 %v1853_v57  ;;  %2024 = vmatprep.mubr.bf16.mxu0 %v5866_v0  ;;  %v2346_v25 = vpack.c.bf16 %v2340_v36, %v2339_v32  ;;  %v2345_v49 = vpack.c.bf16 %v2342_v29, %v2341_v1 }
 0x4a7   : > { %2093 = vmatprep.subr.bf16.mxu0 %v2079_v42  ;;  %v2206_v42 = vsel %vm1132_vm4, %v5310_v63, %v5315_v14 }
 0x4a8   : > { %v2212_v5 = vpack.c.bf16 %v2206_v42, %v2205_v37  ;;  %v3080_v37 = vld [vmem:[#allocation7] sm:$0xff] }
 0x4a9   : > { %4630 = vmatmul.mubr.msk.bf16.vlgmr.msra.gmra.mrb[20].mxu1 %vm932_vm2, %v5492_v54 }
 0x4aa   : > { %2036 = vmatpush1.bf16.msra.mxu1 %v1855_v60  ;;  %2067 = vmatprep.mubr.bf16.mxu1 %v5866_v0 }
 0x4ab   : > { %2136 = vmatprep.subr.bf16.mxu1 %v2081_v44  ;;  %v2210_v44 = vsel %vm1132_vm4, %v5320_v7, %v5305_v20 }
 0x4ac   : > { %v2214_v12 = vpack.c.bf16 %v2210_v44, %v2209_v38 }
 0x4b1   : > { %4632 = vmatmul.mubr.msk.bf16.vlgmr.msra.gmra.mrb[20].mxu0 %vm932_vm2, %v5493_v33 }
 0x4b2   : > { %2094 = vmatpush1.bf16.msra.mxu0 %v2078_v43  ;;  %2125 = vmatprep.mubr.bf16.mxu0 %v5866_v0  ;;  %v5338_v43 = vpop.permute.xlu1 %5337 }
 0x4b3   : > { %2226 = vmatprep.subr.bf16.mxu0 %v2212_v5  ;;  %v5339_v17 = vunpack.i.l.bf16 %v5338_v43 }
 0x4b5   : > { %4633 = vmatmul.mubr.msk.bf16.vlgmr.msra.gmra.mrb[20].mxu1 %vm932_vm2, %v5493_v33  ;;  %v2343_v23 = vsel %vm2336_vm8, %v5339_v17, %v5324_v21  ;;  %v2337_v51 = vsel %vm2336_vm8, %v5334_v35, %v5339_v17  ;;  %v3081_v33 = vld [vmem:[#allocation7 + $0x8] sm:$0xff] }
 0x4b6   : > { %2137 = vmatpush1.bf16.msra.mxu1 %v2080_v45  ;;  %2168 = vmatprep.mubr.bf16.mxu1 %v5866_v0  ;;  %v5340_v45 = vunpack.i.h.bf16 %v5338_v43 }
 0x4b7   : > { %2269 = vmatprep.subr.bf16.mxu1 %v2214_v12 }
 0x4b8   : > { %v2344_v28 = vsel %vm2336_vm8, %v5340_v45, %v5325_v19  ;;  %v2338_v50 = vsel %vm2336_vm8, %v5335_v31, %v5340_v45  ;;  %vm3977_vm8 = vcmask 1046528  }
 0x4b9   : > { %v2348_v47 = vpack.c.bf16 %v2344_v28, %v2343_v23  ;;  %v2347_v52 = vpack.c.bf16 %v2338_v50, %v2337_v51 }
 0x4bd   : > { %4637 = vmatmul.mubr.msk.bf16.vlgmr.msra.gmra.mrb[20].mxu0 %vm932_vm2, %v5494_v16 }
 0x4be   : > { %2227 = vmatpush1.bf16.msra.mxu0 %v2211_v18  ;;  %2258 = vmatprep.mubr.bf16.mxu0 %v5866_v0 }
 0x4bf   : > { %2360 = vmatprep.subr.bf16.mxu0 %v2346_v25 }
 0x4c1   : > { %4638 = vmatmul.mubr.msk.bf16.vlgmr.msra.gmra.mrb[20].mxu1 %vm932_vm2, %v5494_v16 }
 0x4c2   : > { %2270 = vmatpush1.bf16.msra.mxu1 %v2213_v41  ;;  %2301 = vmatprep.mubr.bf16.mxu1 %v5866_v0 }
 0x4c3   : > { %2403 = vmatprep.subr.bf16.mxu1 %v2348_v47 }
 0x4c9   : > { %4642 = vmatmul.mubr.msk.bf16.vlgmr.msra.gmra.mrb[20].mxu0 %vm932_vm2, %v5495_v48 }
 0x4ca   : > { %2361 = vmatpush1.bf16.msra.mxu0 %v2345_v49  ;;  %2392 = vmatprep.mubr.bf16.mxu0 %v5866_v0 }
 0x4cd   : > { %4643 = vmatmul.mubr.msk.bf16.vlgmr.msra.gmra.mrb[20].mxu1 %vm932_vm2, %v5495_v48 }
 0x4ce   : > { %2404 = vmatpush1.bf16.msra.mxu1 %v2347_v52  ;;  %2435 = vmatprep.mubr.bf16.mxu1 %v5866_v0 }
 0x4d5   : > { %4647 = vmatmul.mubr.msk.bf16.vlgmr.msra.gmra.mrb[20].mxu0 %vm932_vm2, %v5496_v53 }
 0x4d6   : > { %2556 = vmatprep.mubr.bf16.mxu0 %v5866_v0 }
 0x4d9   : > { %4648 = vmatmul.mubr.msk.bf16.vlgmr.msra.gmra.mrb[20].mxu1 %vm932_vm2, %v5496_v53 }
 0x4da   : > { %2599 = vmatprep.mubr.bf16.mxu1 %v5866_v0 }
 0x5a8   : > { %v6559_v24 = vpop.f32.mrb[20].mxu0 }
 0x5a9   : > { %v6561_v27 = vpop.f32.mrb[21].mxu0 }
 0x5aa   : > { %v6563_v54 = vpop.f32.mrb[22].mxu0 }
 0x5ab   : > { %v6565_v55 = vpop.f32.mrb[23].mxu0  ;;  %v5341_v56 = vpack.i.bf16 %v6563_v54, %v6559_v24  ;;  %v2704_v59 = vpack.c.bf16 %v6563_v54, %v6559_v24 }
 0x5ac   : > { %v5351_v57 = vpack.i.bf16 %v6565_v55, %v6561_v27  ;;  %v6571_v58 = vpop.f32.mrb[20].mxu1  ;;  %v2705_v46 = vpack.c.bf16 %v6565_v55, %v6561_v27 }
 0x5ad   : > { %5342 = vrot.lane.b32.xlu0 %v5341_v56, %s5869_s26  ;;  %v6578_v60 = vpop.f32.mrb[21].mxu1 }
 0x5ae   : > { %5352 = vrot.lane.b32.xlu1 %v5351_v57, %s5869_s26  ;;  %v6581_v61 = vpop.f32.mrb[22].mxu1 }
 0x5af   : > { %v6583_v63 = vpop.f32.mrb[23].mxu1  ;;  %v5346_v3 = vpack.i.bf16 %v6581_v61, %v6571_v58  ;;  %v2706_v26 = vpack.c.bf16 %v6581_v61, %v6571_v58  ;;  %v5499_v58 = vld [vmem:[%s7157_s7 + $0x10] sm:$0xff]  }
 0x5b0   : > { %v5356_v14 = vpack.i.bf16 %v6583_v63, %v6578_v60  ;;  %v2707_v4 = vpack.c.bf16 %v6583_v63, %v6578_v60 }
 0x5b1   : > { %5347 = vrot.lane.b32.xlu0 %v5346_v3, %s5869_s26 }
 0x5b2   : > { %5357 = vrot.lane.b32.xlu1 %v5356_v14, %s5869_s26 }
 0x5b5   : > { %5362 = vrot.lane.b32.xlu0 %v5341_v56, %s5874_s25 }
 0x5b6   : > { %5372 = vrot.lane.b32.xlu1 %v5351_v57, %s5874_s25 }
 0x5b9   : > { %5367 = vrot.lane.b32.xlu0 %v5346_v3, %s5874_s25 }
 0x5ba   : > { %5377 = vrot.lane.b32.xlu1 %v5356_v14, %s5874_s25 }
 0x5bd   : > { %5382 = vrot.lane.b32.xlu0 %v5341_v56, %s5870_s24 }
 0x5be   : > { %5392 = vrot.lane.b32.xlu1 %v5351_v57, %s5870_s24 }
 0x5c1   : > { %5387 = vrot.lane.b32.xlu0 %v5346_v3, %s5870_s24 }
 0x5c2   : > { %5397 = vrot.lane.b32.xlu1 %v5356_v14, %s5870_s24 }
 0x5c5   : > { %5402 = vrot.lane.b32.xlu0 %v5341_v56, %s5875_s14 }
 0x5c6   : > { %5412 = vrot.lane.b32.xlu1 %v5351_v57, %s5875_s14 }
 0x5c9   : > { %5407 = vrot.lane.b32.xlu0 %v5346_v3, %s5875_s14 }
 0x5ca   : > { %5417 = vrot.lane.b32.xlu1 %v5356_v14, %s5875_s14 }
 0x5cd   : > { %3084 = vperm.xlu0 %5421, %v3080_v37  }
 0x5ce   : > { %3089 = vperm.xlu1 %5422, %v3081_v33  }
 0x5d1   : > { %5424 = vset.pattern.permute.xlu0 %v5871_v2 }
 0x5d2   : > { %5423 = vset.pattern.permute.xlu1 %v5871_v2  ;;  %3105 = vperm.xlu0 %5424, %v3081_v33  }
 0x5d3   : > { %3101 = vperm.xlu1 %5423, %v3080_v37  }
 0x5d7   : > { %5425 = vset.pattern.permute.xlu1 %v5866_v0 }
 0x61f   : > { %v5343_v42 = vpop.permute.xlu0 %5342 }
 0x620   : > { %v5345_v6 = vunpack.i.h.bf16 %v5343_v42  ;;  %v5344_v7 = vunpack.i.l.bf16 %v5343_v42  ;;  %v5353_v8 = vpop.permute.xlu1 %5352 }
 0x621   : > { %v5355_v20 = vunpack.i.h.bf16 %v5353_v8  ;;  %v5354_v30 = vunpack.i.l.bf16 %v5353_v8 }
 0x623   : > { %v2505_v5 = vsel %vm1266_vm5, %v5344_v7, %v5354_v30  ;;  %v2506_v34 = vsel %vm1266_vm5, %v5345_v6, %v5355_v20  ;;  %v5348_v38 = vpop.permute.xlu0 %5347 }
 0x624   : > { %v2510_v44 = vpack.c.bf16 %v2506_v34, %v2505_v5  ;;  %v5350_v9 = vunpack.i.h.bf16 %v5348_v38  ;;  %v5349_v2 = vunpack.i.l.bf16 %v5348_v38  ;;  %v5358_v10 = vpop.permute.xlu1 %5357 }
 0x625   : > { %v5360_v11 = vunpack.i.h.bf16 %v5358_v10  ;;  %v5359_v12 = vunpack.i.l.bf16 %v5358_v10 }
 0x626   : > { %2524 = vmatprep.subr.bf16.mxu0 %v2510_v44  ;;  %v2503_v31 = vsel %vm1266_vm5, %v5354_v30, %v5349_v2  ;;  %v2504_v35 = vsel %vm1266_vm5, %v5355_v20, %v5350_v9 }
 0x627   : > { %v2508_v43 = vsel %vm1266_vm5, %v5360_v11, %v5345_v6  ;;  %v2507_v13 = vsel %vm1266_vm5, %v5359_v12, %v5344_v7  ;;  %v5363_v15 = vpop.permute.xlu0 %5362  ;;  %v2501_v16 = vsel %vm1266_vm5, %v5349_v2, %v5359_v12  ;;  %v2502_v18 = vsel %vm1266_vm5, %v5350_v9, %v5360_v11  ;;  %v5498_v2 = vld [vmem:[%s7157_s7] sm:$0xff]  }
 0x628   : > { %v2509_v32 = vpack.c.bf16 %v2508_v43, %v2507_v13  ;;  %v5365_v36 = vunpack.i.h.bf16 %v5363_v15  ;;  %v5364_v45 = vunpack.i.l.bf16 %v5363_v15  ;;  %v5373_v17 = vpop.permute.xlu1 %5372  ;;  %v2512_v25 = vpack.c.bf16 %v2502_v18, %v2501_v16 }
 0x629   : > { %v5375_v19 = vunpack.i.h.bf16 %v5373_v17  ;;  %v5374_v21 = vunpack.i.l.bf16 %v5373_v17  ;;  %v2511_v62 = vpack.c.bf16 %v2504_v35, %v2503_v31  ;;  %vm3856_vm5 = vcmask 1045504  }
 0x62a   : > { %2525 = vmatpush1.bf16.msra.mxu0 %v2509_v32  ;;  %2567 = vmatprep.subr.bf16.mxu1 %v2512_v25  ;;  %vm4947_vm7 = vmpackc.low %vm3856_vm5, %vm5877_vm12 }
 0x62b   : > { %v5368_v23 = vpop.permute.xlu0 %5367  ;;  %v2475_v28 = vsel %vm2470_vm9, %v5364_v45, %v5374_v21  ;;  %v2476_v41 = vsel %vm2470_vm9, %v5365_v36, %v5375_v19  ;;  %2568 = vmatpush1.bf16.msra.mxu1 %v2511_v62 }
 0x62c   : > { %v5370_v47 = vunpack.i.h.bf16 %v5368_v23  ;;  %v5369_v29 = vunpack.i.l.bf16 %v5368_v23  ;;  %v5378_v1 = vpop.permute.xlu1 %5377  ;;  %v2480_v48 = vpack.c.bf16 %v2476_v41, %v2475_v28 }
 0x62d   : > { %v5380_v49 = vunpack.i.h.bf16 %v5378_v1  ;;  %v5379_v50 = vunpack.i.l.bf16 %v5378_v1  ;;  %4652 = vmatmul.mubr.msk.bf16.vlgmr.msra.gmra.mrb[24].mxu0 %vm932_vm2, %v5497_v22 }
 0x62e   : > { %v2473_v51 = vsel %vm2470_vm9, %v5374_v21, %v5369_v29  ;;  %2618 = vmatprep.subr.bf16.mxu0 %v2480_v48  ;;  %2650 = vmatprep.mubr.bf16.mxu0 %v5866_v0  ;;  %v2474_v52 = vsel %vm2470_vm9, %v5375_v19, %v5370_v47 }
 0x62f   : > { %v2478_v53 = vsel %vm2470_vm9, %v5380_v49, %v5365_v36  ;;  %v2477_v56 = vsel %vm2470_vm9, %v5379_v50, %v5364_v45  ;;  %4653 = vmatmul.mubr.msk.bf16.vlgmr.msra.gmra.mrb[24].mxu1 %vm932_vm2, %v5497_v22  ;;  %v5383_v57 = vpop.permute.xlu0 %5382  ;;  %v2471_v3 = vsel %vm2470_vm9, %v5369_v29, %v5379_v50  ;;  %v2472_v37 = vsel %vm2470_vm9, %v5370_v47, %v5380_v49  ;;  %v5500_v47 = vld [vmem:[%s7157_s7 + $0x18] sm:$0xff]   ;;  %v5501_v50 = vld [vmem:[%s7157_s7 + $0x20] sm:$0xff]   ;;  %vm7054_vm9 = vmpackc.low %vm3977_vm8, %vm5877_vm12 }
 0x630   : > { %v2479_v14 = vpack.c.bf16 %v2478_v53, %v2477_v56  ;;  %v5393_v33 = vpop.permute.xlu1 %5392  ;;  %2693 = vmatprep.mubr.bf16.mxu1 %v5866_v0  ;;  %v2482_v42 = vpack.c.bf16 %v2472_v37, %v2471_v3  ;;  %v2481_v6 = vpack.c.bf16 %v2474_v52, %v2473_v51  ;;  %v5384_v38 = vunpack.i.l.bf16 %v5383_v57  ;;  %v637_v51 = vld [vmem:[#allocation9] sm:$0xff] }
 0x631   : > { %v5395_v8 = vunpack.i.h.bf16 %v5393_v33  ;;  %v5394_v20 = vunpack.i.l.bf16 %v5393_v33  ;;  %v5385_v10 = vunpack.i.h.bf16 %v5383_v57  ;;  %880 = vperm.xlu1 %5425, %v637_v51  }
 0x632   : > { %2619 = vmatpush1.bf16.msra.mxu0 %v2479_v14  ;;  %2661 = vmatprep.subr.bf16.mxu1 %v2482_v42 }
 0x633   : > { %v5388_v7 = vpop.permute.xlu0 %5387  ;;  %2719 = vmatprep.subr.bf16.mxu0 %v2705_v46  ;;  %2662 = vmatpush1.bf16.msra.mxu1 %v2481_v6  ;;  %v2833_v32 = vsel %vm1492_vm6, %v5384_v38, %v5394_v20 }
 0x634   : > { %v5390_v30 = vunpack.i.h.bf16 %v5388_v7  ;;  %v5389_v5 = vunpack.i.l.bf16 %v5388_v7  ;;  %v5398_v34 = vpop.permute.xlu1 %5397  ;;  %2762 = vmatprep.subr.bf16.mxu1 %v2707_v4 }
 0x635   : > { %v5400_v44 = vunpack.i.h.bf16 %v5398_v34  ;;  %v5399_v9 = vunpack.i.l.bf16 %v5398_v34 }
 0x636   : > { %v2831_v27 = vsel %vm1492_vm6, %v5394_v20, %v5389_v5  ;;  %v2832_v55 = vsel %vm1492_vm6, %v5395_v8, %v5390_v30 }
 0x637   : > { %v5403_v46 = vpop.permute.xlu0 %5402  ;;  %v2838_v11 = vpack.c.bf16 %v2832_v55, %v2831_v27  ;;  %v2835_v12 = vsel %vm1492_vm6, %v5399_v9, %v5384_v38  ;;  %v2836_v60 = vsel %vm1492_vm6, %v5400_v44, %v5385_v10  ;;  %v2830_v17 = vsel %vm1492_vm6, %v5390_v30, %v5400_v44 }
 0x638   : > { %v5413_v31 = vpop.permute.xlu1 %5412  ;;  %v2840_v63 = vpack.c.bf16 %v2836_v60, %v2835_v12  ;;  %v5405_v61 = vunpack.i.h.bf16 %v5403_v46  ;;  %v2829_v18 = vsel %vm1492_vm6, %v5389_v5, %v5399_v9 }
 0x639   : > { %4655 = vmatmul.mubr.msk.bf16.vlgmr.msra.gmra.mrb[24].mxu0 %vm932_vm2, %v5498_v2  ;;  %v5415_v15 = vunpack.i.h.bf16 %v5413_v31  ;;  %v5414_v16 = vunpack.i.l.bf16 %v5413_v31  ;;  %v2839_v62 = vpack.c.bf16 %v2830_v17, %v2829_v18 }
 0x63a   : > { %2720 = vmatpush1.bf16.msra.mxu0 %v2704_v59  ;;  %2751 = vmatprep.mubr.bf16.mxu0 %v5866_v0  ;;  %v2834_v59 = vsel %vm1492_vm6, %v5385_v10, %v5395_v8 }
 0x63b   : > { %4656 = vmatmul.mubr.msk.bf16.vlgmr.msra.gmra.mrb[24].mxu1 %vm932_vm2, %v5498_v2  ;;  %2852 = vmatprep.subr.bf16.mxu0 %v2838_v11  ;;  %v5408_v4 = vpop.permute.xlu0 %5407  ;;  %v2837_v19 = vpack.c.bf16 %v2834_v59, %v2833_v32  ;;  %v2968_v28 = vsel %vm2962_vm10, %v5405_v61, %v5415_v15 }
 0x63c   : > { %2763 = vmatpush1.bf16.msra.mxu1 %v2706_v26  ;;  %2794 = vmatprep.mubr.bf16.mxu1 %v5866_v0  ;;  %v5418_v35 = vpop.permute.xlu1 %5417  ;;  %v5410_v43 = vunpack.i.h.bf16 %v5408_v4  ;;  %v5409_v13 = vunpack.i.l.bf16 %v5408_v4  ;;  %v5404_v26 = vunpack.i.l.bf16 %v5403_v46 }
 0x63d   : > { %2895 = vmatprep.subr.bf16.mxu1 %v2840_v63  ;;  %v5420_v24 = vunpack.i.h.bf16 %v5418_v35  ;;  %v5419_v54 = vunpack.i.l.bf16 %v5418_v35 }
 0x63e   : > { %v2965_v36 = vsel %vm2962_vm10, %v5414_v16, %v5409_v13  ;;  %v2966_v45 = vsel %vm2962_vm10, %v5415_v15, %v5410_v43  ;;  %v2967_v41 = vsel %vm2962_vm10, %v5404_v26, %v5414_v16 }
 0x63f   : > { %v2969_v21 = vsel %vm2962_vm10, %v5419_v54, %v5404_v26  ;;  %v2970_v25 = vsel %vm2962_vm10, %v5420_v24, %v5405_v61  ;;  %v2972_v22 = vpack.c.bf16 %v2966_v45, %v2965_v36  ;;  %v2964_v29 = vsel %vm2962_vm10, %v5410_v43, %v5420_v24 }
 0x640   : > { %v2974_v23 = vpack.c.bf16 %v2970_v25, %v2969_v21  ;;  %v2963_v1 = vsel %vm2962_vm10, %v5409_v13, %v5419_v54  ;;  %v2971_v48 = vpack.c.bf16 %v2968_v28, %v2967_v41  ;;  %vm3973_vm10 = vcmask 252928  }
 0x641   : > { %v2973_v49 = vpack.c.bf16 %v2964_v29, %v2963_v1 }
 0x645   : > { %4660 = vmatmul.mubr.msk.bf16.vlgmr.msra.gmra.mrb[24].mxu0 %vm932_vm2, %v5499_v58 }
 0x646   : > { %2853 = vmatpush1.bf16.msra.mxu0 %v2837_v19  ;;  %2884 = vmatprep.mubr.bf16.mxu0 %v5866_v0 }
 0x647   : > { %4661 = vmatmul.mubr.msk.bf16.vlgmr.msra.gmra.mrb[24].mxu1 %vm932_vm2, %v5499_v58  ;;  %2986 = vmatprep.subr.bf16.mxu0 %v2972_v22 }
 0x648   : > { %2896 = vmatpush1.bf16.msra.mxu1 %v2839_v62  ;;  %2927 = vmatprep.mubr.bf16.mxu1 %v5866_v0 }
 0x649   : > { %3029 = vmatprep.subr.bf16.mxu1 %v2974_v23 }
 0x64c   : > { %v3085_v53 = vpop.permute.xlu0 %3084 }
 0x64d   : > { %v3090_v52 = vpop.permute.xlu1 %3089 }
 0x651   : > { %4665 = vmatmul.mubr.msk.bf16.vlgmr.msra.gmra.mrb[24].mxu0 %vm932_vm2, %v5500_v47  ;;  %v3106_v33 = vpop.permute.xlu0 %3105 }
 0x652   : > { %2987 = vmatpush1.bf16.msra.mxu0 %v2971_v48  ;;  %3018 = vmatprep.mubr.bf16.mxu0 %v5866_v0  ;;  %v3102_v57 = vpop.permute.xlu1 %3101 }
 0x653   : > { %4666 = vmatmul.mubr.msk.bf16.vlgmr.msra.gmra.mrb[24].mxu1 %vm932_vm2, %v5500_v47 }
 0x654   : > { %3030 = vmatpush1.bf16.msra.mxu1 %v2973_v49  ;;  %3061 = vmatprep.mubr.bf16.mxu1 %v5866_v0 }
 0x65d   : > { %4670 = vmatmul.mubr.msk.bf16.vlgmr.msra.gmra.mrb[24].mxu0 %vm932_vm2, %v5501_v50 }
 0x65e   : > { %3244 = vmatprep.mubr.bf16.mxu0 %v5866_v0 }
 0x65f   : > { %4671 = vmatmul.mubr.msk.bf16.vlgmr.msra.gmra.mrb[24].mxu1 %vm932_vm2, %v5501_v50 }
 0x660   : > { %3285 = vmatprep.mubr.bf16.mxu1 %v5866_v0 }
 0x730   : > { %v3020_v56 = vpop.f32.mrb[24].mxu0 }
 0x731   : > { %v3092_v3 = vmul.f32 %v3085_v53, %v3020_v56  ;;  %v3022_v14 = vpop.f32.mrb[25].mxu0 }
 0x732   : > { %v3093_v37 = vmul.f32 %v3085_v53, %v3022_v14  ;;  %v3063_v42 = vpop.f32.mrb[24].mxu1  ;;  %v3024_v6 = vpop.f32.mrb[26].mxu0 }
 0x733   : > { %v3094_v7 = vmul.f32 %v3085_v53, %v3063_v42  ;;  %v6719_v8 = vadd.f32 %v3102_v57, %v3092_v3  ;;  %v3096_v20 = vmul.f32 %v3090_v52, %v3024_v6  ;;  %v3065_v30 = vpop.f32.mrb[25].mxu1  ;;  %v3026_v5 = vpop.f32.mrb[27].mxu0 }
 0x734   : > { %v6721_v34 = vadd.f32 %v3102_v57, %v3093_v37  ;;  %v3095_v0 = vmul.f32 %v3085_v53, %v3065_v30  ;;  %v3097_v38 = vmul.f32 %v3090_v52, %v3026_v5  ;;  %v3067_v44 = vpop.f32.mrb[26].mxu1 }
 0x735   : > { %v6723_v9 = vadd.f32 %v3102_v57, %v3094_v7  ;;  %v3124_v2 = vand.u32 2147483647, %v6719_v8  ;;  %v3098_v10 = vmul.f32 %v3090_v52, %v3067_v44  ;;  %v3069_v27 = vpop.f32.mrb[27].mxu1  ;;  %v6729_v11 = vadd.f32 %v3106_v33, %v3096_v20 }
 0x736   : > { %v3125_v55 = vand.u32 2147483647, %v6721_v34  ;;  %v6727_v46 = vadd.f32 %v3102_v57, %v3095_v0  ;;  %v6732_v60 = vadd.f32 %v3106_v33, %v3097_v38  ;;  %v3099_v26 = vmul.f32 %v3090_v52, %v3069_v27 }
 0x737   : > { %v3126_v12 = vand.u32 2147483647, %v6723_v9  ;;  %v3132_v31 = vsub.f32 0.0, %v3124_v2  ;;  %v6735_v35 = vadd.f32 %v3106_v33, %v3098_v10  ;;  %v3128_v24 = vand.u32 2147483647, %v6729_v11 }
 0x738   : > { %v3133_v63 = vsub.f32 0.0, %v3125_v55  ;;  %v3127_v4 = vand.u32 2147483647, %v6727_v46  ;;  %v3129_v59 = vand.u32 2147483647, %v6732_v60  ;;  %v6740_v18 = vadd.f32 %v3106_v33, %v3099_v26 }
 0x739   : > { %v3134_v43 = vsub.f32 0.0, %v3126_v12  ;;  %v3140_v13 = vmul.f32 1.442695, %v3132_v31  ;;  %v3130_v32 = vand.u32 2147483647, %v6735_v35  ;;  %v3136_v61 = vsub.f32 0.0, %v3128_v24 }
 0x73a   : > { %v3142_v15 = vmul.f32 1.442695, %v3133_v63  ;;  %v3135_v16 = vsub.f32 0.0, %v3127_v4  ;;  %v3137_v36 = vsub.f32 0.0, %v3129_v59  ;;  %v3131_v25 = vand.u32 2147483647, %v6740_v18 }
 0x73b   : > { %5582 = vpow2.f32 %v3140_v13  ;;  %v3144_v54 = vmul.f32 1.442695, %v3134_v43  ;;  %v3138_v45 = vsub.f32 0.0, %v3130_v32  ;;  %v3148_v17 = vmul.f32 1.442695, %v3136_v61 }
 0x73c   : > { %5584 = vpow2.f32 %v3142_v15  ;;  %v3146_v58 = vmul.f32 1.442695, %v3135_v16  ;;  %v3150_v19 = vmul.f32 1.442695, %v3137_v36  ;;  %v3139_v22 = vsub.f32 0.0, %v3131_v25 }
 0x73d   : > { %5586 = vpow2.f32 %v3144_v54  ;;  %v3152_v21 = vmul.f32 1.442695, %v3138_v45  ;;  %v3116_v42 = vmax.f32 %v6719_v8, 0.0  ;;  %v3117_v20 = vmax.f32 %v6721_v34, 0.0 }
 0x73e   : > { %5588 = vpow2.f32 %v3146_v58  ;;  %v3154_v62 = vmul.f32 1.442695, %v3139_v22  ;;  %v3118_v0 = vmax.f32 %v6723_v9, 0.0  ;;  %v3120_v31 = vmax.f32 %v6729_v11, 0.0 }
 0x73f   : > { %5590 = vpow2.f32 %v3148_v17  ;;  %v3119_v43 = vmax.f32 %v6727_v46, 0.0  ;;  %v3121_v13 = vmax.f32 %v6732_v60, 0.0  ;;  %v3122_v16 = vmax.f32 %v6735_v35, 0.0 }
 0x740   : > { %5592 = vpow2.f32 %v3150_v19  ;;  %v3123_v26 = vmax.f32 %v6740_v18, 0.0 }
 0x741   : > { %5594 = vpow2.f32 %v3152_v21 }
 0x742   : > { %5596 = vpow2.f32 %v3154_v62 }
 0x745   : > { %v5583_v23 = vpop.eup %5582 }
 0x746   : > { %v5585_v28 = vpop.eup %5584  ;;  %v3156_v41 = vadd.f32 1.0, %v5583_v23 }
 0x747   : > { %v5587_v47 = vpop.eup %5586  ;;  %v3157_v29 = vadd.f32 1.0, %v5585_v28 }
 0x748   : > { %v5589_v1 = vpop.eup %5588  ;;  %v3158_v48 = vadd.f32 1.0, %v5587_v47  ;;  %5598 = vlog2.f32 %v3156_v41 }
 0x749   : > { %5600 = vlog2.f32 %v3157_v29  ;;  %v3159_v49 = vadd.f32 1.0, %v5589_v1  ;;  %v5591_v50 = vpop.eup %5590 }
 0x74a   : > { %5602 = vlog2.f32 %v3158_v48  ;;  %v5593_v51 = vpop.eup %5592  ;;  %v3160_v52 = vadd.f32 1.0, %v5591_v50 }
 0x74b   : > { %5604 = vlog2.f32 %v3159_v49  ;;  %v5595_v53 = vpop.eup %5594  ;;  %v3161_v56 = vadd.f32 1.0, %v5593_v51  ;;  %v5502_v51 = vld [vmem:[%s7161_s11 + $0x40] sm:$0xff]  }
 0x74c   : > { %v3162_v57 = vadd.f32 1.0, %v5595_v53  ;;  %5606 = vlog2.f32 %v3160_v52  ;;  %v5597_v3 = vpop.eup %5596 }
 0x74d   : > { %5608 = vlog2.f32 %v3161_v56  ;;  %v3163_v14 = vadd.f32 1.0, %v5597_v3  ;;  %v5505_v56 = vld [vmem:[%s7161_s11 + $0x80] sm:$0xff]   ;;  %v5508_v3 = vld [vmem:[%s7161_s11 + $0xc8] sm:$0xff]  }
 0x74e   : > { %5610 = vlog2.f32 %v3162_v57  ;;  %v5510_v57 = vld [vmem:[%s7161_s11 + $0x50] sm:$0xff]  }
 0x74f   : > { %5612 = vlog2.f32 %v3163_v14  ;;  %v5511_v14 = vld [vmem:[%s7161_s11 + $0x10] sm:$0xff]  }
 0x752   : > { %v5599_v33 = vpop.eup %5598 }
 0x753   : > { %v5601_v37 = vpop.eup %5600  ;;  %v3165_v6 = vmul.f32 0.6931472, %v5599_v33  ;;  %v5509_v33 = vld [vmem:[%s7161_s11 + $0x88] sm:$0xff]  }
 0x754   : > { %v5603_v7 = vpop.eup %5602  ;;  %v3167_v30 = vmul.f32 0.6931472, %v5601_v37  ;;  %v5514_v37 = vld [vmem:[%s7161_s11 + $0x58] sm:$0xff]  }
 0x755   : > { %v5605_v5 = vpop.eup %5604  ;;  %v3169_v38 = vmul.f32 0.6931472, %v5603_v7  ;;  %v3180_v44 = vadd.f32 %v3165_v6, %v3116_v42  ;;  %v5512_v42 = vld [vmem:[%s7161_s11 + $0xd0] sm:$0xff]   ;;  %v5515_v6 = vld [vmem:[%s7161_s11 + $0x18] sm:$0xff]  }
 0x756   : > { %v3181_v2 = vadd.f32 %v3167_v30, %v3117_v20  ;;  %v5607_v10 = vpop.eup %5606  ;;  %v3171_v12 = vmul.f32 0.6931472, %v5605_v5  ;;  %v5513_v7 = vld [vmem:[%s7161_s11 + $0x90] sm:$0xff]   ;;  %v5518_v20 = vld [vmem:[%s7161_s11 + $0x60] sm:$0xff]   ;;  %v5516_v30 = vld [vmem:[%s7161_s11 + $0xd8] sm:$0xff]  }
 0x757   : > { %v3182_v27 = vadd.f32 %v3169_v38, %v3118_v0  ;;  %v5609_v55 = vpop.eup %5608  ;;  %v3173_v63 = vmul.f32 0.6931472, %v5607_v10  ;;  %5614 = vtanh.f32 %v3180_v44  ;;  %v5519_v5 = vld [vmem:[%s7161_s11 + $0x20] sm:$0xff]   ;;  %v5517_v0 = vld [vmem:[%s7161_s11 + $0x98] sm:$0xff]   ;;  %v5522_v38 = vld [vmem:[%s7161_s11 + $0x68] sm:$0xff]  }
 0x758   : > { %v5611_v4 = vpop.eup %5610  ;;  %v3175_v15 = vmul.f32 0.6931472, %v5609_v55  ;;  %5616 = vtanh.f32 %v3181_v2  ;;  %v3183_v32 = vadd.f32 %v3171_v12, %v3119_v43  ;;  %v5520_v44 = vld [vmem:[%s7161_s11 + $0xe0] sm:$0xff]   ;;  %v5523_v2 = vld [vmem:[%s7161_s11 + $0x28] sm:$0xff]   ;;  %v5530_v43 = vld [vmem:[%s7161_s11 + $0x78] sm:$0xff]  }
 0x759   : > { %v3177_v24 = vmul.f32 0.6931472, %v5611_v4  ;;  %v3184_v54 = vadd.f32 %v3173_v63, %v3120_v31  ;;  %5618 = vtanh.f32 %v3182_v27  ;;  %v5613_v61 = vpop.eup %5612  ;;  %v5521_v10 = vld [vmem:[%s7161_s11 + $0xa0] sm:$0xff]   ;;  %v5526_v27 = vld [vmem:[%s7161_s11 + $0x70] sm:$0xff]   ;;  %v5524_v55 = vld [vmem:[%s7161_s11 + $0xe8] sm:$0xff]  }
 0x75a   : > { %v3185_v59 = vadd.f32 %v3175_v15, %v3121_v13  ;;  %v3179_v36 = vmul.f32 0.6931472, %v5613_v61  ;;  %v5525_v12 = vld [vmem:[%s7161_s11 + $0xa8] sm:$0xff]   ;;  %v5527_v31 = vld [vmem:[%s7161_s11 + $0x30] sm:$0xff]   ;;  %v5531_v13 = vld [vmem:[%s7161_s11 + $0x38] sm:$0xff]  }
 0x75b   : > { %v3186_v58 = vadd.f32 %v3177_v24, %v3122_v16  ;;  %5620 = vtanh.f32 %v3184_v54  ;;  %v5528_v63 = vld [vmem:[%s7161_s11 + $0xf0] sm:$0xff]   ;;  %v5532_v15 = vld [vmem:[%s7161_s11 + $0xf8] sm:$0xff]   ;;  %v5876_v24 = vmov 0.0|0.0   ;;  %v881_v54 = vpop.permute.xlu1 %880 }
 0x75c   : > { %5622 = vtanh.f32 %v3185_v59  ;;  %v3187_v45 = vadd.f32 %v3179_v36, %v3123_v26  ;;  %v5529_v4 = vld [vmem:[%s7161_s11 + $0xb0] sm:$0xff]   ;;  %v5533_v16 = vld [vmem:[%s7161_s11 + $0xb8] sm:$0xff]  }
 0x75d   : > { %5624 = vtanh.f32 %v3186_v58 }
 0x75e   : > { %5626 = vtanh.f32 %v3183_v32 }
 0x75f   : > { %5628 = vtanh.f32 %v3187_v45 }
 0x761   : > { %v5615_v17 = vpop.eup %5614 }
 0x762   : > { %v5617_v19 = vpop.eup %5616  ;;  %v3196_v62 = vmul.f32 %v5615_v17, %v6719_v8 }
 0x763   : > { %v5619_v21 = vpop.eup %5618  ;;  %v3197_v41 = vmul.f32 %v5617_v19, %v6721_v34 }
 0x764   : > { %v3198_v1 = vmul.f32 %v5619_v21, %v6723_v9  ;;  %v3204_v9 = vld [vmem:[%s7159_s9] sm:$0xf] }
 0x765   : > { %v5621_v25 = vpop.eup %5620 }
 0x766   : > { %v5623_v22 = vpop.eup %5622  ;;  %v3200_v23 = vmul.f32 %v5621_v25, %v6729_v11 }
 0x767   : > { %v5625_v28 = vpop.eup %5624  ;;  %v3201_v47 = vmul.f32 %v5623_v22, %v6732_v60  ;;  %v5503_v60 = vld [vmem:[%s7161_s11] sm:$0xff]  }
 0x768   : > { %v3205_v29 = vpack.c.bf16 %v3200_v23, %v3196_v62  ;;  %v3202_v48 = vmul.f32 %v5625_v28, %v6735_v35  ;;  %v5627_v49 = vpop.eup %5626  ;;  %v5506_v35 = vld [vmem:[%s7161_s11 + $0x48] sm:$0xff]  }
 0x769   : > { %v3206_v50 = vpack.c.bf16 %v3201_v47, %v3197_v41  ;;  %v5629_v8 = vpop.eup %5628  ;;  %v3199_v11 = vmul.f32 %v5627_v49, %v6727_v46  ;;  %v5504_v46 = vld [vmem:[%s7161_s11 + $0xc0] sm:$0xff]   ;;  %v705_v49 = vld [vmem:[%s7162_s12 + $0x18] sm:$0x1] }
 0x76a   : > { %v3207_v52 = vpack.c.bf16 %v3202_v48, %v3198_v1  ;;  %v3203_v34 = vmul.f32 %v5629_v8, %v6740_v18  ;;  %v5507_v18 = vld [vmem:[%s7161_s11 + $0x8] sm:$0xff]   ;;  %v702_v47 = vld [vmem:[%s7162_s12] sm:$0xff]  ;;  %v704_v48 = vld [vmem:[%s7162_s12 + $0x10] sm:$0xff] }
 0x76b   : > { %3212 = vmatprep.subr.bf16.mxu0 %v3206_v50  ;;  %v4908_v50 = vpack.c.bf16 %v705_v49, %v704_v48  ;;  %v3663_v8 = vld [vmem:[%s7165_s15 + $0x10] sm:$0xff] }
 0x76c   : > { %3213 = vmatpush1.bf16.msra.mxu0 %v3205_v29  ;;  %v3208_v53 = vpack.c.bf16 %v3203_v34, %v3199_v11  ;;  %v703_v29 = vld [vmem:[%s7162_s12 + $0x8] sm:$0xff]  ;;  %v6908_v11 = vld [vmem:[%s7165_s15 + $0x20] sm:$0xff] }
 0x76d   : > { %4724 = vmatprep.subr.bf16.mxu0 %v5502_v51  ;;  %v4905_v1 = vpack.c.bf16 %v703_v29, %v702_v47  ;;  %v5879_v51 = vmov 0.0  }
 0x76e   : > { %3253 = vmatprep.subr.bf16.mxu1 %v3208_v53  ;;  %v6927_v53 = vld [vmem:[%s7165_s15 + $0x50] sm:$0xff] }
 0x76f   : > { %4672 = vmatmul.mubr.msk.bf16.vlgmr.msra.gmra.mrb[8].mxu0 %vm932_vm2, %v3204_v9  ;;  %3254 = vmatpush1.bf16.msra.mxu1 %v3207_v52  ;;  %v6900_v52 = vld [vmem:[%s7165_s15] sm:$0xff] }
 0x770   : > { %4725 = vmatpush3.bf16.msra.mxu0 %v5503_v60  ;;  %4746 = vmatprep.subr.bf16.mxu1 %v5504_v46  ;;  %v4912_v34 = vpack.c.bf16 %v3663_v8, %v6900_v52 }
 0x771   : > { %4726 = vmatprep.subr.bf16.mxu0 %v5506_v35  ;;  %v6922_v35 = vld [vmem:[%s7165_s15 + $0x40] sm:$0xff] }
 0x772   : > { %4673 = vmatmul.mubr.msk.bf16.vlgmr.msra.gmra.mrb[8].mxu1 %vm932_vm2, %v3204_v9  ;;  %v6914_v9 = vld [vmem:[%s7165_s15 + $0x30] sm:$0xff]  ;;  %v4918_v46 = vpack.c.bf16 %v6927_v53, %v6922_v35  ;;  %vm4934_vm2 = vmpackc.low %vm3681_vm0, %vm5877_vm12  ;;  %vm4179_vm12 = vcmask 56320  }
 0x773   : > { %4747 = vmatpush3.bf16.msra.mxu1 %v5505_v56  ;;  %v4915_v60 = vpack.c.bf16 %v6914_v9, %v6908_v11  ;;  %v3669_v56 = vld [vmem:[%s7165_s15 + $0x70] sm:$0xff] }
 0x774   : > { %4727 = vmatpush3.bf16.msra.mxu0 %v5507_v18  ;;  %4748 = vmatprep.subr.bf16.mxu1 %v5508_v3  ;;  %v6935_v18 = vld [vmem:[%s7165_s15 + $0x60] sm:$0xff] }
 0x775   : > { %4728 = vmatprep.subr.bf16.mxu0 %v5510_v57  ;;  %v4921_v57 = vpack.c.bf16 %v3669_v56, %v6935_v18 }
 0x777   : > { %4749 = vmatpush3.bf16.msra.mxu1 %v5509_v33 }
 0x778   : > { %4729 = vmatpush3.bf16.msra.mxu0 %v5511_v14  ;;  %4750 = vmatprep.subr.bf16.mxu1 %v5512_v42 }
 0x779   : > { %4730 = vmatprep.subr.bf16.mxu0 %v5514_v37 }
 0x77b   : > { %4751 = vmatpush3.bf16.msra.mxu1 %v5513_v7 }
 0x77c   : > { %4731 = vmatpush3.bf16.msra.mxu0 %v5515_v6  ;;  %4752 = vmatprep.subr.bf16.mxu1 %v5516_v30 }
 0x77d   : > { %4732 = vmatprep.subr.bf16.mxu0 %v5518_v20 }
 0x77f   : > { %4753 = vmatpush3.bf16.msra.mxu1 %v5517_v0 }
 0x780   : > { %4733 = vmatpush3.bf16.msra.mxu0 %v5519_v5  ;;  %4754 = vmatprep.subr.bf16.mxu1 %v5520_v44  ;;  %v3671_v44 = vld [vmem:[%s7165_s15 + $0x90] sm:$0xff] }
 0x781   : > { %4734 = vmatprep.subr.bf16.mxu0 %v5522_v38  ;;  %v3670_v38 = vld [vmem:[%s7165_s15 + $0x80] sm:$0xff] }
 0x783   : > { %4755 = vmatpush3.bf16.msra.mxu1 %v5521_v10  ;;  %v3672_v10 = vld [vmem:[%s7165_s15 + $0xa0] sm:$0xff] }
 0x784   : > { %4735 = vmatpush3.bf16.msra.mxu0 %v5523_v2  ;;  %4756 = vmatprep.subr.bf16.mxu1 %v5524_v55  ;;  %v4924_v2 = vpack.c.bf16 %v3671_v44, %v3670_v38 }
 0x785   : > { %4736 = vmatprep.subr.bf16.mxu0 %v5526_v27  ;;  %v3673_v27 = vld [vmem:[%s7165_s15 + $0xb0] sm:$0xff] }
 0x786   : > { %v4927_v55 = vpack.c.bf16 %v3673_v27, %v3672_v10 }
 0x787   : > { %4757 = vmatpush3.bf16.msra.mxu1 %v5525_v12  ;;  %v3674_v12 = vld [vmem:[%s7165_s15 + $0xc0] sm:$0xff] }
 0x788   : > { %4737 = vmatpush3.bf16.msra.mxu0 %v5527_v31  ;;  %4758 = vmatprep.subr.bf16.mxu1 %v5528_v63  ;;  %v3675_v31 = vld [vmem:[%s7165_s15 + $0xd0] sm:$0xff] }
 0x789   : > { %4738 = vmatprep.subr.bf16.mxu0 %v5530_v43  ;;  %v4930_v63 = vpack.c.bf16 %v3675_v31, %v3674_v12  ;;  %v3677_v43 = vld [vmem:[%s7165_s15 + $0xf0] sm:$0x1f] }
 0x78b   : > { %4759 = vmatpush3.bf16.msra.mxu1 %v5529_v4  ;;  %v3676_v4 = vld [vmem:[%s7165_s15 + $0xe0] sm:$0xff] }
 0x78c   : > { %4739 = vmatpush3.bf16.msra.mxu0 %v5531_v13  ;;  %4760 = vmatprep.subr.bf16.mxu1 %v5532_v15  ;;  %v4933_v13 = vpack.c.bf16 %v3677_v43, %v3676_v4  ;;  %v6977_v15 = vld [vmem:[%s7165_s15 + $0x18] sm:$0xff] }
 0x78d   : > { %4904 = vmatprep.subr.bf16.mxu0 %v5876_v24 }
 0x78f   : > { %4761 = vmatpush3.bf16.msra.mxu1 %v5533_v16  ;;  %v6982_v16 = vld [vmem:[%s7165_s15 + $0x8] sm:$0xff] }
 0x790   : > { %4911 = vmatprep.subr.bf16.mxu1 %v5876_v24 }
 0x842   : > { %v3246_v59 = vpop.f32.mrb[8].mxu0 }
 0x843   : > { %v6862_v32 = vadd.f32 %v3246_v59, %v881_v54  ;;  %v3248_v58 = vpop.f32.mrb[9].mxu0  ;;  %v5431_v59 = vpack.i.bf16 %v6977_v15, %v3663_v8 }
 0x844   : > { %v6864_v61 = vadd.f32 %v3248_v58, %v881_v54  ;;  %v3250_v26 = vpop.f32.mrb[10].mxu0  ;;  %v5426_v58 = vpack.i.bf16 %v6982_v16, %v6900_v52 }
 0x845   : > { %v3251_v36 = vpop.f32.mrb[11].mxu0  ;;  %v3287_v17 = vpop.f32.mrb[8].mxu1  ;;  %v3298_v19 = vpack.c.bf16 %v6862_v32, %v6862_v32  ;;  %v6993_v26 = vld [vmem:[%s7165_s15 + $0x28] sm:$0xff]  ;;  %5432 = vrot.lane.b32.xlu0 %v5431_v59, %s5880_s1 }
 0x846   : > { %v3299_v45 = vpack.c.bf16 %v6864_v61, %v6864_v61  ;;  %v6870_v21 = vadd.f32 %v3287_v17, %v881_v54  ;;  %v3289_v25 = vpop.f32.mrb[9].mxu1  ;;  %5427 = vrot.lane.b32.xlu1 %v5426_v58, %s5880_s1  ;;  %v3784_v17 = vld [vmem:[%s7165_s15 + $0x58] sm:$0xff] }
 0x847   : > { %v6872_v22 = vadd.f32 %v3289_v25, %v881_v54  ;;  %v3291_v62 = vpop.f32.mrb[10].mxu1  ;;  %v3780_v54 = vld [vmem:[%s7165_s15 + $0x38] sm:$0xff]  ;;  %v5451_v25 = vpack.i.bf16 %v3784_v17, %v6927_v53 }
 0x848   : > { %3526 = vmatprep.mubr.bf16.mxu0 %v3299_v45  ;;  %v3292_v23 = vpop.f32.mrb[11].mxu1  ;;  %v3300_v41 = vpack.c.bf16 %v6870_v21, %v6870_v21  ;;  %v5441_v36 = vpack.i.bf16 %v3780_v54, %v6914_v9  ;;  %v5436_v45 = vpack.i.bf16 %v6993_v26, %v6908_v11 }
 0x849   : > { %3527 = vmatmul.mubr.bf16.vlgmr.msra.gmra.mrb[28].mxu0 %v3298_v19  ;;  %v3301_v28 = vpack.c.bf16 %v6872_v22, %v6872_v22  ;;  %v3782_v19 = vld [vmem:[%s7165_s15 + $0x48] sm:$0xff]  ;;  %v3787_v23 = vld [vmem:[%s7165_s15 + $0x70] sm:$0x3f] }
 0x84a   : > { %4906 = vmatpush3.bf16.msra.mxu0 %v4905_v1  ;;  %4819 = vmatprep.mubr.msk.f32.mxu0 %vm5878_vm14, %v5879_v51  ;;  %v5446_v62 = vpack.i.bf16 %v3782_v19, %v6922_v35  ;;  %v706_v1 = vld [vmem:[#allocation10] sm:$0xff] }
 0x84b   : > { %3566 = vmatprep.mubr.bf16.mxu1 %v3301_v28  ;;  %4907 = vmatprep.subr.bf16.mxu0 %v5876_v24  ;;  %v3788_v28 = vld [vmem:[%s7165_s15 + $0x78] sm:$0x3f]  ;;  %v707_v35 = vld [vmem:[%s7194_s29] sm:$0x1] }
 0x84c   : > { %3567 = vmatmul.mubr.bf16.vlgmr.msra.gmra.mrb[28].mxu1 %v3300_v41  ;;  %5442 = vrot.lane.b32.xlu0 %v5441_v36, %s5880_s1  ;;  %v3786_v41 = vld [vmem:[%s7165_s15 + $0x68] sm:$0xff]  ;;  %v5461_v47 = vpack.i.bf16 %v3788_v28, %v3787_v23 }
 0x84d   : > { %4854 = vmatprep.mubr.msk.f32.mxu1 %vm5878_vm14, %v5879_v51  ;;  %4913 = vmatpush3.bf16.msra.mxu1 %v4912_v34  ;;  %v5456_v29 = vpack.i.bf16 %v3786_v41, %v6935_v18  ;;  %v3931_v18 = vshrl.u32 %v903_v39, 7 }
 0x84e   : > { %4910 = vmatpush3.bf16.msk.msra.mxu0 %vm4909_vm13, %v4908_v50  ;;  %4914 = vmatprep.subr.bf16.mxu1 %v5876_v24  ;;  %vm4283_vm13 = vcmask 1042432  }
 0x84f   : > { %4936 = vmatprep.subr.bf16.mxu0 %v5876_v24  ;;  %5437 = vrot.lane.b32.xlu1 %v5436_v45, %s5880_s1 }
 0x850   : > { %5452 = vrot.lane.b32.xlu0 %v5451_v25, %s5880_s1 }
 0x851   : > { %4916 = vmatpush3.bf16.msra.mxu1 %v4915_v60 }
 0x852   : > { %4917 = vmatprep.subr.bf16.mxu1 %v5876_v24 }
 0x853   : > { %5447 = vrot.lane.b32.xlu1 %v5446_v62, %s5880_s1 }
 0x854   : > { %5462 = vrot.lane.b32.xlu0 %v5461_v47, %s5880_s1 }
 0x855   : > { %4919 = vmatpush3.bf16.msra.mxu1 %v4918_v46 }
 0x856   : > { %4920 = vmatprep.subr.bf16.mxu1 %v5876_v24 }
 0x857   : > { %5457 = vrot.lane.b32.xlu1 %v5456_v29, %s5880_s1  ;;  %v3957_v29 = vld [vmem:[%s7165_s15 + $0x38] sm:$0x7f]  ;;  %s5886_s1 = smov 26  }
 0x859   : > { %4922 = vmatpush3.bf16.msra.mxu1 %v4921_v57 }
 0x85a   : > { %4923 = vmatprep.subr.bf16.mxu1 %v5876_v24 }
 0x85d   : > { %4925 = vmatpush3.bf16.msra.mxu1 %v4924_v2 }
 0x85e   : > { %4926 = vmatprep.subr.bf16.mxu1 %v5876_v24 }
 0x861   : > { %4928 = vmatpush3.bf16.msra.mxu1 %v4927_v55 }
 0x862   : > { %4929 = vmatprep.subr.bf16.mxu1 %v5876_v24 }
 0x865   : > { %4931 = vmatpush3.bf16.msra.mxu1 %v4930_v63 }
 0x866   : > { %4932 = vmatprep.subr.bf16.mxu1 %v5876_v24 }
 0x869   : > { %4935 = vmatpush3.bf16.msk.msra.mxu1 %vm4934_vm2, %v4933_v13 }
 0x86a   : > { %4894 = vmatprep.subr.mxu1 %v5879_v51 }
 0x8b7   : > { %v5433_v56 = vpop.permute.xlu0 %5432 }
 0x8b8   : > { %v5428_v57 = vpop.permute.xlu1 %5427 }
 0x8c1   : > { %v5438_v39 = vpop.permute.xlu1 %5437 }
 0x8c2   : > { %v5440_v2 = vunpack.i.h.bf16 %v5438_v39  ;;  %v5439_v10 = vunpack.i.l.bf16 %v5438_v39  ;;  %v4071_v39 = vld [vmem:[%s7165_s15 + $0x18] sm:$0x7f] }
 0x8c4   : > { %v3839_v55 = vsel %vm733_vm1, %v5439_v10, %v5440_v2  ;;  %v5476_v2 = vpack.i.bf16 %v4071_v39, %v6982_v16 }
 0x8c5   : > { %v5448_v63 = vpop.permute.xlu1 %5447 }
 0x8c6   : > { %v5450_v13 = vunpack.i.h.bf16 %v5448_v63  ;;  %v5449_v54 = vunpack.i.l.bf16 %v5448_v63 }
 0x8c8   : > { %v3841_v58 = vsel %vm733_vm1, %v5449_v54, %v5450_v13 }
 0x8c9   : > { %v5458_v17 = vpop.permute.xlu1 %5457 }
 0x8ca   : > { %v5460_v62 = vunpack.i.h.bf16 %v5458_v17  ;;  %v5459_v23 = vunpack.i.l.bf16 %v5458_v17 }
 0x8cc   : > { %v3843_v41 = vsel %vm733_vm1, %v5459_v23, %v5460_v62 }
 0x91c   : > { %v4740_v3 = vpop.f32.mrb[28].mxu0 }
 0x91d   : > { %v4741_v14 = vpop.f32.mrb[29].mxu0 }
 0x91e   : > { %v4742_v33 = vadd.f32 %v4741_v14, %v4740_v3  ;;  %v4743_v37 = vpop.f32.mrb[30].mxu0  ;;  %v5435_v3 = vunpack.i.h.bf16 %v5433_v56  ;;  %v5434_v14 = vunpack.i.l.bf16 %v5433_v56 }
 0x91f   : > { %v4744_v42 = vpop.f32.mrb[31].mxu0  ;;  %v4762_v6 = vpop.f32.mrb[28].mxu1  ;;  %v5429_v37 = vunpack.i.l.bf16 %v5428_v57 }
 0x920   : > { %v4763_v7 = vpop.f32.mrb[29].mxu1  ;;  %v3932_v42 = vsub.s32 0, %v3931_v18 }
 0x921   : > { %v4764_v20 = vadd.f32 %v4763_v7, %v4762_v6  ;;  %v4765_v30 = vpop.f32.mrb[30].mxu1  ;;  %v3755_v6 = vld [vmem:[%s7195_s28] sm:$0x1]  ;;  %v3838_v7 = vsel %vm733_vm1, %v5434_v14, %v5435_v3  ;;  %s5888_s28 = smov 13  }
 0x922   : > { %v4766_v5 = vpop.f32.mrb[31].mxu1  ;;  %v7027_v30 = vrot.slane %v3755_v6, %v3932_v42 }
 0x923   : > { %v3569_v0 = vadd.f32 %v4764_v20, %v4742_v33  ;;  %v5430_v33 = vunpack.i.h.bf16 %v5428_v57 }
 0x924   : > { %3934 = vrot.lane.b32.xlu0 %v7027_v30, %s5881_s30 }
 0x925   : > { %4820 = vmatmul.mubr.msk.f32.vlgmr.msra.gmra.mrb[32].mxu0 %vm3574_vm15, %v3569_v0  ;;  %v3837_v20 = vsel %vm733_vm1, %v5429_v37, %v5430_v33  ;;  %v5443_v0 = vpop.permute.xlu0 %5442  ;;  %vm4399_vm15 = vcmp.lt.s32.totalorder %v6221_v40, 107 }
 0x926   : > { %4873 = vmatprep.mubr.msk.f32.mxu0 %vm5878_vm14, %v5879_v51  ;;  %v4937_v5 = vpack.c.bf16 %v3838_v7, %v3837_v20  ;;  %v5445_v38 = vunpack.i.h.bf16 %v5443_v0  ;;  %v5444_v44 = vunpack.i.l.bf16 %v5443_v0 }
 0x928   : > { %4938 = vmatpush3.bf16.msra.mxu0 %v4937_v5  ;;  %v3840_v27 = vsel %vm733_vm1, %v5444_v44, %v5445_v38 }
 0x929   : > { %4939 = vmatprep.subr.bf16.mxu0 %v5876_v24  ;;  %v4940_v12 = vpack.c.bf16 %v3840_v27, %v3839_v55  ;;  %v5453_v31 = vpop.permute.xlu0 %5452 }
 0x92a   : > { %v5455_v4 = vunpack.i.h.bf16 %v5453_v31  ;;  %v5454_v43 = vunpack.i.l.bf16 %v5453_v31 }
 0x92c   : > { %4941 = vmatpush3.bf16.msra.mxu0 %v4940_v12  ;;  %v3842_v59 = vsel %vm733_vm1, %v5454_v43, %v5455_v4 }
 0x92d   : > { %4942 = vmatprep.subr.bf16.mxu0 %v5876_v24  ;;  %v4943_v36 = vpack.c.bf16 %v3842_v59, %v3841_v58  ;;  %v5463_v45 = vpop.permute.xlu0 %5462 }
 0x92e   : > { %v5465_v19 = vunpack.i.h.bf16 %v5463_v45  ;;  %v5464_v25 = vunpack.i.l.bf16 %v5463_v45 }
 0x930   : > { %4944 = vmatpush3.bf16.msra.mxu0 %v4943_v36  ;;  %v3844_v28 = vsel %vm733_vm1, %v5464_v25, %v5465_v19  ;;  %vm3852_vm1 = vcmask 506880  }
 0x931   : > { %4945 = vmatprep.subr.bf16.mxu0 %v5876_v24  ;;  %v4946_v47 = vpack.c.bf16 %v3844_v28, %v3843_v41 }
 0x934   : > { %4948 = vmatpush3.bf16.msk.msra.mxu0 %vm4947_vm7, %v4946_v47 }
 0x935   : > { %4949 = vmatprep.subr.bf16.mxu0 %v5876_v24 }
 0x9f8   : > { %v3648_v48 = vpop.f32.mrb[32].mxu0 }
 0x9f9   : > { %v3652_v49 = vmul.f32 %v3648_v48, %v706_v1  ;;  %v4821_v50 = vpop.f32.mrb[33].mxu0  ;;  %v5471_v1 = vpack.i.bf16 %v3957_v29, %v6993_v26 }
 0x9fa   : > { %v5466_v50 = vpack.i.bf16 %v6977_v15, %v6982_v16  ;;  %v3935_v15 = vpop.permute.xlu0 %3934 }
 0x9fb   : > { %v3654_v52 = vsel %vm3653_vm3, %v3652_v49, 0.0  ;;  %5472 = vrot.lane.b32.xlu0 %v5471_v1, %s5882_s20 }
 0x9fc   : > { %v3655_v8 = vrot.slane %v3654_v52, 4 }
 0x9fe   : > { %v3656_v11 = vadd.f32 %v3655_v8, %v3654_v52 }
 0x9ff   : > { %4050 = vrot.lane.b32.xlu0 %v7027_v30, %s5883_s4  ;;  %s4723_s4 = sshll.u32 %s7201_s27, 5 }
 0xa00   : > { %v3657_v34 = vrot.slane %v3656_v11, 2 }
 0xa02   : > { %v3658_v9 = vadd.f32 %v3657_v34, %v3656_v11 }
 0xa04   : > { %v3659_v60 = vrot.slane %v3658_v9, 1 }
 0xa06   : > { %v3660_v53 = vadd.f32 %v3659_v60, %v3658_v9 }
 0xa08   : > { %v3661_v46 = vadd.f32 %v3660_v53, %v707_v35 }
 0xa0a   : > { %4855 = vmatmul.mubr.msk.f32.vlgmr.msra.gmra.mrb[32].mxu1 %vm3653_vm3, %v3661_v46 }
 0xa0b   : > { %4896 = vmatprep.mubr.msk.f32.mxu1 %vm5878_vm14, %v5879_v51 }
 0xa6d   : > { %v5473_v33 = vpop.permute.xlu0 %5472 }
 0xa6e   : > { %v5474_v7 = vunpack.i.l.bf16 %v5473_v33 }
 0xa71   : > { %v4051_v23 = vpop.permute.xlu0 %4050 }
 0xadd   : > { %v3751_v48 = vpop.f32.mrb[32].mxu1 }
 0xade   : > { %3769 = vrot.lane.b32.xlu1 %v3751_v48, %s5881_s30  ;;  %v4856_v49 = vpop.f32.mrb[33].mxu1  ;;  %v3756_v52 = vadd.f32 %v3755_v6, %v3751_v48  ;;  %v5475_v6 = vunpack.i.h.bf16 %v5473_v33 }
 0xae0   : > { %v3758_v8 = vand.u32 2147483647, %v3756_v52  ;;  %v3757_v53 = vmax.f32 %v3756_v52, 0.0  ;;  %v4953_v5 = vpack.c.bf16 %v5475_v6, %v5474_v7 }
 0xae2   : > { %5467 = vrot.lane.b32.xlu1 %v5466_v50, %s5882_s20  ;;  %v3759_v11 = vsub.f32 0.0, %v3758_v8  ;;  %s5891_s20 = smov 10  }
 0xae4   : > { %v3760_v34 = vmul.f32 1.442695, %v3759_v11 }
 0xae6   : > { %5630 = vpow2.f32 %v3760_v34 }
 0xaf0   : > { %v5631_v9 = vpop.eup %5630 }
 0xaf1   : > { %v3762_v60 = vadd.f32 1.0, %v5631_v9 }
 0xaf3   : > { %5632 = vlog2.f32 %v3762_v60 }
 0xafd   : > { %v5633_v35 = vpop.eup %5632 }
 0xafe   : > { %v3764_v26 = vmul.f32 0.6931472, %v5633_v35  ;;  %v4175_v35 = vld [vmem:[%s7165_s15 + $0x8] sm:$0x7f] }
 0xb00   : > { %v3765_v46 = vadd.f32 %v3764_v26, %v3757_v53 }
 0xb02   : > { %5634 = vtanh.f32 %v3765_v46 }
 0xb0c   : > { %v5635_v18 = vpop.eup %5634 }
 0xb0d   : > { %v3767_v56 = vmul.f32 %v5635_v18, %v3756_v52 }
 0xb50   : > { %v3770_v57 = vpop.permute.xlu1 %3769 }
 0xb51   : > { %v3772_v3 = vadd.f32 %v3770_v57, %v3767_v56 }
 0xb53   : > { %4874 = vmatmul.mubr.msk.f32.vlgmr.msra.gmra.mrb[34].mxu0 %vm3852_vm1, %v3772_v3 }
 0xb54   : > { %4884 = vmatprep.mubr.msk.f32.mxu0 %vm5878_vm14, %v5879_v51  ;;  %v5468_v14 = vpop.permute.xlu1 %5467 }
 0xb55   : > { %v5470_v37 = vunpack.i.h.bf16 %v5468_v14  ;;  %v5469_v42 = vunpack.i.l.bf16 %v5468_v14 }
 0xb57   : > { %v4950_v20 = vpack.c.bf16 %v5470_v37, %v5469_v42 }
 0xb59   : > { %4951 = vmatpush3.bf16.msra.mxu0 %v4950_v20 }
 0xb5a   : > { %4952 = vmatprep.subr.bf16.mxu0 %v5876_v24 }
 0xb5d   : > { %4955 = vmatpush3.bf16.msk.msra.mxu0 %vm7054_vm9, %v4953_v5 }
 0xb5e   : > { %4956 = vmatprep.subr.bf16.mxu0 %v5876_v24 }
 0xc26   : > { %v3925_v38 = vpop.f32.mrb[34].mxu0 }
 0xc27   : > { %3950 = vrot.lane.b32.xlu1 %v3925_v38, %s5884_s23  ;;  %v4875_v44 = vpop.f32.mrb[35].mxu0  ;;  %v3937_v10 = vadd.f32 %v3935_v15, %v3925_v38  ;;  %s7198_s23 = sld [smem:[#allocation22_spill]] }
 0xc29   : > { %v3939_v24 = vand.u32 2147483647, %v3937_v10  ;;  %v3938_v43 = vmax.f32 %v3937_v10, 0.0 }
 0xc2b   : > { %5477 = vrot.lane.b32.xlu1 %v5476_v2, %s5874_s25  ;;  %v3940_v27 = vsub.f32 0.0, %v3939_v24  ;;  %s5885_s25 = smov 113  }
 0xc2d   : > { %v3941_v55 = vmul.f32 1.442695, %v3940_v27 }
 0xc2f   : > { %4155 = vrot.lane.b32.xlu1 %v7027_v30, %s5869_s26  ;;  %5636 = vpow2.f32 %v3941_v55 }
 0xc33   : > { %4177 = vrot.lane.b32.xlu1 %v4175_v35, %s5886_s1 }
 0xc39   : > { %v5637_v12 = vpop.eup %5636 }
 0xc3a   : > { %v3943_v31 = vadd.f32 1.0, %v5637_v12 }
 0xc3c   : > { %5638 = vlog2.f32 %v3943_v31 }
 0xc46   : > { %v5639_v63 = vpop.eup %5638 }
 0xc47   : > { %v3945_v4 = vmul.f32 0.6931472, %v5639_v63 }
 0xc49   : > { %v3946_v13 = vadd.f32 %v3945_v4, %v3938_v43 }
 0xc4b   : > { %5640 = vtanh.f32 %v3946_v13 }
 0xc55   : > { %v5641_v54 = vpop.eup %5640 }
 0xc56   : > { %v3948_v16 = vmul.f32 %v5641_v54, %v3937_v10 }
 0xc99   : > { %v3951_v59 = vpop.permute.xlu1 %3950 }
 0xc9a   : > { %v3953_v58 = vadd.f32 %v3951_v59, %v3948_v16 }
 0xc9c   : > { %4885 = vmatmul.mubr.msk.f32.vlgmr.msra.gmra.mrb[36].mxu0 %vm3973_vm10, %v3953_v58 }
 0xc9d   : > { %4891 = vmatprep.mubr.msk.f32.mxu0 %vm5878_vm14, %v5879_v51  ;;  %v5478_v36 = vpop.permute.xlu1 %5477 }
 0xc9e   : > { %v5480_v45 = vunpack.i.h.bf16 %v5478_v36  ;;  %v5479_v17 = vunpack.i.l.bf16 %v5478_v36 }
 0xca0   : > { %v4957_v19 = vpack.c.bf16 %v5480_v45, %v5479_v17 }
 0xca1   : > { %v4156_v26 = vpop.permute.xlu1 %4155 }
 0xca2   : > { %4959 = vmatpush3.bf16.msk.msra.mxu0 %vm7054_vm9, %v4957_v19 }
 0xca3   : > { %4899 = vmatprep.subr.mxu0 %v5879_v51 }
 0xca5   : > { %v4178_v53 = vpop.permute.xlu1 %4177 }
 0xca6   : > { %4895 = vmatpush3.msk.msra.mxu1 %vm3977_vm8, %v4178_v53 }
 0xd6f   : > { %v4046_v25 = vpop.f32.mrb[36].mxu0 }
 0xd70   : > { %4066 = vrot.lane.b32.xlu0 %v4046_v25, %s5885_s25  ;;  %v4886_v62 = vpop.f32.mrb[37].mxu0  ;;  %v4053_v28 = vadd.f32 %v4051_v23, %v4046_v25  ;;  %s630_s25 = scalar_lea.vmem %s7198_s23, %s4723_s4 }
 0xd72   : > { %v4055_v41 = vand.u32 2147483647, %v4053_v28  ;;  %v4054_v52 = vmax.f32 %v4053_v28, 0.0 }
 0xd74   : > { %v4056_v47 = vsub.f32 0.0, %v4055_v41 }
 0xd76   : > { %v4057_v29 = vmul.f32 1.442695, %v4056_v47 }
 0xd78   : > { %5642 = vpow2.f32 %v4057_v29 }
 0xd82   : > { %v5643_v1 = vpop.eup %5642 }
 0xd83   : > { %v4059_v48 = vadd.f32 1.0, %v5643_v1 }
 0xd85   : > { %5644 = vlog2.f32 %v4059_v48 }
 0xd8f   : > { %v5645_v49 = vpop.eup %5644 }
 0xd90   : > { %v4061_v50 = vmul.f32 0.6931472, %v5645_v49 }
 0xd92   : > { %v4062_v8 = vadd.f32 %v4061_v50, %v4054_v52 }
 0xd94   : > { %5646 = vtanh.f32 %v4062_v8 }
 0xd9e   : > { %v5647_v11 = vpop.eup %5646 }
 0xd9f   : > { %v4064_v34 = vmul.f32 %v5647_v11, %v4053_v28 }
 0xde2   : > { %v4067_v9 = vpop.permute.xlu0 %4066 }
 0xde3   : > { %v4069_v60 = vadd.f32 %v4067_v9, %v4064_v34 }
 0xde5   : > { %4892 = vmatmul.mubr.msk.f32.vlgmr.msra.gmra.mrb[38].mxu0 %vm4079_vm11, %v4069_v60 }
 0xde6   : > { %4901 = vmatprep.mubr.msk.f32.mxu0 %vm5878_vm14, %v5879_v51  ;;  %v4275_v51 = vld [vmem:[%s7165_s15 + $0x8] sm:$0x7]  ;;  %vm4279_vm14 = vcmask 23552  }
 0xeb8   : > { %v4151_v46 = vpop.f32.mrb[38].mxu0 }
 0xeb9   : > { %v4158_v18 = vadd.f32 %v4156_v26, %v4151_v46  ;;  %4171 = vrot.lane.b32.xlu0 %v4151_v46, %s5887_s0  ;;  %v4893_v56 = vpop.f32.mrb[39].mxu0 }
 0xebb   : > { %v4160_v57 = vand.u32 2147483647, %v4158_v18  ;;  %v4159_v6 = vmax.f32 %v4158_v18, 0.0 }
 0xebd   : > { %4255 = vrot.lane.b32.xlu0 %v7027_v30, %s5888_s28  ;;  %v4161_v3 = vsub.f32 0.0, %v4160_v57 }
 0xebf   : > { %v4162_v15 = vmul.f32 1.442695, %v4161_v3 }
 0xec1   : > { %4277 = vrot.lane.b32.xlu0 %v4275_v51, %s5869_s26  ;;  %5648 = vpow2.f32 %v4162_v15  ;;  %s5890_s26 = smov 125  }
 0xec5   : > { %4367 = vrot.lane.b32.xlu0 %v6862_v32, %s5868_s16 }
 0xec9   : > { %4371 = vrot.lane.b32.xlu0 %v6870_v21, %s5868_s16 }
 0xecb   : > { %v5649_v14 = vpop.eup %5648 }
 0xecc   : > { %v4164_v33 = vadd.f32 1.0, %v5649_v14 }
 0xecd   : > { %4379 = vrot.lane.b32.xlu0 %v6862_v32, %s5870_s24 }
 0xece   : > { %5650 = vlog2.f32 %v4164_v33 }
 0xed1   : > { %4383 = vrot.lane.b32.xlu0 %v6870_v21, %s5870_s24 }
 0xed5   : > { %4391 = vrot.lane.b32.xlu0 %v6862_v32, %s5889_s19 }
 0xed8   : > { %v5651_v37 = vpop.eup %5650 }
 0xed9   : > { %4395 = vrot.lane.b32.xlu0 %v6870_v21, %s5889_s19  ;;  %v4166_v42 = vmul.f32 0.6931472, %v5651_v37 }
 0xedb   : > { %v4167_v7 = vadd.f32 %v4166_v42, %v4159_v6 }
 0xedd   : > { %5652 = vtanh.f32 %v4167_v7 }
 0xee7   : > { %v5653_v20 = vpop.eup %5652 }
 0xee8   : > { %v4169_v5 = vmul.f32 %v5653_v20, %v4158_v18 }
 0xf2b   : > { %v4172_v0 = vpop.permute.xlu0 %4171 }
 0xf2c   : > { %v4174_v39 = vadd.f32 %v4172_v0, %v4169_v5 }
 0xf2e   : > { %4897 = vmatmul.mubr.msk.f32.vlgmr.msra.gmra.mrb[34].mxu1 %vm4179_vm12, %v4174_v39 }
 0xf2f   : > { %v4256_v38 = vpop.permute.xlu0 %4255 }
 0xf33   : > { %v4278_v44 = vpop.permute.xlu0 %4277 }
 0xf34   : > { %4900 = vmatpush3.msk.msra.mxu0 %vm4283_vm13, %v4278_v44 }
 0xf37   : > { %v4368_v29 = vpop.permute.xlu0 %4367 }
 0xf3b   : > { %v4372_v48 = vpop.permute.xlu0 %4371 }
 0xf3f   : > { %v4380_v50 = vpop.permute.xlu0 %4379 }
 0xf43   : > { %v4384_v8 = vpop.permute.xlu0 %4383 }
 0xf47   : > { %v4392_v34 = vpop.permute.xlu0 %4391 }
 0xf4b   : > { %v4396_v56 = vpop.permute.xlu0 %4395 }
0x1001   : > { %v4251_v2 = vpop.f32.mrb[34].mxu1 }
0x1002   : > { %4271 = vrot.lane.b32.xlu1 %v4251_v2, %s5890_s26  ;;  %v4898_v10 = vpop.f32.mrb[35].mxu1  ;;  %v4258_v24 = vadd.f32 %v4256_v38, %v4251_v2 }
0x1004   : > { %v4259_v43 = vmax.f32 %v4258_v24, 0.0 }
0x1006   : > { %4356 = vrot.lane.b32.xlu1 %v7027_v30, %s5891_s20  ;;  %v4260_v30 = vand.u32 2147483647, %v4258_v24 }
0x1008   : > { %v4261_v27 = vsub.f32 0.0, %v4260_v30 }
0x100a   : > { %4369 = vrot.lane.b32.xlu1 %v6864_v61, %s5868_s16  ;;  %v4262_v55 = vmul.f32 1.442695, %v4261_v27 }
0x100c   : > { %5654 = vpow2.f32 %v4262_v55 }
0x100e   : > { %4373 = vrot.lane.b32.xlu1 %v6872_v22, %s5868_s16 }
0x1012   : > { %4381 = vrot.lane.b32.xlu1 %v6864_v61, %s5870_s24 }
0x1016   : > { %4385 = vrot.lane.b32.xlu1 %v6872_v22, %s5870_s24  ;;  %v5655_v12 = vpop.eup %5654 }
0x1017   : > { %v4264_v31 = vadd.f32 1.0, %v5655_v12 }
0x1019   : > { %5656 = vlog2.f32 %v4264_v31 }
0x101a   : > { %4393 = vrot.lane.b32.xlu1 %v6864_v61, %s5889_s19 }
0x101e   : > { %4397 = vrot.lane.b32.xlu1 %v6872_v22, %s5889_s19 }
0x1023   : > { %v5657_v63 = vpop.eup %5656 }
0x1024   : > { %v4266_v4 = vmul.f32 0.6931472, %v5657_v63 }
0x1026   : > { %v4267_v13 = vadd.f32 %v4266_v4, %v4259_v43 }
0x1028   : > { %5658 = vtanh.f32 %v4267_v13 }
0x1032   : > { %v5659_v54 = vpop.eup %5658 }
0x1033   : > { %v4269_v16 = vmul.f32 %v5659_v54, %v4258_v24 }
0x1074   : > { %v4272_v59 = vpop.permute.xlu1 %4271 }
0x1075   : > { %v4274_v58 = vadd.f32 %v4272_v59, %v4269_v16 }
0x1077   : > { %4902 = vmatmul.mubr.msk.f32.vlgmr.msra.gmra.mrb[40].mxu0 %vm4279_vm14, %v4274_v58 }
0x1078   : > { %v4357_v36 = vpop.permute.xlu1 %4356 }
0x107c   : > { %v4370_v47 = vpop.permute.xlu1 %4369 }
0x107d   : > { %v4376_v9 = vsel %vm1132_vm4, %v4370_v47, %v4372_v48  ;;  %v4377_v60 = vsel %vm1132_vm4, %v4368_v29, %v4370_v47 }
0x107e   : > { %v4404_v51 = vadd.f32 %v6862_v32, %v4377_v60  ;;  %v4405_v57 = vadd.f32 %v6864_v61, %v4376_v9  ;;  %v4420_v12 = vmax.f32 %v6862_v32, %v4377_v60  ;;  %v4421_v31 = vmax.f32 %v6864_v61, %v4376_v9 }
0x1080   : > { %v4374_v1 = vpop.permute.xlu1 %4373 }
0x1081   : > { %v4375_v35 = vsel %vm1132_vm4, %v4372_v48, %v4374_v1  ;;  %v4378_v26 = vsel %vm1132_vm4, %v4374_v1, %v4368_v29 }
0x1082   : > { %v4406_v14 = vadd.f32 %v6870_v21, %v4375_v35  ;;  %v4407_v33 = vadd.f32 %v6872_v22, %v4378_v26  ;;  %v4422_v63 = vmax.f32 %v6870_v21, %v4375_v35  ;;  %v4423_v40 = vmax.f32 %v6872_v22, %v4378_v26 }
0x1084   : > { %v4382_v49 = vpop.permute.xlu1 %4381 }
0x1085   : > { %v4388_v53 = vsel %vm1492_vm6, %v4382_v49, %v4384_v8  ;;  %v4389_v46 = vsel %vm1492_vm6, %v4380_v50, %v4382_v49 }
0x1086   : > { %v4408_v6 = vadd.f32 %v4404_v51, %v4389_v46  ;;  %v4409_v7 = vadd.f32 %v4405_v57, %v4388_v53 }
0x1088   : > { %v4386_v52 = vpop.permute.xlu1 %4385 }
0x1089   : > { %v4387_v3 = vsel %vm1492_vm6, %v4384_v8, %v4386_v52  ;;  %v4390_v15 = vsel %vm1492_vm6, %v4386_v52, %v4380_v50 }
0x108a   : > { %v4410_v0 = vadd.f32 %v4406_v14, %v4387_v3  ;;  %v4411_v39 = vadd.f32 %v4407_v33, %v4390_v15 }
0x108c   : > { %v4394_v11 = vpop.permute.xlu1 %4393 }
0x108d   : > { %v4401_v37 = vsel %vm4399_vm15, %v4394_v11, %v4396_v56  ;;  %v4402_v42 = vsel %vm4399_vm15, %v4392_v34, %v4394_v11 }
0x108e   : > { %v4412_v38 = vadd.f32 %v4408_v6, %v4402_v42  ;;  %v4413_v44 = vadd.f32 %v4409_v7, %v4401_v37  ;;  %v4424_v2 = vmax.f32 %v4389_v46, %v4402_v42  ;;  %v4425_v30 = vmax.f32 %v4388_v53, %v4401_v37 }
0x1090   : > { %v4398_v18 = vpop.permute.xlu1 %4397  ;;  %v4416_v4 = vmul.f32 0.25, %v4412_v38  ;;  %v4417_v43 = vmul.f32 0.25, %v4413_v44  ;;  %v4428_v13 = vmax.f32 %v4420_v12, %v4424_v2  ;;  %v4429_v58 = vmax.f32 %v4421_v31, %v4425_v30 }
0x1091   : > { %v4400_v20 = vsel %vm4399_vm15, %v4396_v56, %v4398_v18  ;;  %v4403_v5 = vsel %vm4399_vm15, %v4398_v18, %v4392_v34 }
0x1092   : > { %v4414_v10 = vadd.f32 %v4410_v0, %v4400_v20  ;;  %v4415_v24 = vadd.f32 %v4411_v39, %v4403_v5  ;;  %v4426_v27 = vmax.f32 %v4387_v3, %v4400_v20  ;;  %v4427_v55 = vmax.f32 %v4390_v15, %v4403_v5 }
0x1094   : > { %v4418_v54 = vmul.f32 0.25, %v4414_v10  ;;  %v4419_v16 = vmul.f32 0.25, %v4415_v24 }
0x114a   : > { %v4352_v45 = vpop.f32.mrb[40].mxu0 }
0x114b   : > { %v4359_v17 = vadd.f32 %v4357_v36, %v4352_v45  ;;  %v4903_v19 = vpop.f32.mrb[41].mxu0  ;;  %v4430_v36 = vmax.f32 %v4422_v63, %v4426_v27  ;;  %v4431_v45 = vmax.f32 %v4423_v40, %v4427_v55 }
0x114d   : > { %v4360_v25 = vsub.f32 0.0, %v4359_v17 }
0x114f   : > { %v4361_v62 = vmul.f32 1.442695, %v4360_v25 }
0x1151   : > { %5660 = vpow2.f32 %v4361_v62 }
0x115b   : > { %v5661_v23 = vpop.eup %5660 }
0x115c   : > { %v4363_v28 = vadd.f32 1.0, %v5661_v23 }
0x115e   : > { %5662 = vrcp.f32 %v4363_v28 }
0x1168   : > { %v5663_v41 = vpop.eup %5662 }
0x1169   : > { %5076 = vpush %v5663_v41 }
0x119a   : > { %s5077_s16 = spop %5076 }
0x119b   : > { %v4432_v59 = vstv %s5077_s16  ;;  %s4437_s24 = ssub.f32 1.0, %s5077_s16 }
0x119c   : > { %v4433_v17 = vmul.f32 %v4432_v59, %v4416_v4  ;;  %v4434_v32 = vmul.f32 %v4432_v59, %v4417_v43  ;;  %v4435_v19 = vmul.f32 %v4432_v59, %v4418_v54  ;;  %v4436_v61 = vmul.f32 %v4432_v59, %v4419_v16 }
0x119d   : > { %v4438_v25 = vstv %s4437_s24 }
0x119e   : > { %v4439_v21 = vmul.f32 %v4438_v25, %v4428_v13  ;;  %v4440_v62 = vmul.f32 %v4438_v25, %v4429_v58  ;;  %v4441_v22 = vmul.f32 %v4438_v25, %v4430_v36  ;;  %v4442_v23 = vmul.f32 %v4438_v25, %v4431_v45 }
0x11a0   : > { %v4443_v28 = vadd.f32 %v4439_v21, %v4433_v17  ;;  %v4444_v41 = vadd.f32 %v4440_v62, %v4434_v32  ;;  %v4445_v47 = vadd.f32 %v4441_v22, %v4435_v19  ;;  %v4446_v29 = vadd.f32 %v4442_v23, %v4436_v61 }
0x11a2   : > { %4447 = vst [vmem:[%s630_s25] sm:$0xff] %v4443_v28  ;;  %4448 = vst [vmem:[%s630_s25 + $0x8] sm:$0xff] %v4444_v41 }
0x11a3   : > { %4449 = vst [vmem:[%s630_s25 + $0x10] sm:$0xff] %v4445_v47  ;;  %4450 = vst [vmem:[%s630_s25 + $0x18] sm:$0xff] %v4446_v29 }
0x11a4 PF: > { %s7199_s27 = sld [smem:[#allocation16_spill]] }
0x11aa   : > { %s31_s24 = sadd.s32 1, %s7199_s27  }
0x11ab   : > { %p28_p9 = scmp.ge.s32.totalorder %s31_s24, 4  }
0x11ad   :  { %30 = sbr.rel (!%p28_p9) target bundleno = 11 (0xb), region = 155 }
0x11b4   :  { %4472 = vsyncpa [#allocation3], 1 }
0x11b5   :  { %4474 = vsyncpa [#allocation3 + $0x1], 1 }
0x11b6   :  { %4475 = vsyncpa [#allocation5], 1 }
0x11b7   :  { %4476 = vsyncpa [#allocation8], 1 }
0x11b8   :  { %4477 = vsyncpa [#allocation11], 1 }

</bundles_post_ra>
